<compile_context>
chip_gen: v5e
topology: v5e:2x2
jax: 0.10.0
libtpu: 0.0.40
codegen_flags: <defaults>
</compile_context>

<pallas_src>
import numpy as np
import jax
import jax.numpy as jnp
from jax.experimental import pallas as pl
from jax.experimental.pallas import tpu as pltpu


# ----------------------------------------------------------------------------
# Host-side constant builders (numpy).
# ----------------------------------------------------------------------------
def make_interp_matrix(n_out, n_in):
    """1-D bilinear interpolation matrix, align_corners=True (torch semantics)."""
    A = np.zeros((n_out, n_in), np.float32)
    if n_out == 1:
        A[0, 0] = 1.0
        return A
    for i in range(n_out):
        src = i * (n_in - 1) / (n_out - 1)
        i0 = min(max(int(np.floor(src)), 0), n_in - 1)
        i1 = min(i0 + 1, n_in - 1)
        f = src - i0
        A[i, i0] += 1.0 - f
        A[i, i1] += f
    return A


def make_upsample_matrix(Hl, Wl):
    """(Hl/2*Wl/2, Hl*Wl) flat operator: low_flat @ U == bilinear x2 upsample."""
    Hi, Wi = Hl // 2, Wl // 2
    Ah = make_interp_matrix(Hl, Hi)          # (Hl, Hi)
    Aw = make_interp_matrix(Wl, Wi)          # (Wl, Wi)
    U = np.kron(Ah, Aw).T.astype(np.float32)  # (Hi*Wi, Hl*Wl)
    return jnp.asarray(U)


def make_pool_matrix(Hl, Wl):
    """(Hl*Wl, Hl/2*Wl/2) one-hot compaction: picks flat index (2ho, 2wo)."""
    Hh, Wh = Hl // 2, Wl // 2
    G = np.zeros((Hl * Wl, Hh * Wh), np.float32)
    for ho in range(Hh):
        for wo in range(Wh):
            G[(2 * ho) * Wl + 2 * wo, ho * Wh + wo] = 1.0
    return jnp.asarray(G)


def _full_spec(arr):
    nd = arr.ndim
    return pl.BlockSpec(arr.shape, lambda n, _nd=nd: (0,) * _nd)


# ----------------------------------------------------------------------------
# Fused Hourglass forward: one pallas_call, grid over batch.
# Activations live as (C, H*W) f32 values inside the kernel.
# ----------------------------------------------------------------------------
def hourglass_pallas(x_nchw, params, depth):
    N, C, H, W = x_nchw.shape
    HW = H * W
    Ch = C // 2
    R = params['w1'].shape[0]
    assert R == 3 * depth + 1

    # Kernel-layout weights (stacked over the R resblocks, traversal order).
    w1 = params['w1']                                   # (R, Ch, C)
    b1 = params['b1'][:, :, None]                       # (R, Ch, 1)
    # w3p[r, (kh*3+kw)*Ch + co, ci] = torch_w3[r, co, ci, kh, kw]
    w3p = jnp.transpose(params['w3'], (0, 3, 4, 1, 2)).reshape(R, 9 * Ch, Ch)
    b3 = params['b3'][:, :, None]                       # (R, Ch, 1)
    w2 = params['w2']                                   # (R, C, Ch)
    b2 = params['b2'][:, :, None]                       # (R, C, 1)

    # Per-level constant operators.
    g_mats, u_mats = [], []
    for lvl in range(depth):
        Hl, Wl = H >> lvl, W >> lvl
        g_mats.append(make_pool_matrix(Hl, Wl))
        u_mats.append(make_upsample_matrix(Hl, Wl))

    def kernel(*refs):
        x_ref = refs[0]
        w1_ref, b1_ref, w3p_ref, b3_ref, w2_ref, b2_ref = refs[1:7]
        g_refs = refs[7:7 + depth]
        u_refs = refs[7 + depth:7 + 2 * depth]
        o_ref = refs[7 + 2 * depth]

        idx_cache = {}

        def hw_indices(Hc, Wc):
            k = (Hc, Wc)
            if k not in idx_cache:
                HWc = Hc * Wc
                pos = jax.lax.broadcasted_iota(jnp.int32, (1, HWc), 1)
                if Wc & (Wc - 1) == 0:           # power-of-two width: bit ops
                    sh = Wc.bit_length() - 1
                    hh = pos >> sh
                    ww = pos & (Wc - 1)
                else:
                    hh = pos // Wc
                    ww = pos - hh * Wc
                idx_cache[k] = (hh, ww)
            return idx_cache[k]

        mask_cache = {}

        def tap_mask(Hc, Wc, dy, dx):
            k = (Hc, Wc, dy, dx)
            if k not in mask_cache:
                hh, ww = hw_indices(Hc, Wc)
                valid = None

                def _and(a, b):
                    return b if a is None else a & b

                if dy < 0:
                    valid = _and(valid, hh >= -dy)
                if dy > 0:
                    valid = _and(valid, hh < Hc - dy)
                if dx < 0:
                    valid = _and(valid, ww >= -dx)
                if dx > 0:
                    valid = _and(valid, ww < Wc - dx)
                mask_cache[k] = valid
            return mask_cache[k]

        def shift_lanes(v, s):
            """y[:, p] = v[:, (p + s) mod n]  (static shift along the lane dim)."""
            n = v.shape[-1]
            k = s % n
            if k == 0:
                return v
            return jnp.concatenate([v[:, k:], v[:, :k]], axis=-1)

        def resblock(xv, r, Hc, Wc):
            # conv1x1 + ReLU:  (Ch, C) @ (C, HW) -> lane-dense (Ch, HW)
            y1 = jnp.dot(w1_ref[r], xv, preferred_element_type=jnp.float32)
            y1 = jnp.maximum(y1 + b1_ref[r], 0.0)

            # conv3x3 (pad=1): one channel-mixing matmul for all 9 taps,
            # then spatial gather via lane shifts + edge masks.
            z = jnp.dot(w3p_ref[r], y1, preferred_element_type=jnp.float32)  # (9Ch, HW)
            acc = None
            t = 0
            for dy in (-1, 0, 1):
                for dx in (-1, 0, 1):
                    zt = z[t * Ch:(t + 1) * Ch, :]
                    if dy == 0 and dx == 0:
                        contrib = zt
                    else:
                        shifted = shift_lanes(zt, dy * Wc + dx)
                        contrib = jnp.where(tap_mask(Hc, Wc, dy, dx), shifted, 0.0)
                    acc = contrib if acc is None else acc + contrib
                    t += 1
            y3 = acc + b3_ref[r]

            # final conv1x1 + identity residual
            out = jnp.dot(w2_ref[r], y3, preferred_element_type=jnp.float32) + b2_ref[r]
            return xv + out

        def maxpool(xv, g_ref, Wc):
            # 2x2/stride-2: pairwise max (VPU) + lane-dense compaction matmul.
            m = jnp.maximum(xv, shift_lanes(xv, 1))
            m = jnp.maximum(m, shift_lanes(m, Wc))
            return jnp.dot(m, g_ref[...], preferred_element_type=jnp.float32)

        def upsample_add(low, up, u_ref):
            # bilinear x2 (align_corners=True) + up1 residual, one matmul.
            return up + jnp.dot(low, u_ref[...], preferred_element_type=jnp.float32)

        counter = [0]

        def next_r():
            r = counter[0]
            counter[0] += 1
            return r

        def level(xv, d, Hc, Wc):
            lvl = depth - d
            up1 = resblock(xv, next_r(), Hc, Wc)
            low1 = resblock(maxpool(xv, g_refs[lvl], Wc), next_r(), Hc // 2, Wc // 2)
            if d == 1:
                low2 = resblock(low1, next_r(), Hc // 2, Wc // 2)
            else:
                low2 = level(low1, d - 1, Hc // 2, Wc // 2)
            low3 = resblock(low2, next_r(), Hc // 2, Wc // 2)
            return upsample_add(low3, up1, u_refs[lvl])

        o_ref[0] = level(x_ref[0], depth, H, W)

    # --- cost estimate (advisory) ------------------------------------------
    def _rb_flops(hw):
        return 2 * hw * (2 * Ch * C + 9 * Ch * Ch) + 12 * hw * Ch

    flops = 0
    for lvl in range(depth):
        h_, w_ = H >> lvl, W >> lvl
        hw, hwq = h_ * w_, (h_ * w_) // 4
        flops += _rb_flops(hw) + 2 * _rb_flops(hwq)
        flops += 2 * hw * hwq * C      # pool compaction matmul
        flops += 2 * hwq * hw * C      # upsample matmul
    flops += _rb_flops((H >> depth) * (W >> depth))
    flops *= N

    inputs = [x_nchw.reshape(N, C, HW), w1, b1, w3p, b3, w2, b2] + g_mats + u_mats
    bytes_accessed = int(sum(a.size * a.dtype.itemsize for a in inputs) + N * C * HW * 4)

    in_specs = [pl.BlockSpec((1, C, HW), lambda n: (n, 0, 0))]
    in_specs += [_full_spec(a) for a in inputs[1:]]

    out_flat = pl.pallas_call(
        kernel,
        out_shape=jax.ShapeDtypeStruct((N, C, HW), jnp.float32),
        grid=(N,),
        in_specs=in_specs,
        out_specs=pl.BlockSpec((1, C, HW), lambda n: (n, 0, 0)),
        compiler_params=pltpu.CompilerParams(dimension_semantics=("parallel",)),
        cost_estimate=pl.CostEstimate(flops=int(flops), transcendentals=0,
                                      bytes_accessed=bytes_accessed),
    )(*inputs)
    return out_flat.reshape(N, C, H, W)


# ----------------------------------------------------------------------------
# Parameter init (PyTorch conv layout, stacked over the R resblocks in forward
# traversal order: up1, low1, [inner...], low3 at every level).
# ----------------------------------------------------------------------------
def init_params(key, depth, mid):
    R = 3 * depth + 1
    ch = mid // 2
    ks = jax.random.split(key, 6)
    s = 0.2
    return {
        'w1': jax.random.normal(ks[0], (R, ch, mid), jnp.float32) * s,      # Conv2d(mid,ch,1).weight[:,:,0,0]
        'b1': jax.random.normal(ks[1], (R, ch), jnp.float32) * 0.01,
        'w3': jax.random.normal(ks[2], (R, ch, ch, 3, 3), jnp.float32) * s, # Conv2d(ch,ch,3,pad=1).weight
        'b3': jax.random.normal(ks[3], (R, ch), jnp.float32) * 0.01,
        'w2': jax.random.normal(ks[4], (R, mid, ch), jnp.float32) * s,      # Conv2d(ch,mid,1).weight[:,:,0,0]
        'b2': jax.random.normal(ks[5], (R, mid), jnp.float32) * 0.01,
    }


# ----------------------------------------------------------------------------
# Pure-JAX reference (XLA) for a tolerance check.
# ----------------------------------------------------------------------------
def ref_hourglass(x, params, depth):
    P = jax.lax.Precision.HIGHEST

    def conv1x1(x, w, b):
        return jnp.einsum('oc,nchw->nohw', w, x, precision=P) + b[None, :, None, None]

    def conv3x3(x, w, b):
        Np, Ci, Hc, Wc = x.shape
        xp = jnp.pad(x, ((0, 0), (0, 0), (1, 1), (1, 1)))
        acc = 0.0
        for kh in range(3):
            for kw in range(3):
                acc = acc + jnp.einsum('oc,nchw->nohw', w[:, :, kh, kw],
                                       xp[:, :, kh:kh + Hc, kw:kw + Wc], precision=P)
        return acc + b[None, :, None, None]

    def pool(x):
        n, c, h, w = x.shape
        return jnp.max(x.reshape(n, c, h // 2, 2, w // 2, 2), axis=(3, 5))

    def upsample(x):
        n, c, h, w = x.shape
        Ah = jnp.asarray(make_interp_matrix(2 * h, h))
        Aw = jnp.asarray(make_interp_matrix(2 * w, w))
        return jnp.einsum('oh,pw,nchw->ncop', Ah, Aw, x, precision=P)

    counter = [0]

    def rb(x):
        r = counter[0]
        counter[0] += 1
        y = conv1x1(x, params['w1'][r], params['b1'][r])
        y = jnp.maximum(y, 0.0)
        y = conv3x3(y, params['w3'][r], params['b3'][r])
        y = conv1x1(y, params['w2'][r], params['b2'][r])
        return x + y

    def level(x, d):
        up1 = rb(x)
        low1 = rb(pool(x))
        low2 = rb(low1) if d == 1 else level(low1, d - 1)
        low3 = rb(low2)
        return up1 + upsample(low3)

    return level(x, depth)


if __name__ == "__main__":
    N, C, H, W = 2, 4, 16, 16
    DEPTH = 2

    key = jax.random.PRNGKey(0)
    kx, kp = jax.random.split(key)

    x_nchw = jax.random.normal(kx, (N, C, H, W), jnp.float32)
    params = init_params(kp, DEPTH, C)

    run = jax.jit(hourglass_pallas, static_argnums=(2,))
    out = run(x_nchw, params, DEPTH)
    out = jax.block_until_ready(out)

    assert out.shape == (N, C, H, W), out.shape
    assert bool(jnp.all(jnp.isfinite(out)))

    ref = ref_hourglass(x_nchw, params, DEPTH)
    max_err = float(jnp.max(jnp.abs(out - ref)))
    assert max_err < 5e-2, f"mismatch vs pure-JAX reference: {max_err}"

    print("KERNEL_OK")
</pallas_src>

<mosaic_0001>
module attributes {stable_mosaic.version = 11 : i64} {
  func.func @kernel(%arg0: i32, %arg1: memref<1x4x256xf32, #tpu.memory_space<vmem>>, %arg2: memref<7x2x4xf32, #tpu.memory_space<vmem>>, %arg3: memref<7x2x1xf32, #tpu.memory_space<vmem>>, %arg4: memref<7x18x2xf32, #tpu.memory_space<vmem>>, %arg5: memref<7x2x1xf32, #tpu.memory_space<vmem>>, %arg6: memref<7x4x2xf32, #tpu.memory_space<vmem>>, %arg7: memref<7x4x1xf32, #tpu.memory_space<vmem>>, %arg8: memref<256x64xf32, #tpu.memory_space<vmem>>, %arg9: memref<64x16xf32, #tpu.memory_space<vmem>>, %arg10: memref<64x256xf32, #tpu.memory_space<vmem>>, %arg11: memref<16x64xf32, #tpu.memory_space<vmem>>, %arg12: memref<1x4x256xf32, #tpu.memory_space<vmem>>) attributes {dimension_semantics = [#tpu.dimension_semantics<parallel>], iteration_bounds = array<i64: 2>, scalar_prefetch = 0 : i64, scratch_operands = 0 : i64, tpu.core_type = #tpu.core_type<tc>, window_params = [{transform_indices = @transform_0, window_bounds = array<i64: 1, 4, 256>}, {pipeline_mode = #tpu.pipeline_mode<synchronous>, transform_indices = @transform_1, window_bounds = array<i64: 7, 2, 4>}, {pipeline_mode = #tpu.pipeline_mode<synchronous>, transform_indices = @transform_2, window_bounds = array<i64: 7, 2, 1>}, {pipeline_mode = #tpu.pipeline_mode<synchronous>, transform_indices = @transform_3, window_bounds = array<i64: 7, 18, 2>}, {pipeline_mode = #tpu.pipeline_mode<synchronous>, transform_indices = @transform_4, window_bounds = array<i64: 7, 2, 1>}, {pipeline_mode = #tpu.pipeline_mode<synchronous>, transform_indices = @transform_5, window_bounds = array<i64: 7, 4, 2>}, {pipeline_mode = #tpu.pipeline_mode<synchronous>, transform_indices = @transform_6, window_bounds = array<i64: 7, 4, 1>}, {pipeline_mode = #tpu.pipeline_mode<synchronous>, transform_indices = @transform_7, window_bounds = array<i64: 256, 64>}, {pipeline_mode = #tpu.pipeline_mode<synchronous>, transform_indices = @transform_8, window_bounds = array<i64: 64, 16>}, {pipeline_mode = #tpu.pipeline_mode<synchronous>, transform_indices = @transform_9, window_bounds = array<i64: 64, 256>}, {pipeline_mode = #tpu.pipeline_mode<synchronous>, transform_indices = @transform_10, window_bounds = array<i64: 16, 64>}, {transform_indices = @transform_11, window_bounds = array<i64: 1, 4, 256>}]} {
    %c0 = arith.constant 0 : index
    %c0_0 = arith.constant 0 : index
    %c0_1 = arith.constant 0 : index
    %0 = vector.load %arg1[%c0, %c0_0, %c0_1] : memref<1x4x256xf32, #tpu.memory_space<vmem>>, vector<1x4x256xf32>
    %1 = vector.shape_cast %0 : vector<1x4x256xf32> to vector<4x256xf32>
    %c0_2 = arith.constant 0 : index
    %c0_3 = arith.constant 0 : index
    %c0_4 = arith.constant 0 : index
    %2 = vector.load %arg2[%c0_2, %c0_3, %c0_4] : memref<7x2x4xf32, #tpu.memory_space<vmem>>, vector<1x2x4xf32>
    %3 = vector.shape_cast %2 : vector<1x2x4xf32> to vector<2x4xf32>
    %cst = arith.constant dense<0.000000e+00> : vector<2x256xf32>
    %4 = tpu.matmul %3, %1, %cst {dimension_numbers = #tpu.dot_dimension_numbers<[1], [0], [0], [1], [0, 0, 1, 1], [], []>} : vector<2x4xf32>, vector<4x256xf32>, vector<2x256xf32> -> vector<2x256xf32>
    %c0_5 = arith.constant 0 : index
    %c0_6 = arith.constant 0 : index
    %c0_7 = arith.constant 0 : index
    %5 = vector.load %arg3[%c0_5, %c0_6, %c0_7] : memref<7x2x1xf32, #tpu.memory_space<vmem>>, vector<1x2x1xf32>
    %6 = vector.shape_cast %5 : vector<1x2x1xf32> to vector<2x1xf32>
    %7 = vector.broadcast %6 : vector<2x1xf32> to vector<2x256xf32>
    %8 = arith.addf %4, %7 : vector<2x256xf32>
    %cst_8 = arith.constant 0.000000e+00 : f32
    %9 = vector.broadcast %cst_8 : f32 to vector<2x256xf32>
    %10 = arith.maximumf %8, %9 : vector<2x256xf32>
    %c0_9 = arith.constant 0 : index
    %c0_10 = arith.constant 0 : index
    %c0_11 = arith.constant 0 : index
    %11 = vector.load %arg4[%c0_9, %c0_10, %c0_11] : memref<7x18x2xf32, #tpu.memory_space<vmem>>, vector<1x18x2xf32>
    %12 = vector.shape_cast %11 : vector<1x18x2xf32> to vector<18x2xf32>
    %cst_12 = arith.constant dense<0.000000e+00> : vector<18x256xf32>
    %13 = tpu.matmul %12, %10, %cst_12 {dimension_numbers = #tpu.dot_dimension_numbers<[1], [0], [0], [1], [0, 0, 1, 1], [], []>} : vector<18x2xf32>, vector<2x256xf32>, vector<18x256xf32> -> vector<18x256xf32>
    %14 = vector.extract_strided_slice %13 {offsets = [0, 0], sizes = [2, 256], strides = [1, 1]} : vector<18x256xf32> to vector<2x256xf32>
    %15 = vector.extract_strided_slice %14 {offsets = [0, 239], sizes = [2, 17], strides = [1, 1]} : vector<2x256xf32> to vector<2x17xf32>
    %16 = vector.extract_strided_slice %14 {offsets = [0, 0], sizes = [2, 239], strides = [1, 1]} : vector<2x256xf32> to vector<2x239xf32>
    %17 = tpu.concatenate %15, %16 in 1 : vector<2x17xf32>, vector<2x239xf32> -> vector<2x256xf32>
    %18 = tpu.iota {dimensions = array<i32: 1>} : vector<1x256xi32>
    %c4_i32 = arith.constant 4 : i32
    %19 = vector.broadcast %c4_i32 : i32 to vector<1x256xi32>
    %20 = arith.shrsi %18, %19 : vector<1x256xi32>
    %c15_i32 = arith.constant 15 : i32
    %21 = vector.broadcast %c15_i32 : i32 to vector<1x256xi32>
    %22 = arith.andi %18, %21 : vector<1x256xi32>
    %c1_i32 = arith.constant 1 : i32
    %23 = vector.broadcast %c1_i32 : i32 to vector<1x256xi32>
    %24 = arith.cmpi sge, %20, %23 : vector<1x256xi32>
    %c1_i32_13 = arith.constant 1 : i32
    %25 = vector.broadcast %c1_i32_13 : i32 to vector<1x256xi32>
    %26 = arith.cmpi sge, %22, %25 : vector<1x256xi32>
    %27 = arith.andi %24, %26 : vector<1x256xi1>
    %cst_14 = arith.constant 0.000000e+00 : f32
    %28 = vector.shape_cast %27 : vector<1x256xi1> to vector<1x256xi1>
    %29 = vector.broadcast %28 : vector<1x256xi1> to vector<2x256xi1>
    %30 = vector.broadcast %cst_14 : f32 to vector<2x256xf32>
    %31 = arith.select %29, %17, %30 : vector<2x256xi1>, vector<2x256xf32>
    %32 = vector.extract_strided_slice %13 {offsets = [2, 0], sizes = [2, 256], strides = [1, 1]} : vector<18x256xf32> to vector<2x256xf32>
    %33 = vector.extract_strided_slice %32 {offsets = [0, 240], sizes = [2, 16], strides = [1, 1]} : vector<2x256xf32> to vector<2x16xf32>
    %34 = vector.extract_strided_slice %32 {offsets = [0, 0], sizes = [2, 240], strides = [1, 1]} : vector<2x256xf32> to vector<2x240xf32>
    %35 = tpu.concatenate %33, %34 in 1 : vector<2x16xf32>, vector<2x240xf32> -> vector<2x256xf32>
    %c1_i32_15 = arith.constant 1 : i32
    %36 = vector.broadcast %c1_i32_15 : i32 to vector<1x256xi32>
    %37 = arith.cmpi sge, %20, %36 : vector<1x256xi32>
    %cst_16 = arith.constant 0.000000e+00 : f32
    %38 = vector.shape_cast %37 : vector<1x256xi1> to vector<1x256xi1>
    %39 = vector.broadcast %38 : vector<1x256xi1> to vector<2x256xi1>
    %40 = vector.broadcast %cst_16 : f32 to vector<2x256xf32>
    %41 = arith.select %39, %35, %40 : vector<2x256xi1>, vector<2x256xf32>
    %42 = arith.addf %31, %41 : vector<2x256xf32>
    %43 = vector.extract_strided_slice %13 {offsets = [4, 0], sizes = [2, 256], strides = [1, 1]} : vector<18x256xf32> to vector<2x256xf32>
    %44 = vector.extract_strided_slice %43 {offsets = [0, 241], sizes = [2, 15], strides = [1, 1]} : vector<2x256xf32> to vector<2x15xf32>
    %45 = vector.extract_strided_slice %43 {offsets = [0, 0], sizes = [2, 241], strides = [1, 1]} : vector<2x256xf32> to vector<2x241xf32>
    %46 = tpu.concatenate %44, %45 in 1 : vector<2x15xf32>, vector<2x241xf32> -> vector<2x256xf32>
    %c1_i32_17 = arith.constant 1 : i32
    %47 = vector.broadcast %c1_i32_17 : i32 to vector<1x256xi32>
    %48 = arith.cmpi sge, %20, %47 : vector<1x256xi32>
    %c15_i32_18 = arith.constant 15 : i32
    %49 = vector.broadcast %c15_i32_18 : i32 to vector<1x256xi32>
    %50 = arith.cmpi slt, %22, %49 : vector<1x256xi32>
    %51 = arith.andi %48, %50 : vector<1x256xi1>
    %cst_19 = arith.constant 0.000000e+00 : f32
    %52 = vector.shape_cast %51 : vector<1x256xi1> to vector<1x256xi1>
    %53 = vector.broadcast %52 : vector<1x256xi1> to vector<2x256xi1>
    %54 = vector.broadcast %cst_19 : f32 to vector<2x256xf32>
    %55 = arith.select %53, %46, %54 : vector<2x256xi1>, vector<2x256xf32>
    %56 = arith.addf %42, %55 : vector<2x256xf32>
    %57 = vector.extract_strided_slice %13 {offsets = [6, 0], sizes = [2, 256], strides = [1, 1]} : vector<18x256xf32> to vector<2x256xf32>
    %58 = vector.extract_strided_slice %57 {offsets = [0, 255], sizes = [2, 1], strides = [1, 1]} : vector<2x256xf32> to vector<2x1xf32>
    %59 = vector.extract_strided_slice %57 {offsets = [0, 0], sizes = [2, 255], strides = [1, 1]} : vector<2x256xf32> to vector<2x255xf32>
    %60 = tpu.concatenate %58, %59 in 1 : vector<2x1xf32>, vector<2x255xf32> -> vector<2x256xf32>
    %c1_i32_20 = arith.constant 1 : i32
    %61 = vector.broadcast %c1_i32_20 : i32 to vector<1x256xi32>
    %62 = arith.cmpi sge, %22, %61 : vector<1x256xi32>
    %cst_21 = arith.constant 0.000000e+00 : f32
    %63 = vector.shape_cast %62 : vector<1x256xi1> to vector<1x256xi1>
    %64 = vector.broadcast %63 : vector<1x256xi1> to vector<2x256xi1>
    %65 = vector.broadcast %cst_21 : f32 to vector<2x256xf32>
    %66 = arith.select %64, %60, %65 : vector<2x256xi1>, vector<2x256xf32>
    %67 = arith.addf %56, %66 : vector<2x256xf32>
    %68 = vector.extract_strided_slice %13 {offsets = [8, 0], sizes = [2, 256], strides = [1, 1]} : vector<18x256xf32> to vector<2x256xf32>
    %69 = arith.addf %67, %68 : vector<2x256xf32>
    %70 = vector.extract_strided_slice %13 {offsets = [10, 0], sizes = [2, 256], strides = [1, 1]} : vector<18x256xf32> to vector<2x256xf32>
    %71 = vector.extract_strided_slice %70 {offsets = [0, 1], sizes = [2, 255], strides = [1, 1]} : vector<2x256xf32> to vector<2x255xf32>
    %72 = vector.extract_strided_slice %70 {offsets = [0, 0], sizes = [2, 1], strides = [1, 1]} : vector<2x256xf32> to vector<2x1xf32>
    %73 = tpu.concatenate %71, %72 in 1 : vector<2x255xf32>, vector<2x1xf32> -> vector<2x256xf32>
    %c15_i32_22 = arith.constant 15 : i32
    %74 = vector.broadcast %c15_i32_22 : i32 to vector<1x256xi32>
    %75 = arith.cmpi slt, %22, %74 : vector<1x256xi32>
    %cst_23 = arith.constant 0.000000e+00 : f32
    %76 = vector.shape_cast %75 : vector<1x256xi1> to vector<1x256xi1>
    %77 = vector.broadcast %76 : vector<1x256xi1> to vector<2x256xi1>
    %78 = vector.broadcast %cst_23 : f32 to vector<2x256xf32>
    %79 = arith.select %77, %73, %78 : vector<2x256xi1>, vector<2x256xf32>
    %80 = arith.addf %69, %79 : vector<2x256xf32>
    %81 = vector.extract_strided_slice %13 {offsets = [12, 0], sizes = [2, 256], strides = [1, 1]} : vector<18x256xf32> to vector<2x256xf32>
    %82 = vector.extract_strided_slice %81 {offsets = [0, 15], sizes = [2, 241], strides = [1, 1]} : vector<2x256xf32> to vector<2x241xf32>
    %83 = vector.extract_strided_slice %81 {offsets = [0, 0], sizes = [2, 15], strides = [1, 1]} : vector<2x256xf32> to vector<2x15xf32>
    %84 = tpu.concatenate %82, %83 in 1 : vector<2x241xf32>, vector<2x15xf32> -> vector<2x256xf32>
    %c15_i32_24 = arith.constant 15 : i32
    %85 = vector.broadcast %c15_i32_24 : i32 to vector<1x256xi32>
    %86 = arith.cmpi slt, %20, %85 : vector<1x256xi32>
    %c1_i32_25 = arith.constant 1 : i32
    %87 = vector.broadcast %c1_i32_25 : i32 to vector<1x256xi32>
    %88 = arith.cmpi sge, %22, %87 : vector<1x256xi32>
    %89 = arith.andi %86, %88 : vector<1x256xi1>
    %cst_26 = arith.constant 0.000000e+00 : f32
    %90 = vector.shape_cast %89 : vector<1x256xi1> to vector<1x256xi1>
    %91 = vector.broadcast %90 : vector<1x256xi1> to vector<2x256xi1>
    %92 = vector.broadcast %cst_26 : f32 to vector<2x256xf32>
    %93 = arith.select %91, %84, %92 : vector<2x256xi1>, vector<2x256xf32>
    %94 = arith.addf %80, %93 : vector<2x256xf32>
    %95 = vector.extract_strided_slice %13 {offsets = [14, 0], sizes = [2, 256], strides = [1, 1]} : vector<18x256xf32> to vector<2x256xf32>
    %96 = vector.extract_strided_slice %95 {offsets = [0, 16], sizes = [2, 240], strides = [1, 1]} : vector<2x256xf32> to vector<2x240xf32>
    %97 = vector.extract_strided_slice %95 {offsets = [0, 0], sizes = [2, 16], strides = [1, 1]} : vector<2x256xf32> to vector<2x16xf32>
    %98 = tpu.concatenate %96, %97 in 1 : vector<2x240xf32>, vector<2x16xf32> -> vector<2x256xf32>
    %c15_i32_27 = arith.constant 15 : i32
    %99 = vector.broadcast %c15_i32_27 : i32 to vector<1x256xi32>
    %100 = arith.cmpi slt, %20, %99 : vector<1x256xi32>
    %cst_28 = arith.constant 0.000000e+00 : f32
    %101 = vector.shape_cast %100 : vector<1x256xi1> to vector<1x256xi1>
    %102 = vector.broadcast %101 : vector<1x256xi1> to vector<2x256xi1>
    %103 = vector.broadcast %cst_28 : f32 to vector<2x256xf32>
    %104 = arith.select %102, %98, %103 : vector<2x256xi1>, vector<2x256xf32>
    %105 = arith.addf %94, %104 : vector<2x256xf32>
    %106 = vector.extract_strided_slice %13 {offsets = [16, 0], sizes = [2, 256], strides = [1, 1]} : vector<18x256xf32> to vector<2x256xf32>
    %107 = vector.extract_strided_slice %106 {offsets = [0, 17], sizes = [2, 239], strides = [1, 1]} : vector<2x256xf32> to vector<2x239xf32>
    %108 = vector.extract_strided_slice %106 {offsets = [0, 0], sizes = [2, 17], strides = [1, 1]} : vector<2x256xf32> to vector<2x17xf32>
    %109 = tpu.concatenate %107, %108 in 1 : vector<2x239xf32>, vector<2x17xf32> -> vector<2x256xf32>
    %c15_i32_29 = arith.constant 15 : i32
    %110 = vector.broadcast %c15_i32_29 : i32 to vector<1x256xi32>
    %111 = arith.cmpi slt, %20, %110 : vector<1x256xi32>
    %c15_i32_30 = arith.constant 15 : i32
    %112 = vector.broadcast %c15_i32_30 : i32 to vector<1x256xi32>
    %113 = arith.cmpi slt, %22, %112 : vector<1x256xi32>
    %114 = arith.andi %111, %113 : vector<1x256xi1>
    %cst_31 = arith.constant 0.000000e+00 : f32
    %115 = vector.shape_cast %114 : vector<1x256xi1> to vector<1x256xi1>
    %116 = vector.broadcast %115 : vector<1x256xi1> to vector<2x256xi1>
    %117 = vector.broadcast %cst_31 : f32 to vector<2x256xf32>
    %118 = arith.select %116, %109, %117 : vector<2x256xi1>, vector<2x256xf32>
    %119 = arith.addf %105, %118 : vector<2x256xf32>
    %c0_32 = arith.constant 0 : index
    %c0_33 = arith.constant 0 : index
    %c0_34 = arith.constant 0 : index
    %120 = vector.load %arg5[%c0_32, %c0_33, %c0_34] : memref<7x2x1xf32, #tpu.memory_space<vmem>>, vector<1x2x1xf32>
    %121 = vector.shape_cast %120 : vector<1x2x1xf32> to vector<2x1xf32>
    %122 = vector.broadcast %121 : vector<2x1xf32> to vector<2x256xf32>
    %123 = arith.addf %119, %122 : vector<2x256xf32>
    %c0_35 = arith.constant 0 : index
    %c0_36 = arith.constant 0 : index
    %c0_37 = arith.constant 0 : index
    %124 = vector.load %arg6[%c0_35, %c0_36, %c0_37] : memref<7x4x2xf32, #tpu.memory_space<vmem>>, vector<1x4x2xf32>
    %125 = vector.shape_cast %124 : vector<1x4x2xf32> to vector<4x2xf32>
    %cst_38 = arith.constant dense<0.000000e+00> : vector<4x256xf32>
    %126 = tpu.matmul %125, %123, %cst_38 {dimension_numbers = #tpu.dot_dimension_numbers<[1], [0], [0], [1], [0, 0, 1, 1], [], []>} : vector<4x2xf32>, vector<2x256xf32>, vector<4x256xf32> -> vector<4x256xf32>
    %c0_39 = arith.constant 0 : index
    %c0_40 = arith.constant 0 : index
    %c0_41 = arith.constant 0 : index
    %127 = vector.load %arg7[%c0_39, %c0_40, %c0_41] : memref<7x4x1xf32, #tpu.memory_space<vmem>>, vector<1x4x1xf32>
    %128 = vector.shape_cast %127 : vector<1x4x1xf32> to vector<4x1xf32>
    %129 = vector.broadcast %128 : vector<4x1xf32> to vector<4x256xf32>
    %130 = arith.addf %126, %129 : vector<4x256xf32>
    %131 = arith.addf %1, %130 : vector<4x256xf32>
    %132 = vector.extract_strided_slice %1 {offsets = [0, 1], sizes = [4, 255], strides = [1, 1]} : vector<4x256xf32> to vector<4x255xf32>
    %133 = vector.extract_strided_slice %1 {offsets = [0, 0], sizes = [4, 1], strides = [1, 1]} : vector<4x256xf32> to vector<4x1xf32>
    %134 = tpu.concatenate %132, %133 in 1 : vector<4x255xf32>, vector<4x1xf32> -> vector<4x256xf32>
    %135 = arith.maximumf %1, %134 : vector<4x256xf32>
    %136 = vector.extract_strided_slice %135 {offsets = [0, 16], sizes = [4, 240], strides = [1, 1]} : vector<4x256xf32> to vector<4x240xf32>
    %137 = vector.extract_strided_slice %135 {offsets = [0, 0], sizes = [4, 16], strides = [1, 1]} : vector<4x256xf32> to vector<4x16xf32>
    %138 = tpu.concatenate %136, %137 in 1 : vector<4x240xf32>, vector<4x16xf32> -> vector<4x256xf32>
    %139 = arith.maximumf %135, %138 : vector<4x256xf32>
    %c0_42 = arith.constant 0 : index
    %c0_43 = arith.constant 0 : index
    %140 = vector.load %arg8[%c0_42, %c0_43] : memref<256x64xf32, #tpu.memory_space<vmem>>, vector<256x64xf32>
    %cst_44 = arith.constant dense<0.000000e+00> : vector<4x64xf32>
    %141 = tpu.matmul %139, %140, %cst_44 {dimension_numbers = #tpu.dot_dimension_numbers<[1], [0], [0], [1], [0, 0, 1, 1], [], []>} : vector<4x256xf32>, vector<256x64xf32>, vector<4x64xf32> -> vector<4x64xf32>
    %c1 = arith.constant 1 : index
    %c0_45 = arith.constant 0 : index
    %c0_46 = arith.constant 0 : index
    %142 = vector.load %arg2[%c1, %c0_45, %c0_46] : memref<7x2x4xf32, #tpu.memory_space<vmem>>, vector<1x2x4xf32>
    %143 = vector.shape_cast %142 : vector<1x2x4xf32> to vector<2x4xf32>
    %cst_47 = arith.constant dense<0.000000e+00> : vector<2x64xf32>
    %144 = tpu.matmul %143, %141, %cst_47 {dimension_numbers = #tpu.dot_dimension_numbers<[1], [0], [0], [1], [0, 0, 1, 1], [], []>} : vector<2x4xf32>, vector<4x64xf32>, vector<2x64xf32> -> vector<2x64xf32>
    %c1_48 = arith.constant 1 : index
    %c0_49 = arith.constant 0 : index
    %c0_50 = arith.constant 0 : index
    %145 = vector.load %arg3[%c1_48, %c0_49, %c0_50] : memref<7x2x1xf32, #tpu.memory_space<vmem>>, vector<1x2x1xf32>
    %146 = vector.shape_cast %145 : vector<1x2x1xf32> to vector<2x1xf32>
    %147 = vector.broadcast %146 : vector<2x1xf32> to vector<2x64xf32>
    %148 = arith.addf %144, %147 : vector<2x64xf32>
    %cst_51 = arith.constant 0.000000e+00 : f32
    %149 = vector.broadcast %cst_51 : f32 to vector<2x64xf32>
    %150 = arith.maximumf %148, %149 : vector<2x64xf32>
    %c1_52 = arith.constant 1 : index
    %c0_53 = arith.constant 0 : index
    %c0_54 = arith.constant 0 : index
    %151 = vector.load %arg4[%c1_52, %c0_53, %c0_54] : memref<7x18x2xf32, #tpu.memory_space<vmem>>, vector<1x18x2xf32>
    %152 = vector.shape_cast %151 : vector<1x18x2xf32> to vector<18x2xf32>
    %cst_55 = arith.constant dense<0.000000e+00> : vector<18x64xf32>
    %153 = tpu.matmul %152, %150, %cst_55 {dimension_numbers = #tpu.dot_dimension_numbers<[1], [0], [0], [1], [0, 0, 1, 1], [], []>} : vector<18x2xf32>, vector<2x64xf32>, vector<18x64xf32> -> vector<18x64xf32>
    %154 = vector.extract_strided_slice %153 {offsets = [0, 0], sizes = [2, 64], strides = [1, 1]} : vector<18x64xf32> to vector<2x64xf32>
    %155 = vector.extract_strided_slice %154 {offsets = [0, 55], sizes = [2, 9], strides = [1, 1]} : vector<2x64xf32> to vector<2x9xf32>
    %156 = vector.extract_strided_slice %154 {offsets = [0, 0], sizes = [2, 55], strides = [1, 1]} : vector<2x64xf32> to vector<2x55xf32>
    %157 = tpu.concatenate %155, %156 in 1 : vector<2x9xf32>, vector<2x55xf32> -> vector<2x64xf32>
    %158 = tpu.iota {dimensions = array<i32: 1>} : vector<1x64xi32>
    %c3_i32 = arith.constant 3 : i32
    %159 = vector.broadcast %c3_i32 : i32 to vector<1x64xi32>
    %160 = arith.shrsi %158, %159 : vector<1x64xi32>
    %c7_i32 = arith.constant 7 : i32
    %161 = vector.broadcast %c7_i32 : i32 to vector<1x64xi32>
    %162 = arith.andi %158, %161 : vector<1x64xi32>
    %c1_i32_56 = arith.constant 1 : i32
    %163 = vector.broadcast %c1_i32_56 : i32 to vector<1x64xi32>
    %164 = arith.cmpi sge, %160, %163 : vector<1x64xi32>
    %c1_i32_57 = arith.constant 1 : i32
    %165 = vector.broadcast %c1_i32_57 : i32 to vector<1x64xi32>
    %166 = arith.cmpi sge, %162, %165 : vector<1x64xi32>
    %167 = arith.andi %164, %166 : vector<1x64xi1>
    %cst_58 = arith.constant 0.000000e+00 : f32
    %168 = vector.shape_cast %167 : vector<1x64xi1> to vector<1x64xi1>
    %169 = vector.broadcast %168 : vector<1x64xi1> to vector<2x64xi1>
    %170 = vector.broadcast %cst_58 : f32 to vector<2x64xf32>
    %171 = arith.select %169, %157, %170 : vector<2x64xi1>, vector<2x64xf32>
    %172 = vector.extract_strided_slice %153 {offsets = [2, 0], sizes = [2, 64], strides = [1, 1]} : vector<18x64xf32> to vector<2x64xf32>
    %173 = vector.extract_strided_slice %172 {offsets = [0, 56], sizes = [2, 8], strides = [1, 1]} : vector<2x64xf32> to vector<2x8xf32>
    %174 = vector.extract_strided_slice %172 {offsets = [0, 0], sizes = [2, 56], strides = [1, 1]} : vector<2x64xf32> to vector<2x56xf32>
    %175 = tpu.concatenate %173, %174 in 1 : vector<2x8xf32>, vector<2x56xf32> -> vector<2x64xf32>
    %c1_i32_59 = arith.constant 1 : i32
    %176 = vector.broadcast %c1_i32_59 : i32 to vector<1x64xi32>
    %177 = arith.cmpi sge, %160, %176 : vector<1x64xi32>
    %cst_60 = arith.constant 0.000000e+00 : f32
    %178 = vector.shape_cast %177 : vector<1x64xi1> to vector<1x64xi1>
    %179 = vector.broadcast %178 : vector<1x64xi1> to vector<2x64xi1>
    %180 = vector.broadcast %cst_60 : f32 to vector<2x64xf32>
    %181 = arith.select %179, %175, %180 : vector<2x64xi1>, vector<2x64xf32>
    %182 = arith.addf %171, %181 : vector<2x64xf32>
    %183 = vector.extract_strided_slice %153 {offsets = [4, 0], sizes = [2, 64], strides = [1, 1]} : vector<18x64xf32> to vector<2x64xf32>
    %184 = vector.extract_strided_slice %183 {offsets = [0, 57], sizes = [2, 7], strides = [1, 1]} : vector<2x64xf32> to vector<2x7xf32>
    %185 = vector.extract_strided_slice %183 {offsets = [0, 0], sizes = [2, 57], strides = [1, 1]} : vector<2x64xf32> to vector<2x57xf32>
    %186 = tpu.concatenate %184, %185 in 1 : vector<2x7xf32>, vector<2x57xf32> -> vector<2x64xf32>
    %c1_i32_61 = arith.constant 1 : i32
    %187 = vector.broadcast %c1_i32_61 : i32 to vector<1x64xi32>
    %188 = arith.cmpi sge, %160, %187 : vector<1x64xi32>
    %c7_i32_62 = arith.constant 7 : i32
    %189 = vector.broadcast %c7_i32_62 : i32 to vector<1x64xi32>
    %190 = arith.cmpi slt, %162, %189 : vector<1x64xi32>
    %191 = arith.andi %188, %190 : vector<1x64xi1>
    %cst_63 = arith.constant 0.000000e+00 : f32
    %192 = vector.shape_cast %191 : vector<1x64xi1> to vector<1x64xi1>
    %193 = vector.broadcast %192 : vector<1x64xi1> to vector<2x64xi1>
    %194 = vector.broadcast %cst_63 : f32 to vector<2x64xf32>
    %195 = arith.select %193, %186, %194 : vector<2x64xi1>, vector<2x64xf32>
    %196 = arith.addf %182, %195 : vector<2x64xf32>
    %197 = vector.extract_strided_slice %153 {offsets = [6, 0], sizes = [2, 64], strides = [1, 1]} : vector<18x64xf32> to vector<2x64xf32>
    %198 = vector.extract_strided_slice %197 {offsets = [0, 63], sizes = [2, 1], strides = [1, 1]} : vector<2x64xf32> to vector<2x1xf32>
    %199 = vector.extract_strided_slice %197 {offsets = [0, 0], sizes = [2, 63], strides = [1, 1]} : vector<2x64xf32> to vector<2x63xf32>
    %200 = tpu.concatenate %198, %199 in 1 : vector<2x1xf32>, vector<2x63xf32> -> vector<2x64xf32>
    %c1_i32_64 = arith.constant 1 : i32
    %201 = vector.broadcast %c1_i32_64 : i32 to vector<1x64xi32>
    %202 = arith.cmpi sge, %162, %201 : vector<1x64xi32>
    %cst_65 = arith.constant 0.000000e+00 : f32
    %203 = vector.shape_cast %202 : vector<1x64xi1> to vector<1x64xi1>
    %204 = vector.broadcast %203 : vector<1x64xi1> to vector<2x64xi1>
    %205 = vector.broadcast %cst_65 : f32 to vector<2x64xf32>
    %206 = arith.select %204, %200, %205 : vector<2x64xi1>, vector<2x64xf32>
    %207 = arith.addf %196, %206 : vector<2x64xf32>
    %208 = vector.extract_strided_slice %153 {offsets = [8, 0], sizes = [2, 64], strides = [1, 1]} : vector<18x64xf32> to vector<2x64xf32>
    %209 = arith.addf %207, %208 : vector<2x64xf32>
    %210 = vector.extract_strided_slice %153 {offsets = [10, 0], sizes = [2, 64], strides = [1, 1]} : vector<18x64xf32> to vector<2x64xf32>
    %211 = vector.extract_strided_slice %210 {offsets = [0, 1], sizes = [2, 63], strides = [1, 1]} : vector<2x64xf32> to vector<2x63xf32>
    %212 = vector.extract_strided_slice %210 {offsets = [0, 0], sizes = [2, 1], strides = [1, 1]} : vector<2x64xf32> to vector<2x1xf32>
    %213 = tpu.concatenate %211, %212 in 1 : vector<2x63xf32>, vector<2x1xf32> -> vector<2x64xf32>
    %c7_i32_66 = arith.constant 7 : i32
    %214 = vector.broadcast %c7_i32_66 : i32 to vector<1x64xi32>
    %215 = arith.cmpi slt, %162, %214 : vector<1x64xi32>
    %cst_67 = arith.constant 0.000000e+00 : f32
    %216 = vector.shape_cast %215 : vector<1x64xi1> to vector<1x64xi1>
    %217 = vector.broadcast %216 : vector<1x64xi1> to vector<2x64xi1>
    %218 = vector.broadcast %cst_67 : f32 to vector<2x64xf32>
    %219 = arith.select %217, %213, %218 : vector<2x64xi1>, vector<2x64xf32>
    %220 = arith.addf %209, %219 : vector<2x64xf32>
    %221 = vector.extract_strided_slice %153 {offsets = [12, 0], sizes = [2, 64], strides = [1, 1]} : vector<18x64xf32> to vector<2x64xf32>
    %222 = vector.extract_strided_slice %221 {offsets = [0, 7], sizes = [2, 57], strides = [1, 1]} : vector<2x64xf32> to vector<2x57xf32>
    %223 = vector.extract_strided_slice %221 {offsets = [0, 0], sizes = [2, 7], strides = [1, 1]} : vector<2x64xf32> to vector<2x7xf32>
    %224 = tpu.concatenate %222, %223 in 1 : vector<2x57xf32>, vector<2x7xf32> -> vector<2x64xf32>
    %c7_i32_68 = arith.constant 7 : i32
    %225 = vector.broadcast %c7_i32_68 : i32 to vector<1x64xi32>
    %226 = arith.cmpi slt, %160, %225 : vector<1x64xi32>
    %c1_i32_69 = arith.constant 1 : i32
    %227 = vector.broadcast %c1_i32_69 : i32 to vector<1x64xi32>
    %228 = arith.cmpi sge, %162, %227 : vector<1x64xi32>
    %229 = arith.andi %226, %228 : vector<1x64xi1>
    %cst_70 = arith.constant 0.000000e+00 : f32
    %230 = vector.shape_cast %229 : vector<1x64xi1> to vector<1x64xi1>
    %231 = vector.broadcast %230 : vector<1x64xi1> to vector<2x64xi1>
    %232 = vector.broadcast %cst_70 : f32 to vector<2x64xf32>
    %233 = arith.select %231, %224, %232 : vector<2x64xi1>, vector<2x64xf32>
    %234 = arith.addf %220, %233 : vector<2x64xf32>
    %235 = vector.extract_strided_slice %153 {offsets = [14, 0], sizes = [2, 64], strides = [1, 1]} : vector<18x64xf32> to vector<2x64xf32>
    %236 = vector.extract_strided_slice %235 {offsets = [0, 8], sizes = [2, 56], strides = [1, 1]} : vector<2x64xf32> to vector<2x56xf32>
    %237 = vector.extract_strided_slice %235 {offsets = [0, 0], sizes = [2, 8], strides = [1, 1]} : vector<2x64xf32> to vector<2x8xf32>
    %238 = tpu.concatenate %236, %237 in 1 : vector<2x56xf32>, vector<2x8xf32> -> vector<2x64xf32>
    %c7_i32_71 = arith.constant 7 : i32
    %239 = vector.broadcast %c7_i32_71 : i32 to vector<1x64xi32>
    %240 = arith.cmpi slt, %160, %239 : vector<1x64xi32>
    %cst_72 = arith.constant 0.000000e+00 : f32
    %241 = vector.shape_cast %240 : vector<1x64xi1> to vector<1x64xi1>
    %242 = vector.broadcast %241 : vector<1x64xi1> to vector<2x64xi1>
    %243 = vector.broadcast %cst_72 : f32 to vector<2x64xf32>
    %244 = arith.select %242, %238, %243 : vector<2x64xi1>, vector<2x64xf32>
    %245 = arith.addf %234, %244 : vector<2x64xf32>
    %246 = vector.extract_strided_slice %153 {offsets = [16, 0], sizes = [2, 64], strides = [1, 1]} : vector<18x64xf32> to vector<2x64xf32>
    %247 = vector.extract_strided_slice %246 {offsets = [0, 9], sizes = [2, 55], strides = [1, 1]} : vector<2x64xf32> to vector<2x55xf32>
    %248 = vector.extract_strided_slice %246 {offsets = [0, 0], sizes = [2, 9], strides = [1, 1]} : vector<2x64xf32> to vector<2x9xf32>
    %249 = tpu.concatenate %247, %248 in 1 : vector<2x55xf32>, vector<2x9xf32> -> vector<2x64xf32>
    %c7_i32_73 = arith.constant 7 : i32
    %250 = vector.broadcast %c7_i32_73 : i32 to vector<1x64xi32>
    %251 = arith.cmpi slt, %160, %250 : vector<1x64xi32>
    %c7_i32_74 = arith.constant 7 : i32
    %252 = vector.broadcast %c7_i32_74 : i32 to vector<1x64xi32>
    %253 = arith.cmpi slt, %162, %252 : vector<1x64xi32>
    %254 = arith.andi %251, %253 : vector<1x64xi1>
    %cst_75 = arith.constant 0.000000e+00 : f32
    %255 = vector.shape_cast %254 : vector<1x64xi1> to vector<1x64xi1>
    %256 = vector.broadcast %255 : vector<1x64xi1> to vector<2x64xi1>
    %257 = vector.broadcast %cst_75 : f32 to vector<2x64xf32>
    %258 = arith.select %256, %249, %257 : vector<2x64xi1>, vector<2x64xf32>
    %259 = arith.addf %245, %258 : vector<2x64xf32>
    %c1_76 = arith.constant 1 : index
    %c0_77 = arith.constant 0 : index
    %c0_78 = arith.constant 0 : index
    %260 = vector.load %arg5[%c1_76, %c0_77, %c0_78] : memref<7x2x1xf32, #tpu.memory_space<vmem>>, vector<1x2x1xf32>
    %261 = vector.shape_cast %260 : vector<1x2x1xf32> to vector<2x1xf32>
    %262 = vector.broadcast %261 : vector<2x1xf32> to vector<2x64xf32>
    %263 = arith.addf %259, %262 : vector<2x64xf32>
    %c1_79 = arith.constant 1 : index
    %c0_80 = arith.constant 0 : index
    %c0_81 = arith.constant 0 : index
    %264 = vector.load %arg6[%c1_79, %c0_80, %c0_81] : memref<7x4x2xf32, #tpu.memory_space<vmem>>, vector<1x4x2xf32>
    %265 = vector.shape_cast %264 : vector<1x4x2xf32> to vector<4x2xf32>
    %cst_82 = arith.constant dense<0.000000e+00> : vector<4x64xf32>
    %266 = tpu.matmul %265, %263, %cst_82 {dimension_numbers = #tpu.dot_dimension_numbers<[1], [0], [0], [1], [0, 0, 1, 1], [], []>} : vector<4x2xf32>, vector<2x64xf32>, vector<4x64xf32> -> vector<4x64xf32>
    %c1_83 = arith.constant 1 : index
    %c0_84 = arith.constant 0 : index
    %c0_85 = arith.constant 0 : index
    %267 = vector.load %arg7[%c1_83, %c0_84, %c0_85] : memref<7x4x1xf32, #tpu.memory_space<vmem>>, vector<1x4x1xf32>
    %268 = vector.shape_cast %267 : vector<1x4x1xf32> to vector<4x1xf32>
    %269 = vector.broadcast %268 : vector<4x1xf32> to vector<4x64xf32>
    %270 = arith.addf %266, %269 : vector<4x64xf32>
    %271 = arith.addf %141, %270 : vector<4x64xf32>
    %c2 = arith.constant 2 : index
    %c0_86 = arith.constant 0 : index
    %c0_87 = arith.constant 0 : index
    %272 = vector.load %arg2[%c2, %c0_86, %c0_87] : memref<7x2x4xf32, #tpu.memory_space<vmem>>, vector<1x2x4xf32>
    %273 = vector.shape_cast %272 : vector<1x2x4xf32> to vector<2x4xf32>
    %cst_88 = arith.constant dense<0.000000e+00> : vector<2x64xf32>
    %274 = tpu.matmul %273, %271, %cst_88 {dimension_numbers = #tpu.dot_dimension_numbers<[1], [0], [0], [1], [0, 0, 1, 1], [], []>} : vector<2x4xf32>, vector<4x64xf32>, vector<2x64xf32> -> vector<2x64xf32>
    %c2_89 = arith.constant 2 : index
    %c0_90 = arith.constant 0 : index
    %c0_91 = arith.constant 0 : index
    %275 = vector.load %arg3[%c2_89, %c0_90, %c0_91] : memref<7x2x1xf32, #tpu.memory_space<vmem>>, vector<1x2x1xf32>
    %276 = vector.shape_cast %275 : vector<1x2x1xf32> to vector<2x1xf32>
    %277 = vector.broadcast %276 : vector<2x1xf32> to vector<2x64xf32>
    %278 = arith.addf %274, %277 : vector<2x64xf32>
    %cst_92 = arith.constant 0.000000e+00 : f32
    %279 = vector.broadcast %cst_92 : f32 to vector<2x64xf32>
    %280 = arith.maximumf %278, %279 : vector<2x64xf32>
    %c2_93 = arith.constant 2 : index
    %c0_94 = arith.constant 0 : index
    %c0_95 = arith.constant 0 : index
    %281 = vector.load %arg4[%c2_93, %c0_94, %c0_95] : memref<7x18x2xf32, #tpu.memory_space<vmem>>, vector<1x18x2xf32>
    %282 = vector.shape_cast %281 : vector<1x18x2xf32> to vector<18x2xf32>
    %cst_96 = arith.constant dense<0.000000e+00> : vector<18x64xf32>
    %283 = tpu.matmul %282, %280, %cst_96 {dimension_numbers = #tpu.dot_dimension_numbers<[1], [0], [0], [1], [0, 0, 1, 1], [], []>} : vector<18x2xf32>, vector<2x64xf32>, vector<18x64xf32> -> vector<18x64xf32>
    %284 = vector.extract_strided_slice %283 {offsets = [0, 0], sizes = [2, 64], strides = [1, 1]} : vector<18x64xf32> to vector<2x64xf32>
    %285 = vector.extract_strided_slice %284 {offsets = [0, 55], sizes = [2, 9], strides = [1, 1]} : vector<2x64xf32> to vector<2x9xf32>
    %286 = vector.extract_strided_slice %284 {offsets = [0, 0], sizes = [2, 55], strides = [1, 1]} : vector<2x64xf32> to vector<2x55xf32>
    %287 = tpu.concatenate %285, %286 in 1 : vector<2x9xf32>, vector<2x55xf32> -> vector<2x64xf32>
    %cst_97 = arith.constant 0.000000e+00 : f32
    %288 = vector.shape_cast %167 : vector<1x64xi1> to vector<1x64xi1>
    %289 = vector.broadcast %288 : vector<1x64xi1> to vector<2x64xi1>
    %290 = vector.broadcast %cst_97 : f32 to vector<2x64xf32>
    %291 = arith.select %289, %287, %290 : vector<2x64xi1>, vector<2x64xf32>
    %292 = vector.extract_strided_slice %283 {offsets = [2, 0], sizes = [2, 64], strides = [1, 1]} : vector<18x64xf32> to vector<2x64xf32>
    %293 = vector.extract_strided_slice %292 {offsets = [0, 56], sizes = [2, 8], strides = [1, 1]} : vector<2x64xf32> to vector<2x8xf32>
    %294 = vector.extract_strided_slice %292 {offsets = [0, 0], sizes = [2, 56], strides = [1, 1]} : vector<2x64xf32> to vector<2x56xf32>
    %295 = tpu.concatenate %293, %294 in 1 : vector<2x8xf32>, vector<2x56xf32> -> vector<2x64xf32>
    %cst_98 = arith.constant 0.000000e+00 : f32
    %296 = vector.shape_cast %177 : vector<1x64xi1> to vector<1x64xi1>
    %297 = vector.broadcast %296 : vector<1x64xi1> to vector<2x64xi1>
    %298 = vector.broadcast %cst_98 : f32 to vector<2x64xf32>
    %299 = arith.select %297, %295, %298 : vector<2x64xi1>, vector<2x64xf32>
    %300 = arith.addf %291, %299 : vector<2x64xf32>
    %301 = vector.extract_strided_slice %283 {offsets = [4, 0], sizes = [2, 64], strides = [1, 1]} : vector<18x64xf32> to vector<2x64xf32>
    %302 = vector.extract_strided_slice %301 {offsets = [0, 57], sizes = [2, 7], strides = [1, 1]} : vector<2x64xf32> to vector<2x7xf32>
    %303 = vector.extract_strided_slice %301 {offsets = [0, 0], sizes = [2, 57], strides = [1, 1]} : vector<2x64xf32> to vector<2x57xf32>
    %304 = tpu.concatenate %302, %303 in 1 : vector<2x7xf32>, vector<2x57xf32> -> vector<2x64xf32>
    %cst_99 = arith.constant 0.000000e+00 : f32
    %305 = vector.shape_cast %191 : vector<1x64xi1> to vector<1x64xi1>
    %306 = vector.broadcast %305 : vector<1x64xi1> to vector<2x64xi1>
    %307 = vector.broadcast %cst_99 : f32 to vector<2x64xf32>
    %308 = arith.select %306, %304, %307 : vector<2x64xi1>, vector<2x64xf32>
    %309 = arith.addf %300, %308 : vector<2x64xf32>
    %310 = vector.extract_strided_slice %283 {offsets = [6, 0], sizes = [2, 64], strides = [1, 1]} : vector<18x64xf32> to vector<2x64xf32>
    %311 = vector.extract_strided_slice %310 {offsets = [0, 63], sizes = [2, 1], strides = [1, 1]} : vector<2x64xf32> to vector<2x1xf32>
    %312 = vector.extract_strided_slice %310 {offsets = [0, 0], sizes = [2, 63], strides = [1, 1]} : vector<2x64xf32> to vector<2x63xf32>
    %313 = tpu.concatenate %311, %312 in 1 : vector<2x1xf32>, vector<2x63xf32> -> vector<2x64xf32>
    %cst_100 = arith.constant 0.000000e+00 : f32
    %314 = vector.shape_cast %202 : vector<1x64xi1> to vector<1x64xi1>
    %315 = vector.broadcast %314 : vector<1x64xi1> to vector<2x64xi1>
    %316 = vector.broadcast %cst_100 : f32 to vector<2x64xf32>
    %317 = arith.select %315, %313, %316 : vector<2x64xi1>, vector<2x64xf32>
    %318 = arith.addf %309, %317 : vector<2x64xf32>
    %319 = vector.extract_strided_slice %283 {offsets = [8, 0], sizes = [2, 64], strides = [1, 1]} : vector<18x64xf32> to vector<2x64xf32>
    %320 = arith.addf %318, %319 : vector<2x64xf32>
    %321 = vector.extract_strided_slice %283 {offsets = [10, 0], sizes = [2, 64], strides = [1, 1]} : vector<18x64xf32> to vector<2x64xf32>
    %322 = vector.extract_strided_slice %321 {offsets = [0, 1], sizes = [2, 63], strides = [1, 1]} : vector<2x64xf32> to vector<2x63xf32>
    %323 = vector.extract_strided_slice %321 {offsets = [0, 0], sizes = [2, 1], strides = [1, 1]} : vector<2x64xf32> to vector<2x1xf32>
    %324 = tpu.concatenate %322, %323 in 1 : vector<2x63xf32>, vector<2x1xf32> -> vector<2x64xf32>
    %cst_101 = arith.constant 0.000000e+00 : f32
    %325 = vector.shape_cast %215 : vector<1x64xi1> to vector<1x64xi1>
    %326 = vector.broadcast %325 : vector<1x64xi1> to vector<2x64xi1>
    %327 = vector.broadcast %cst_101 : f32 to vector<2x64xf32>
    %328 = arith.select %326, %324, %327 : vector<2x64xi1>, vector<2x64xf32>
    %329 = arith.addf %320, %328 : vector<2x64xf32>
    %330 = vector.extract_strided_slice %283 {offsets = [12, 0], sizes = [2, 64], strides = [1, 1]} : vector<18x64xf32> to vector<2x64xf32>
    %331 = vector.extract_strided_slice %330 {offsets = [0, 7], sizes = [2, 57], strides = [1, 1]} : vector<2x64xf32> to vector<2x57xf32>
    %332 = vector.extract_strided_slice %330 {offsets = [0, 0], sizes = [2, 7], strides = [1, 1]} : vector<2x64xf32> to vector<2x7xf32>
    %333 = tpu.concatenate %331, %332 in 1 : vector<2x57xf32>, vector<2x7xf32> -> vector<2x64xf32>
    %cst_102 = arith.constant 0.000000e+00 : f32
    %334 = vector.shape_cast %229 : vector<1x64xi1> to vector<1x64xi1>
    %335 = vector.broadcast %334 : vector<1x64xi1> to vector<2x64xi1>
    %336 = vector.broadcast %cst_102 : f32 to vector<2x64xf32>
    %337 = arith.select %335, %333, %336 : vector<2x64xi1>, vector<2x64xf32>
    %338 = arith.addf %329, %337 : vector<2x64xf32>
    %339 = vector.extract_strided_slice %283 {offsets = [14, 0], sizes = [2, 64], strides = [1, 1]} : vector<18x64xf32> to vector<2x64xf32>
    %340 = vector.extract_strided_slice %339 {offsets = [0, 8], sizes = [2, 56], strides = [1, 1]} : vector<2x64xf32> to vector<2x56xf32>
    %341 = vector.extract_strided_slice %339 {offsets = [0, 0], sizes = [2, 8], strides = [1, 1]} : vector<2x64xf32> to vector<2x8xf32>
    %342 = tpu.concatenate %340, %341 in 1 : vector<2x56xf32>, vector<2x8xf32> -> vector<2x64xf32>
    %cst_103 = arith.constant 0.000000e+00 : f32
    %343 = vector.shape_cast %240 : vector<1x64xi1> to vector<1x64xi1>
    %344 = vector.broadcast %343 : vector<1x64xi1> to vector<2x64xi1>
    %345 = vector.broadcast %cst_103 : f32 to vector<2x64xf32>
    %346 = arith.select %344, %342, %345 : vector<2x64xi1>, vector<2x64xf32>
    %347 = arith.addf %338, %346 : vector<2x64xf32>
    %348 = vector.extract_strided_slice %283 {offsets = [16, 0], sizes = [2, 64], strides = [1, 1]} : vector<18x64xf32> to vector<2x64xf32>
    %349 = vector.extract_strided_slice %348 {offsets = [0, 9], sizes = [2, 55], strides = [1, 1]} : vector<2x64xf32> to vector<2x55xf32>
    %350 = vector.extract_strided_slice %348 {offsets = [0, 0], sizes = [2, 9], strides = [1, 1]} : vector<2x64xf32> to vector<2x9xf32>
    %351 = tpu.concatenate %349, %350 in 1 : vector<2x55xf32>, vector<2x9xf32> -> vector<2x64xf32>
    %cst_104 = arith.constant 0.000000e+00 : f32
    %352 = vector.shape_cast %254 : vector<1x64xi1> to vector<1x64xi1>
    %353 = vector.broadcast %352 : vector<1x64xi1> to vector<2x64xi1>
    %354 = vector.broadcast %cst_104 : f32 to vector<2x64xf32>
    %355 = arith.select %353, %351, %354 : vector<2x64xi1>, vector<2x64xf32>
    %356 = arith.addf %347, %355 : vector<2x64xf32>
    %c2_105 = arith.constant 2 : index
    %c0_106 = arith.constant 0 : index
    %c0_107 = arith.constant 0 : index
    %357 = vector.load %arg5[%c2_105, %c0_106, %c0_107] : memref<7x2x1xf32, #tpu.memory_space<vmem>>, vector<1x2x1xf32>
    %358 = vector.shape_cast %357 : vector<1x2x1xf32> to vector<2x1xf32>
    %359 = vector.broadcast %358 : vector<2x1xf32> to vector<2x64xf32>
    %360 = arith.addf %356, %359 : vector<2x64xf32>
    %c2_108 = arith.constant 2 : index
    %c0_109 = arith.constant 0 : index
    %c0_110 = arith.constant 0 : index
    %361 = vector.load %arg6[%c2_108, %c0_109, %c0_110] : memref<7x4x2xf32, #tpu.memory_space<vmem>>, vector<1x4x2xf32>
    %362 = vector.shape_cast %361 : vector<1x4x2xf32> to vector<4x2xf32>
    %cst_111 = arith.constant dense<0.000000e+00> : vector<4x64xf32>
    %363 = tpu.matmul %362, %360, %cst_111 {dimension_numbers = #tpu.dot_dimension_numbers<[1], [0], [0], [1], [0, 0, 1, 1], [], []>} : vector<4x2xf32>, vector<2x64xf32>, vector<4x64xf32> -> vector<4x64xf32>
    %c2_112 = arith.constant 2 : index
    %c0_113 = arith.constant 0 : index
    %c0_114 = arith.constant 0 : index
    %364 = vector.load %arg7[%c2_112, %c0_113, %c0_114] : memref<7x4x1xf32, #tpu.memory_space<vmem>>, vector<1x4x1xf32>
    %365 = vector.shape_cast %364 : vector<1x4x1xf32> to vector<4x1xf32>
    %366 = vector.broadcast %365 : vector<4x1xf32> to vector<4x64xf32>
    %367 = arith.addf %363, %366 : vector<4x64xf32>
    %368 = arith.addf %271, %367 : vector<4x64xf32>
    %369 = vector.extract_strided_slice %271 {offsets = [0, 1], sizes = [4, 63], strides = [1, 1]} : vector<4x64xf32> to vector<4x63xf32>
    %370 = vector.extract_strided_slice %271 {offsets = [0, 0], sizes = [4, 1], strides = [1, 1]} : vector<4x64xf32> to vector<4x1xf32>
    %371 = tpu.concatenate %369, %370 in 1 : vector<4x63xf32>, vector<4x1xf32> -> vector<4x64xf32>
    %372 = arith.maximumf %271, %371 : vector<4x64xf32>
    %373 = vector.extract_strided_slice %372 {offsets = [0, 8], sizes = [4, 56], strides = [1, 1]} : vector<4x64xf32> to vector<4x56xf32>
    %374 = vector.extract_strided_slice %372 {offsets = [0, 0], sizes = [4, 8], strides = [1, 1]} : vector<4x64xf32> to vector<4x8xf32>
    %375 = tpu.concatenate %373, %374 in 1 : vector<4x56xf32>, vector<4x8xf32> -> vector<4x64xf32>
    %376 = arith.maximumf %372, %375 : vector<4x64xf32>
    %c0_115 = arith.constant 0 : index
    %c0_116 = arith.constant 0 : index
    %377 = vector.load %arg9[%c0_115, %c0_116] : memref<64x16xf32, #tpu.memory_space<vmem>>, vector<64x16xf32>
    %cst_117 = arith.constant dense<0.000000e+00> : vector<4x16xf32>
    %378 = tpu.matmul %376, %377, %cst_117 {dimension_numbers = #tpu.dot_dimension_numbers<[1], [0], [0], [1], [0, 0, 1, 1], [], []>} : vector<4x64xf32>, vector<64x16xf32>, vector<4x16xf32> -> vector<4x16xf32>
    %c3 = arith.constant 3 : index
    %c0_118 = arith.constant 0 : index
    %c0_119 = arith.constant 0 : index
    %379 = vector.load %arg2[%c3, %c0_118, %c0_119] : memref<7x2x4xf32, #tpu.memory_space<vmem>>, vector<1x2x4xf32>
    %380 = vector.shape_cast %379 : vector<1x2x4xf32> to vector<2x4xf32>
    %cst_120 = arith.constant dense<0.000000e+00> : vector<2x16xf32>
    %381 = tpu.matmul %380, %378, %cst_120 {dimension_numbers = #tpu.dot_dimension_numbers<[1], [0], [0], [1], [0, 0, 1, 1], [], []>} : vector<2x4xf32>, vector<4x16xf32>, vector<2x16xf32> -> vector<2x16xf32>
    %c3_121 = arith.constant 3 : index
    %c0_122 = arith.constant 0 : index
    %c0_123 = arith.constant 0 : index
    %382 = vector.load %arg3[%c3_121, %c0_122, %c0_123] : memref<7x2x1xf32, #tpu.memory_space<vmem>>, vector<1x2x1xf32>
    %383 = vector.shape_cast %382 : vector<1x2x1xf32> to vector<2x1xf32>
    %384 = vector.broadcast %383 : vector<2x1xf32> to vector<2x16xf32>
    %385 = arith.addf %381, %384 : vector<2x16xf32>
    %cst_124 = arith.constant 0.000000e+00 : f32
    %386 = vector.broadcast %cst_124 : f32 to vector<2x16xf32>
    %387 = arith.maximumf %385, %386 : vector<2x16xf32>
    %c3_125 = arith.constant 3 : index
    %c0_126 = arith.constant 0 : index
    %c0_127 = arith.constant 0 : index
    %388 = vector.load %arg4[%c3_125, %c0_126, %c0_127] : memref<7x18x2xf32, #tpu.memory_space<vmem>>, vector<1x18x2xf32>
    %389 = vector.shape_cast %388 : vector<1x18x2xf32> to vector<18x2xf32>
    %cst_128 = arith.constant dense<0.000000e+00> : vector<18x16xf32>
    %390 = tpu.matmul %389, %387, %cst_128 {dimension_numbers = #tpu.dot_dimension_numbers<[1], [0], [0], [1], [0, 0, 1, 1], [], []>} : vector<18x2xf32>, vector<2x16xf32>, vector<18x16xf32> -> vector<18x16xf32>
    %391 = vector.extract_strided_slice %390 {offsets = [0, 0], sizes = [2, 16], strides = [1, 1]} : vector<18x16xf32> to vector<2x16xf32>
    %392 = vector.extract_strided_slice %391 {offsets = [0, 11], sizes = [2, 5], strides = [1, 1]} : vector<2x16xf32> to vector<2x5xf32>
    %393 = vector.extract_strided_slice %391 {offsets = [0, 0], sizes = [2, 11], strides = [1, 1]} : vector<2x16xf32> to vector<2x11xf32>
    %394 = tpu.concatenate %392, %393 in 1 : vector<2x5xf32>, vector<2x11xf32> -> vector<2x16xf32>
    %395 = tpu.iota {dimensions = array<i32: 1>} : vector<1x16xi32>
    %c2_i32 = arith.constant 2 : i32
    %396 = vector.broadcast %c2_i32 : i32 to vector<1x16xi32>
    %397 = arith.shrsi %395, %396 : vector<1x16xi32>
    %c3_i32_129 = arith.constant 3 : i32
    %398 = vector.broadcast %c3_i32_129 : i32 to vector<1x16xi32>
    %399 = arith.andi %395, %398 : vector<1x16xi32>
    %c1_i32_130 = arith.constant 1 : i32
    %400 = vector.broadcast %c1_i32_130 : i32 to vector<1x16xi32>
    %401 = arith.cmpi sge, %397, %400 : vector<1x16xi32>
    %c1_i32_131 = arith.constant 1 : i32
    %402 = vector.broadcast %c1_i32_131 : i32 to vector<1x16xi32>
    %403 = arith.cmpi sge, %399, %402 : vector<1x16xi32>
    %404 = arith.andi %401, %403 : vector<1x16xi1>
    %cst_132 = arith.constant 0.000000e+00 : f32
    %405 = vector.shape_cast %404 : vector<1x16xi1> to vector<1x16xi1>
    %406 = vector.broadcast %405 : vector<1x16xi1> to vector<2x16xi1>
    %407 = vector.broadcast %cst_132 : f32 to vector<2x16xf32>
    %408 = arith.select %406, %394, %407 : vector<2x16xi1>, vector<2x16xf32>
    %409 = vector.extract_strided_slice %390 {offsets = [2, 0], sizes = [2, 16], strides = [1, 1]} : vector<18x16xf32> to vector<2x16xf32>
    %410 = vector.extract_strided_slice %409 {offsets = [0, 12], sizes = [2, 4], strides = [1, 1]} : vector<2x16xf32> to vector<2x4xf32>
    %411 = vector.extract_strided_slice %409 {offsets = [0, 0], sizes = [2, 12], strides = [1, 1]} : vector<2x16xf32> to vector<2x12xf32>
    %412 = tpu.concatenate %410, %411 in 1 : vector<2x4xf32>, vector<2x12xf32> -> vector<2x16xf32>
    %c1_i32_133 = arith.constant 1 : i32
    %413 = vector.broadcast %c1_i32_133 : i32 to vector<1x16xi32>
    %414 = arith.cmpi sge, %397, %413 : vector<1x16xi32>
    %cst_134 = arith.constant 0.000000e+00 : f32
    %415 = vector.shape_cast %414 : vector<1x16xi1> to vector<1x16xi1>
    %416 = vector.broadcast %415 : vector<1x16xi1> to vector<2x16xi1>
    %417 = vector.broadcast %cst_134 : f32 to vector<2x16xf32>
    %418 = arith.select %416, %412, %417 : vector<2x16xi1>, vector<2x16xf32>
    %419 = arith.addf %408, %418 : vector<2x16xf32>
    %420 = vector.extract_strided_slice %390 {offsets = [4, 0], sizes = [2, 16], strides = [1, 1]} : vector<18x16xf32> to vector<2x16xf32>
    %421 = vector.extract_strided_slice %420 {offsets = [0, 13], sizes = [2, 3], strides = [1, 1]} : vector<2x16xf32> to vector<2x3xf32>
    %422 = vector.extract_strided_slice %420 {offsets = [0, 0], sizes = [2, 13], strides = [1, 1]} : vector<2x16xf32> to vector<2x13xf32>
    %423 = tpu.concatenate %421, %422 in 1 : vector<2x3xf32>, vector<2x13xf32> -> vector<2x16xf32>
    %c1_i32_135 = arith.constant 1 : i32
    %424 = vector.broadcast %c1_i32_135 : i32 to vector<1x16xi32>
    %425 = arith.cmpi sge, %397, %424 : vector<1x16xi32>
    %c3_i32_136 = arith.constant 3 : i32
    %426 = vector.broadcast %c3_i32_136 : i32 to vector<1x16xi32>
    %427 = arith.cmpi slt, %399, %426 : vector<1x16xi32>
    %428 = arith.andi %425, %427 : vector<1x16xi1>
    %cst_137 = arith.constant 0.000000e+00 : f32
    %429 = vector.shape_cast %428 : vector<1x16xi1> to vector<1x16xi1>
    %430 = vector.broadcast %429 : vector<1x16xi1> to vector<2x16xi1>
    %431 = vector.broadcast %cst_137 : f32 to vector<2x16xf32>
    %432 = arith.select %430, %423, %431 : vector<2x16xi1>, vector<2x16xf32>
    %433 = arith.addf %419, %432 : vector<2x16xf32>
    %434 = vector.extract_strided_slice %390 {offsets = [6, 0], sizes = [2, 16], strides = [1, 1]} : vector<18x16xf32> to vector<2x16xf32>
    %435 = vector.extract_strided_slice %434 {offsets = [0, 15], sizes = [2, 1], strides = [1, 1]} : vector<2x16xf32> to vector<2x1xf32>
    %436 = vector.extract_strided_slice %434 {offsets = [0, 0], sizes = [2, 15], strides = [1, 1]} : vector<2x16xf32> to vector<2x15xf32>
    %437 = tpu.concatenate %435, %436 in 1 : vector<2x1xf32>, vector<2x15xf32> -> vector<2x16xf32>
    %c1_i32_138 = arith.constant 1 : i32
    %438 = vector.broadcast %c1_i32_138 : i32 to vector<1x16xi32>
    %439 = arith.cmpi sge, %399, %438 : vector<1x16xi32>
    %cst_139 = arith.constant 0.000000e+00 : f32
    %440 = vector.shape_cast %439 : vector<1x16xi1> to vector<1x16xi1>
    %441 = vector.broadcast %440 : vector<1x16xi1> to vector<2x16xi1>
    %442 = vector.broadcast %cst_139 : f32 to vector<2x16xf32>
    %443 = arith.select %441, %437, %442 : vector<2x16xi1>, vector<2x16xf32>
    %444 = arith.addf %433, %443 : vector<2x16xf32>
    %445 = vector.extract_strided_slice %390 {offsets = [8, 0], sizes = [2, 16], strides = [1, 1]} : vector<18x16xf32> to vector<2x16xf32>
    %446 = arith.addf %444, %445 : vector<2x16xf32>
    %447 = vector.extract_strided_slice %390 {offsets = [10, 0], sizes = [2, 16], strides = [1, 1]} : vector<18x16xf32> to vector<2x16xf32>
    %448 = vector.extract_strided_slice %447 {offsets = [0, 1], sizes = [2, 15], strides = [1, 1]} : vector<2x16xf32> to vector<2x15xf32>
    %449 = vector.extract_strided_slice %447 {offsets = [0, 0], sizes = [2, 1], strides = [1, 1]} : vector<2x16xf32> to vector<2x1xf32>
    %450 = tpu.concatenate %448, %449 in 1 : vector<2x15xf32>, vector<2x1xf32> -> vector<2x16xf32>
    %c3_i32_140 = arith.constant 3 : i32
    %451 = vector.broadcast %c3_i32_140 : i32 to vector<1x16xi32>
    %452 = arith.cmpi slt, %399, %451 : vector<1x16xi32>
    %cst_141 = arith.constant 0.000000e+00 : f32
    %453 = vector.shape_cast %452 : vector<1x16xi1> to vector<1x16xi1>
    %454 = vector.broadcast %453 : vector<1x16xi1> to vector<2x16xi1>
    %455 = vector.broadcast %cst_141 : f32 to vector<2x16xf32>
    %456 = arith.select %454, %450, %455 : vector<2x16xi1>, vector<2x16xf32>
    %457 = arith.addf %446, %456 : vector<2x16xf32>
    %458 = vector.extract_strided_slice %390 {offsets = [12, 0], sizes = [2, 16], strides = [1, 1]} : vector<18x16xf32> to vector<2x16xf32>
    %459 = vector.extract_strided_slice %458 {offsets = [0, 3], sizes = [2, 13], strides = [1, 1]} : vector<2x16xf32> to vector<2x13xf32>
    %460 = vector.extract_strided_slice %458 {offsets = [0, 0], sizes = [2, 3], strides = [1, 1]} : vector<2x16xf32> to vector<2x3xf32>
    %461 = tpu.concatenate %459, %460 in 1 : vector<2x13xf32>, vector<2x3xf32> -> vector<2x16xf32>
    %c3_i32_142 = arith.constant 3 : i32
    %462 = vector.broadcast %c3_i32_142 : i32 to vector<1x16xi32>
    %463 = arith.cmpi slt, %397, %462 : vector<1x16xi32>
    %c1_i32_143 = arith.constant 1 : i32
    %464 = vector.broadcast %c1_i32_143 : i32 to vector<1x16xi32>
    %465 = arith.cmpi sge, %399, %464 : vector<1x16xi32>
    %466 = arith.andi %463, %465 : vector<1x16xi1>
    %cst_144 = arith.constant 0.000000e+00 : f32
    %467 = vector.shape_cast %466 : vector<1x16xi1> to vector<1x16xi1>
    %468 = vector.broadcast %467 : vector<1x16xi1> to vector<2x16xi1>
    %469 = vector.broadcast %cst_144 : f32 to vector<2x16xf32>
    %470 = arith.select %468, %461, %469 : vector<2x16xi1>, vector<2x16xf32>
    %471 = arith.addf %457, %470 : vector<2x16xf32>
    %472 = vector.extract_strided_slice %390 {offsets = [14, 0], sizes = [2, 16], strides = [1, 1]} : vector<18x16xf32> to vector<2x16xf32>
    %473 = vector.extract_strided_slice %472 {offsets = [0, 4], sizes = [2, 12], strides = [1, 1]} : vector<2x16xf32> to vector<2x12xf32>
    %474 = vector.extract_strided_slice %472 {offsets = [0, 0], sizes = [2, 4], strides = [1, 1]} : vector<2x16xf32> to vector<2x4xf32>
    %475 = tpu.concatenate %473, %474 in 1 : vector<2x12xf32>, vector<2x4xf32> -> vector<2x16xf32>
    %c3_i32_145 = arith.constant 3 : i32
    %476 = vector.broadcast %c3_i32_145 : i32 to vector<1x16xi32>
    %477 = arith.cmpi slt, %397, %476 : vector<1x16xi32>
    %cst_146 = arith.constant 0.000000e+00 : f32
    %478 = vector.shape_cast %477 : vector<1x16xi1> to vector<1x16xi1>
    %479 = vector.broadcast %478 : vector<1x16xi1> to vector<2x16xi1>
    %480 = vector.broadcast %cst_146 : f32 to vector<2x16xf32>
    %481 = arith.select %479, %475, %480 : vector<2x16xi1>, vector<2x16xf32>
    %482 = arith.addf %471, %481 : vector<2x16xf32>
    %483 = vector.extract_strided_slice %390 {offsets = [16, 0], sizes = [2, 16], strides = [1, 1]} : vector<18x16xf32> to vector<2x16xf32>
    %484 = vector.extract_strided_slice %483 {offsets = [0, 5], sizes = [2, 11], strides = [1, 1]} : vector<2x16xf32> to vector<2x11xf32>
    %485 = vector.extract_strided_slice %483 {offsets = [0, 0], sizes = [2, 5], strides = [1, 1]} : vector<2x16xf32> to vector<2x5xf32>
    %486 = tpu.concatenate %484, %485 in 1 : vector<2x11xf32>, vector<2x5xf32> -> vector<2x16xf32>
    %c3_i32_147 = arith.constant 3 : i32
    %487 = vector.broadcast %c3_i32_147 : i32 to vector<1x16xi32>
    %488 = arith.cmpi slt, %397, %487 : vector<1x16xi32>
    %c3_i32_148 = arith.constant 3 : i32
    %489 = vector.broadcast %c3_i32_148 : i32 to vector<1x16xi32>
    %490 = arith.cmpi slt, %399, %489 : vector<1x16xi32>
    %491 = arith.andi %488, %490 : vector<1x16xi1>
    %cst_149 = arith.constant 0.000000e+00 : f32
    %492 = vector.shape_cast %491 : vector<1x16xi1> to vector<1x16xi1>
    %493 = vector.broadcast %492 : vector<1x16xi1> to vector<2x16xi1>
    %494 = vector.broadcast %cst_149 : f32 to vector<2x16xf32>
    %495 = arith.select %493, %486, %494 : vector<2x16xi1>, vector<2x16xf32>
    %496 = arith.addf %482, %495 : vector<2x16xf32>
    %c3_150 = arith.constant 3 : index
    %c0_151 = arith.constant 0 : index
    %c0_152 = arith.constant 0 : index
    %497 = vector.load %arg5[%c3_150, %c0_151, %c0_152] : memref<7x2x1xf32, #tpu.memory_space<vmem>>, vector<1x2x1xf32>
    %498 = vector.shape_cast %497 : vector<1x2x1xf32> to vector<2x1xf32>
    %499 = vector.broadcast %498 : vector<2x1xf32> to vector<2x16xf32>
    %500 = arith.addf %496, %499 : vector<2x16xf32>
    %c3_153 = arith.constant 3 : index
    %c0_154 = arith.constant 0 : index
    %c0_155 = arith.constant 0 : index
    %501 = vector.load %arg6[%c3_153, %c0_154, %c0_155] : memref<7x4x2xf32, #tpu.memory_space<vmem>>, vector<1x4x2xf32>
    %502 = vector.shape_cast %501 : vector<1x4x2xf32> to vector<4x2xf32>
    %cst_156 = arith.constant dense<0.000000e+00> : vector<4x16xf32>
    %503 = tpu.matmul %502, %500, %cst_156 {dimension_numbers = #tpu.dot_dimension_numbers<[1], [0], [0], [1], [0, 0, 1, 1], [], []>} : vector<4x2xf32>, vector<2x16xf32>, vector<4x16xf32> -> vector<4x16xf32>
    %c3_157 = arith.constant 3 : index
    %c0_158 = arith.constant 0 : index
    %c0_159 = arith.constant 0 : index
    %504 = vector.load %arg7[%c3_157, %c0_158, %c0_159] : memref<7x4x1xf32, #tpu.memory_space<vmem>>, vector<1x4x1xf32>
    %505 = vector.shape_cast %504 : vector<1x4x1xf32> to vector<4x1xf32>
    %506 = vector.broadcast %505 : vector<4x1xf32> to vector<4x16xf32>
    %507 = arith.addf %503, %506 : vector<4x16xf32>
    %508 = arith.addf %378, %507 : vector<4x16xf32>
    %c4 = arith.constant 4 : index
    %c0_160 = arith.constant 0 : index
    %c0_161 = arith.constant 0 : index
    %509 = vector.load %arg2[%c4, %c0_160, %c0_161] : memref<7x2x4xf32, #tpu.memory_space<vmem>>, vector<1x2x4xf32>
    %510 = vector.shape_cast %509 : vector<1x2x4xf32> to vector<2x4xf32>
    %cst_162 = arith.constant dense<0.000000e+00> : vector<2x16xf32>
    %511 = tpu.matmul %510, %508, %cst_162 {dimension_numbers = #tpu.dot_dimension_numbers<[1], [0], [0], [1], [0, 0, 1, 1], [], []>} : vector<2x4xf32>, vector<4x16xf32>, vector<2x16xf32> -> vector<2x16xf32>
    %c4_163 = arith.constant 4 : index
    %c0_164 = arith.constant 0 : index
    %c0_165 = arith.constant 0 : index
    %512 = vector.load %arg3[%c4_163, %c0_164, %c0_165] : memref<7x2x1xf32, #tpu.memory_space<vmem>>, vector<1x2x1xf32>
    %513 = vector.shape_cast %512 : vector<1x2x1xf32> to vector<2x1xf32>
    %514 = vector.broadcast %513 : vector<2x1xf32> to vector<2x16xf32>
    %515 = arith.addf %511, %514 : vector<2x16xf32>
    %cst_166 = arith.constant 0.000000e+00 : f32
    %516 = vector.broadcast %cst_166 : f32 to vector<2x16xf32>
    %517 = arith.maximumf %515, %516 : vector<2x16xf32>
    %c4_167 = arith.constant 4 : index
    %c0_168 = arith.constant 0 : index
    %c0_169 = arith.constant 0 : index
    %518 = vector.load %arg4[%c4_167, %c0_168, %c0_169] : memref<7x18x2xf32, #tpu.memory_space<vmem>>, vector<1x18x2xf32>
    %519 = vector.shape_cast %518 : vector<1x18x2xf32> to vector<18x2xf32>
    %cst_170 = arith.constant dense<0.000000e+00> : vector<18x16xf32>
    %520 = tpu.matmul %519, %517, %cst_170 {dimension_numbers = #tpu.dot_dimension_numbers<[1], [0], [0], [1], [0, 0, 1, 1], [], []>} : vector<18x2xf32>, vector<2x16xf32>, vector<18x16xf32> -> vector<18x16xf32>
    %521 = vector.extract_strided_slice %520 {offsets = [0, 0], sizes = [2, 16], strides = [1, 1]} : vector<18x16xf32> to vector<2x16xf32>
    %522 = vector.extract_strided_slice %521 {offsets = [0, 11], sizes = [2, 5], strides = [1, 1]} : vector<2x16xf32> to vector<2x5xf32>
    %523 = vector.extract_strided_slice %521 {offsets = [0, 0], sizes = [2, 11], strides = [1, 1]} : vector<2x16xf32> to vector<2x11xf32>
    %524 = tpu.concatenate %522, %523 in 1 : vector<2x5xf32>, vector<2x11xf32> -> vector<2x16xf32>
    %cst_171 = arith.constant 0.000000e+00 : f32
    %525 = vector.shape_cast %404 : vector<1x16xi1> to vector<1x16xi1>
    %526 = vector.broadcast %525 : vector<1x16xi1> to vector<2x16xi1>
    %527 = vector.broadcast %cst_171 : f32 to vector<2x16xf32>
    %528 = arith.select %526, %524, %527 : vector<2x16xi1>, vector<2x16xf32>
    %529 = vector.extract_strided_slice %520 {offsets = [2, 0], sizes = [2, 16], strides = [1, 1]} : vector<18x16xf32> to vector<2x16xf32>
    %530 = vector.extract_strided_slice %529 {offsets = [0, 12], sizes = [2, 4], strides = [1, 1]} : vector<2x16xf32> to vector<2x4xf32>
    %531 = vector.extract_strided_slice %529 {offsets = [0, 0], sizes = [2, 12], strides = [1, 1]} : vector<2x16xf32> to vector<2x12xf32>
    %532 = tpu.concatenate %530, %531 in 1 : vector<2x4xf32>, vector<2x12xf32> -> vector<2x16xf32>
    %cst_172 = arith.constant 0.000000e+00 : f32
    %533 = vector.shape_cast %414 : vector<1x16xi1> to vector<1x16xi1>
    %534 = vector.broadcast %533 : vector<1x16xi1> to vector<2x16xi1>
    %535 = vector.broadcast %cst_172 : f32 to vector<2x16xf32>
    %536 = arith.select %534, %532, %535 : vector<2x16xi1>, vector<2x16xf32>
    %537 = arith.addf %528, %536 : vector<2x16xf32>
    %538 = vector.extract_strided_slice %520 {offsets = [4, 0], sizes = [2, 16], strides = [1, 1]} : vector<18x16xf32> to vector<2x16xf32>
    %539 = vector.extract_strided_slice %538 {offsets = [0, 13], sizes = [2, 3], strides = [1, 1]} : vector<2x16xf32> to vector<2x3xf32>
    %540 = vector.extract_strided_slice %538 {offsets = [0, 0], sizes = [2, 13], strides = [1, 1]} : vector<2x16xf32> to vector<2x13xf32>
    %541 = tpu.concatenate %539, %540 in 1 : vector<2x3xf32>, vector<2x13xf32> -> vector<2x16xf32>
    %cst_173 = arith.constant 0.000000e+00 : f32
    %542 = vector.shape_cast %428 : vector<1x16xi1> to vector<1x16xi1>
    %543 = vector.broadcast %542 : vector<1x16xi1> to vector<2x16xi1>
    %544 = vector.broadcast %cst_173 : f32 to vector<2x16xf32>
    %545 = arith.select %543, %541, %544 : vector<2x16xi1>, vector<2x16xf32>
    %546 = arith.addf %537, %545 : vector<2x16xf32>
    %547 = vector.extract_strided_slice %520 {offsets = [6, 0], sizes = [2, 16], strides = [1, 1]} : vector<18x16xf32> to vector<2x16xf32>
    %548 = vector.extract_strided_slice %547 {offsets = [0, 15], sizes = [2, 1], strides = [1, 1]} : vector<2x16xf32> to vector<2x1xf32>
    %549 = vector.extract_strided_slice %547 {offsets = [0, 0], sizes = [2, 15], strides = [1, 1]} : vector<2x16xf32> to vector<2x15xf32>
    %550 = tpu.concatenate %548, %549 in 1 : vector<2x1xf32>, vector<2x15xf32> -> vector<2x16xf32>
    %cst_174 = arith.constant 0.000000e+00 : f32
    %551 = vector.shape_cast %439 : vector<1x16xi1> to vector<1x16xi1>
    %552 = vector.broadcast %551 : vector<1x16xi1> to vector<2x16xi1>
    %553 = vector.broadcast %cst_174 : f32 to vector<2x16xf32>
    %554 = arith.select %552, %550, %553 : vector<2x16xi1>, vector<2x16xf32>
    %555 = arith.addf %546, %554 : vector<2x16xf32>
    %556 = vector.extract_strided_slice %520 {offsets = [8, 0], sizes = [2, 16], strides = [1, 1]} : vector<18x16xf32> to vector<2x16xf32>
    %557 = arith.addf %555, %556 : vector<2x16xf32>
    %558 = vector.extract_strided_slice %520 {offsets = [10, 0], sizes = [2, 16], strides = [1, 1]} : vector<18x16xf32> to vector<2x16xf32>
    %559 = vector.extract_strided_slice %558 {offsets = [0, 1], sizes = [2, 15], strides = [1, 1]} : vector<2x16xf32> to vector<2x15xf32>
    %560 = vector.extract_strided_slice %558 {offsets = [0, 0], sizes = [2, 1], strides = [1, 1]} : vector<2x16xf32> to vector<2x1xf32>
    %561 = tpu.concatenate %559, %560 in 1 : vector<2x15xf32>, vector<2x1xf32> -> vector<2x16xf32>
    %cst_175 = arith.constant 0.000000e+00 : f32
    %562 = vector.shape_cast %452 : vector<1x16xi1> to vector<1x16xi1>
    %563 = vector.broadcast %562 : vector<1x16xi1> to vector<2x16xi1>
    %564 = vector.broadcast %cst_175 : f32 to vector<2x16xf32>
    %565 = arith.select %563, %561, %564 : vector<2x16xi1>, vector<2x16xf32>
    %566 = arith.addf %557, %565 : vector<2x16xf32>
    %567 = vector.extract_strided_slice %520 {offsets = [12, 0], sizes = [2, 16], strides = [1, 1]} : vector<18x16xf32> to vector<2x16xf32>
    %568 = vector.extract_strided_slice %567 {offsets = [0, 3], sizes = [2, 13], strides = [1, 1]} : vector<2x16xf32> to vector<2x13xf32>
    %569 = vector.extract_strided_slice %567 {offsets = [0, 0], sizes = [2, 3], strides = [1, 1]} : vector<2x16xf32> to vector<2x3xf32>
    %570 = tpu.concatenate %568, %569 in 1 : vector<2x13xf32>, vector<2x3xf32> -> vector<2x16xf32>
    %cst_176 = arith.constant 0.000000e+00 : f32
    %571 = vector.shape_cast %466 : vector<1x16xi1> to vector<1x16xi1>
    %572 = vector.broadcast %571 : vector<1x16xi1> to vector<2x16xi1>
    %573 = vector.broadcast %cst_176 : f32 to vector<2x16xf32>
    %574 = arith.select %572, %570, %573 : vector<2x16xi1>, vector<2x16xf32>
    %575 = arith.addf %566, %574 : vector<2x16xf32>
    %576 = vector.extract_strided_slice %520 {offsets = [14, 0], sizes = [2, 16], strides = [1, 1]} : vector<18x16xf32> to vector<2x16xf32>
    %577 = vector.extract_strided_slice %576 {offsets = [0, 4], sizes = [2, 12], strides = [1, 1]} : vector<2x16xf32> to vector<2x12xf32>
    %578 = vector.extract_strided_slice %576 {offsets = [0, 0], sizes = [2, 4], strides = [1, 1]} : vector<2x16xf32> to vector<2x4xf32>
    %579 = tpu.concatenate %577, %578 in 1 : vector<2x12xf32>, vector<2x4xf32> -> vector<2x16xf32>
    %cst_177 = arith.constant 0.000000e+00 : f32
    %580 = vector.shape_cast %477 : vector<1x16xi1> to vector<1x16xi1>
    %581 = vector.broadcast %580 : vector<1x16xi1> to vector<2x16xi1>
    %582 = vector.broadcast %cst_177 : f32 to vector<2x16xf32>
    %583 = arith.select %581, %579, %582 : vector<2x16xi1>, vector<2x16xf32>
    %584 = arith.addf %575, %583 : vector<2x16xf32>
    %585 = vector.extract_strided_slice %520 {offsets = [16, 0], sizes = [2, 16], strides = [1, 1]} : vector<18x16xf32> to vector<2x16xf32>
    %586 = vector.extract_strided_slice %585 {offsets = [0, 5], sizes = [2, 11], strides = [1, 1]} : vector<2x16xf32> to vector<2x11xf32>
    %587 = vector.extract_strided_slice %585 {offsets = [0, 0], sizes = [2, 5], strides = [1, 1]} : vector<2x16xf32> to vector<2x5xf32>
    %588 = tpu.concatenate %586, %587 in 1 : vector<2x11xf32>, vector<2x5xf32> -> vector<2x16xf32>
    %cst_178 = arith.constant 0.000000e+00 : f32
    %589 = vector.shape_cast %491 : vector<1x16xi1> to vector<1x16xi1>
    %590 = vector.broadcast %589 : vector<1x16xi1> to vector<2x16xi1>
    %591 = vector.broadcast %cst_178 : f32 to vector<2x16xf32>
    %592 = arith.select %590, %588, %591 : vector<2x16xi1>, vector<2x16xf32>
    %593 = arith.addf %584, %592 : vector<2x16xf32>
    %c4_179 = arith.constant 4 : index
    %c0_180 = arith.constant 0 : index
    %c0_181 = arith.constant 0 : index
    %594 = vector.load %arg5[%c4_179, %c0_180, %c0_181] : memref<7x2x1xf32, #tpu.memory_space<vmem>>, vector<1x2x1xf32>
    %595 = vector.shape_cast %594 : vector<1x2x1xf32> to vector<2x1xf32>
    %596 = vector.broadcast %595 : vector<2x1xf32> to vector<2x16xf32>
    %597 = arith.addf %593, %596 : vector<2x16xf32>
    %c4_182 = arith.constant 4 : index
    %c0_183 = arith.constant 0 : index
    %c0_184 = arith.constant 0 : index
    %598 = vector.load %arg6[%c4_182, %c0_183, %c0_184] : memref<7x4x2xf32, #tpu.memory_space<vmem>>, vector<1x4x2xf32>
    %599 = vector.shape_cast %598 : vector<1x4x2xf32> to vector<4x2xf32>
    %cst_185 = arith.constant dense<0.000000e+00> : vector<4x16xf32>
    %600 = tpu.matmul %599, %597, %cst_185 {dimension_numbers = #tpu.dot_dimension_numbers<[1], [0], [0], [1], [0, 0, 1, 1], [], []>} : vector<4x2xf32>, vector<2x16xf32>, vector<4x16xf32> -> vector<4x16xf32>
    %c4_186 = arith.constant 4 : index
    %c0_187 = arith.constant 0 : index
    %c0_188 = arith.constant 0 : index
    %601 = vector.load %arg7[%c4_186, %c0_187, %c0_188] : memref<7x4x1xf32, #tpu.memory_space<vmem>>, vector<1x4x1xf32>
    %602 = vector.shape_cast %601 : vector<1x4x1xf32> to vector<4x1xf32>
    %603 = vector.broadcast %602 : vector<4x1xf32> to vector<4x16xf32>
    %604 = arith.addf %600, %603 : vector<4x16xf32>
    %605 = arith.addf %508, %604 : vector<4x16xf32>
    %c5 = arith.constant 5 : index
    %c0_189 = arith.constant 0 : index
    %c0_190 = arith.constant 0 : index
    %606 = vector.load %arg2[%c5, %c0_189, %c0_190] : memref<7x2x4xf32, #tpu.memory_space<vmem>>, vector<1x2x4xf32>
    %607 = vector.shape_cast %606 : vector<1x2x4xf32> to vector<2x4xf32>
    %cst_191 = arith.constant dense<0.000000e+00> : vector<2x16xf32>
    %608 = tpu.matmul %607, %605, %cst_191 {dimension_numbers = #tpu.dot_dimension_numbers<[1], [0], [0], [1], [0, 0, 1, 1], [], []>} : vector<2x4xf32>, vector<4x16xf32>, vector<2x16xf32> -> vector<2x16xf32>
    %c5_192 = arith.constant 5 : index
    %c0_193 = arith.constant 0 : index
    %c0_194 = arith.constant 0 : index
    %609 = vector.load %arg3[%c5_192, %c0_193, %c0_194] : memref<7x2x1xf32, #tpu.memory_space<vmem>>, vector<1x2x1xf32>
    %610 = vector.shape_cast %609 : vector<1x2x1xf32> to vector<2x1xf32>
    %611 = vector.broadcast %610 : vector<2x1xf32> to vector<2x16xf32>
    %612 = arith.addf %608, %611 : vector<2x16xf32>
    %cst_195 = arith.constant 0.000000e+00 : f32
    %613 = vector.broadcast %cst_195 : f32 to vector<2x16xf32>
    %614 = arith.maximumf %612, %613 : vector<2x16xf32>
    %c5_196 = arith.constant 5 : index
    %c0_197 = arith.constant 0 : index
    %c0_198 = arith.constant 0 : index
    %615 = vector.load %arg4[%c5_196, %c0_197, %c0_198] : memref<7x18x2xf32, #tpu.memory_space<vmem>>, vector<1x18x2xf32>
    %616 = vector.shape_cast %615 : vector<1x18x2xf32> to vector<18x2xf32>
    %cst_199 = arith.constant dense<0.000000e+00> : vector<18x16xf32>
    %617 = tpu.matmul %616, %614, %cst_199 {dimension_numbers = #tpu.dot_dimension_numbers<[1], [0], [0], [1], [0, 0, 1, 1], [], []>} : vector<18x2xf32>, vector<2x16xf32>, vector<18x16xf32> -> vector<18x16xf32>
    %618 = vector.extract_strided_slice %617 {offsets = [0, 0], sizes = [2, 16], strides = [1, 1]} : vector<18x16xf32> to vector<2x16xf32>
    %619 = vector.extract_strided_slice %618 {offsets = [0, 11], sizes = [2, 5], strides = [1, 1]} : vector<2x16xf32> to vector<2x5xf32>
    %620 = vector.extract_strided_slice %618 {offsets = [0, 0], sizes = [2, 11], strides = [1, 1]} : vector<2x16xf32> to vector<2x11xf32>
    %621 = tpu.concatenate %619, %620 in 1 : vector<2x5xf32>, vector<2x11xf32> -> vector<2x16xf32>
    %cst_200 = arith.constant 0.000000e+00 : f32
    %622 = vector.shape_cast %404 : vector<1x16xi1> to vector<1x16xi1>
    %623 = vector.broadcast %622 : vector<1x16xi1> to vector<2x16xi1>
    %624 = vector.broadcast %cst_200 : f32 to vector<2x16xf32>
    %625 = arith.select %623, %621, %624 : vector<2x16xi1>, vector<2x16xf32>
    %626 = vector.extract_strided_slice %617 {offsets = [2, 0], sizes = [2, 16], strides = [1, 1]} : vector<18x16xf32> to vector<2x16xf32>
    %627 = vector.extract_strided_slice %626 {offsets = [0, 12], sizes = [2, 4], strides = [1, 1]} : vector<2x16xf32> to vector<2x4xf32>
    %628 = vector.extract_strided_slice %626 {offsets = [0, 0], sizes = [2, 12], strides = [1, 1]} : vector<2x16xf32> to vector<2x12xf32>
    %629 = tpu.concatenate %627, %628 in 1 : vector<2x4xf32>, vector<2x12xf32> -> vector<2x16xf32>
    %cst_201 = arith.constant 0.000000e+00 : f32
    %630 = vector.shape_cast %414 : vector<1x16xi1> to vector<1x16xi1>
    %631 = vector.broadcast %630 : vector<1x16xi1> to vector<2x16xi1>
    %632 = vector.broadcast %cst_201 : f32 to vector<2x16xf32>
    %633 = arith.select %631, %629, %632 : vector<2x16xi1>, vector<2x16xf32>
    %634 = arith.addf %625, %633 : vector<2x16xf32>
    %635 = vector.extract_strided_slice %617 {offsets = [4, 0], sizes = [2, 16], strides = [1, 1]} : vector<18x16xf32> to vector<2x16xf32>
    %636 = vector.extract_strided_slice %635 {offsets = [0, 13], sizes = [2, 3], strides = [1, 1]} : vector<2x16xf32> to vector<2x3xf32>
    %637 = vector.extract_strided_slice %635 {offsets = [0, 0], sizes = [2, 13], strides = [1, 1]} : vector<2x16xf32> to vector<2x13xf32>
    %638 = tpu.concatenate %636, %637 in 1 : vector<2x3xf32>, vector<2x13xf32> -> vector<2x16xf32>
    %cst_202 = arith.constant 0.000000e+00 : f32
    %639 = vector.shape_cast %428 : vector<1x16xi1> to vector<1x16xi1>
    %640 = vector.broadcast %639 : vector<1x16xi1> to vector<2x16xi1>
    %641 = vector.broadcast %cst_202 : f32 to vector<2x16xf32>
    %642 = arith.select %640, %638, %641 : vector<2x16xi1>, vector<2x16xf32>
    %643 = arith.addf %634, %642 : vector<2x16xf32>
    %644 = vector.extract_strided_slice %617 {offsets = [6, 0], sizes = [2, 16], strides = [1, 1]} : vector<18x16xf32> to vector<2x16xf32>
    %645 = vector.extract_strided_slice %644 {offsets = [0, 15], sizes = [2, 1], strides = [1, 1]} : vector<2x16xf32> to vector<2x1xf32>
    %646 = vector.extract_strided_slice %644 {offsets = [0, 0], sizes = [2, 15], strides = [1, 1]} : vector<2x16xf32> to vector<2x15xf32>
    %647 = tpu.concatenate %645, %646 in 1 : vector<2x1xf32>, vector<2x15xf32> -> vector<2x16xf32>
    %cst_203 = arith.constant 0.000000e+00 : f32
    %648 = vector.shape_cast %439 : vector<1x16xi1> to vector<1x16xi1>
    %649 = vector.broadcast %648 : vector<1x16xi1> to vector<2x16xi1>
    %650 = vector.broadcast %cst_203 : f32 to vector<2x16xf32>
    %651 = arith.select %649, %647, %650 : vector<2x16xi1>, vector<2x16xf32>
    %652 = arith.addf %643, %651 : vector<2x16xf32>
    %653 = vector.extract_strided_slice %617 {offsets = [8, 0], sizes = [2, 16], strides = [1, 1]} : vector<18x16xf32> to vector<2x16xf32>
    %654 = arith.addf %652, %653 : vector<2x16xf32>
    %655 = vector.extract_strided_slice %617 {offsets = [10, 0], sizes = [2, 16], strides = [1, 1]} : vector<18x16xf32> to vector<2x16xf32>
    %656 = vector.extract_strided_slice %655 {offsets = [0, 1], sizes = [2, 15], strides = [1, 1]} : vector<2x16xf32> to vector<2x15xf32>
    %657 = vector.extract_strided_slice %655 {offsets = [0, 0], sizes = [2, 1], strides = [1, 1]} : vector<2x16xf32> to vector<2x1xf32>
    %658 = tpu.concatenate %656, %657 in 1 : vector<2x15xf32>, vector<2x1xf32> -> vector<2x16xf32>
    %cst_204 = arith.constant 0.000000e+00 : f32
    %659 = vector.shape_cast %452 : vector<1x16xi1> to vector<1x16xi1>
    %660 = vector.broadcast %659 : vector<1x16xi1> to vector<2x16xi1>
    %661 = vector.broadcast %cst_204 : f32 to vector<2x16xf32>
    %662 = arith.select %660, %658, %661 : vector<2x16xi1>, vector<2x16xf32>
    %663 = arith.addf %654, %662 : vector<2x16xf32>
    %664 = vector.extract_strided_slice %617 {offsets = [12, 0], sizes = [2, 16], strides = [1, 1]} : vector<18x16xf32> to vector<2x16xf32>
    %665 = vector.extract_strided_slice %664 {offsets = [0, 3], sizes = [2, 13], strides = [1, 1]} : vector<2x16xf32> to vector<2x13xf32>
    %666 = vector.extract_strided_slice %664 {offsets = [0, 0], sizes = [2, 3], strides = [1, 1]} : vector<2x16xf32> to vector<2x3xf32>
    %667 = tpu.concatenate %665, %666 in 1 : vector<2x13xf32>, vector<2x3xf32> -> vector<2x16xf32>
    %cst_205 = arith.constant 0.000000e+00 : f32
    %668 = vector.shape_cast %466 : vector<1x16xi1> to vector<1x16xi1>
    %669 = vector.broadcast %668 : vector<1x16xi1> to vector<2x16xi1>
    %670 = vector.broadcast %cst_205 : f32 to vector<2x16xf32>
    %671 = arith.select %669, %667, %670 : vector<2x16xi1>, vector<2x16xf32>
    %672 = arith.addf %663, %671 : vector<2x16xf32>
    %673 = vector.extract_strided_slice %617 {offsets = [14, 0], sizes = [2, 16], strides = [1, 1]} : vector<18x16xf32> to vector<2x16xf32>
    %674 = vector.extract_strided_slice %673 {offsets = [0, 4], sizes = [2, 12], strides = [1, 1]} : vector<2x16xf32> to vector<2x12xf32>
    %675 = vector.extract_strided_slice %673 {offsets = [0, 0], sizes = [2, 4], strides = [1, 1]} : vector<2x16xf32> to vector<2x4xf32>
    %676 = tpu.concatenate %674, %675 in 1 : vector<2x12xf32>, vector<2x4xf32> -> vector<2x16xf32>
    %cst_206 = arith.constant 0.000000e+00 : f32
    %677 = vector.shape_cast %477 : vector<1x16xi1> to vector<1x16xi1>
    %678 = vector.broadcast %677 : vector<1x16xi1> to vector<2x16xi1>
    %679 = vector.broadcast %cst_206 : f32 to vector<2x16xf32>
    %680 = arith.select %678, %676, %679 : vector<2x16xi1>, vector<2x16xf32>
    %681 = arith.addf %672, %680 : vector<2x16xf32>
    %682 = vector.extract_strided_slice %617 {offsets = [16, 0], sizes = [2, 16], strides = [1, 1]} : vector<18x16xf32> to vector<2x16xf32>
    %683 = vector.extract_strided_slice %682 {offsets = [0, 5], sizes = [2, 11], strides = [1, 1]} : vector<2x16xf32> to vector<2x11xf32>
    %684 = vector.extract_strided_slice %682 {offsets = [0, 0], sizes = [2, 5], strides = [1, 1]} : vector<2x16xf32> to vector<2x5xf32>
    %685 = tpu.concatenate %683, %684 in 1 : vector<2x11xf32>, vector<2x5xf32> -> vector<2x16xf32>
    %cst_207 = arith.constant 0.000000e+00 : f32
    %686 = vector.shape_cast %491 : vector<1x16xi1> to vector<1x16xi1>
    %687 = vector.broadcast %686 : vector<1x16xi1> to vector<2x16xi1>
    %688 = vector.broadcast %cst_207 : f32 to vector<2x16xf32>
    %689 = arith.select %687, %685, %688 : vector<2x16xi1>, vector<2x16xf32>
    %690 = arith.addf %681, %689 : vector<2x16xf32>
    %c5_208 = arith.constant 5 : index
    %c0_209 = arith.constant 0 : index
    %c0_210 = arith.constant 0 : index
    %691 = vector.load %arg5[%c5_208, %c0_209, %c0_210] : memref<7x2x1xf32, #tpu.memory_space<vmem>>, vector<1x2x1xf32>
    %692 = vector.shape_cast %691 : vector<1x2x1xf32> to vector<2x1xf32>
    %693 = vector.broadcast %692 : vector<2x1xf32> to vector<2x16xf32>
    %694 = arith.addf %690, %693 : vector<2x16xf32>
    %c5_211 = arith.constant 5 : index
    %c0_212 = arith.constant 0 : index
    %c0_213 = arith.constant 0 : index
    %695 = vector.load %arg6[%c5_211, %c0_212, %c0_213] : memref<7x4x2xf32, #tpu.memory_space<vmem>>, vector<1x4x2xf32>
    %696 = vector.shape_cast %695 : vector<1x4x2xf32> to vector<4x2xf32>
    %cst_214 = arith.constant dense<0.000000e+00> : vector<4x16xf32>
    %697 = tpu.matmul %696, %694, %cst_214 {dimension_numbers = #tpu.dot_dimension_numbers<[1], [0], [0], [1], [0, 0, 1, 1], [], []>} : vector<4x2xf32>, vector<2x16xf32>, vector<4x16xf32> -> vector<4x16xf32>
    %c5_215 = arith.constant 5 : index
    %c0_216 = arith.constant 0 : index
    %c0_217 = arith.constant 0 : index
    %698 = vector.load %arg7[%c5_215, %c0_216, %c0_217] : memref<7x4x1xf32, #tpu.memory_space<vmem>>, vector<1x4x1xf32>
    %699 = vector.shape_cast %698 : vector<1x4x1xf32> to vector<4x1xf32>
    %700 = vector.broadcast %699 : vector<4x1xf32> to vector<4x16xf32>
    %701 = arith.addf %697, %700 : vector<4x16xf32>
    %702 = arith.addf %605, %701 : vector<4x16xf32>
    %c0_218 = arith.constant 0 : index
    %c0_219 = arith.constant 0 : index
    %703 = vector.load %arg11[%c0_218, %c0_219] : memref<16x64xf32, #tpu.memory_space<vmem>>, vector<16x64xf32>
    %cst_220 = arith.constant dense<0.000000e+00> : vector<4x64xf32>
    %704 = tpu.matmul %702, %703, %cst_220 {dimension_numbers = #tpu.dot_dimension_numbers<[1], [0], [0], [1], [0, 0, 1, 1], [], []>} : vector<4x16xf32>, vector<16x64xf32>, vector<4x64xf32> -> vector<4x64xf32>
    %705 = arith.addf %368, %704 : vector<4x64xf32>
    %c6 = arith.constant 6 : index
    %c0_221 = arith.constant 0 : index
    %c0_222 = arith.constant 0 : index
    %706 = vector.load %arg2[%c6, %c0_221, %c0_222] : memref<7x2x4xf32, #tpu.memory_space<vmem>>, vector<1x2x4xf32>
    %707 = vector.shape_cast %706 : vector<1x2x4xf32> to vector<2x4xf32>
    %cst_223 = arith.constant dense<0.000000e+00> : vector<2x64xf32>
    %708 = tpu.matmul %707, %705, %cst_223 {dimension_numbers = #tpu.dot_dimension_numbers<[1], [0], [0], [1], [0, 0, 1, 1], [], []>} : vector<2x4xf32>, vector<4x64xf32>, vector<2x64xf32> -> vector<2x64xf32>
    %c6_224 = arith.constant 6 : index
    %c0_225 = arith.constant 0 : index
    %c0_226 = arith.constant 0 : index
    %709 = vector.load %arg3[%c6_224, %c0_225, %c0_226] : memref<7x2x1xf32, #tpu.memory_space<vmem>>, vector<1x2x1xf32>
    %710 = vector.shape_cast %709 : vector<1x2x1xf32> to vector<2x1xf32>
    %711 = vector.broadcast %710 : vector<2x1xf32> to vector<2x64xf32>
    %712 = arith.addf %708, %711 : vector<2x64xf32>
    %cst_227 = arith.constant 0.000000e+00 : f32
    %713 = vector.broadcast %cst_227 : f32 to vector<2x64xf32>
    %714 = arith.maximumf %712, %713 : vector<2x64xf32>
    %c6_228 = arith.constant 6 : index
    %c0_229 = arith.constant 0 : index
    %c0_230 = arith.constant 0 : index
    %715 = vector.load %arg4[%c6_228, %c0_229, %c0_230] : memref<7x18x2xf32, #tpu.memory_space<vmem>>, vector<1x18x2xf32>
    %716 = vector.shape_cast %715 : vector<1x18x2xf32> to vector<18x2xf32>
    %cst_231 = arith.constant dense<0.000000e+00> : vector<18x64xf32>
    %717 = tpu.matmul %716, %714, %cst_231 {dimension_numbers = #tpu.dot_dimension_numbers<[1], [0], [0], [1], [0, 0, 1, 1], [], []>} : vector<18x2xf32>, vector<2x64xf32>, vector<18x64xf32> -> vector<18x64xf32>
    %718 = vector.extract_strided_slice %717 {offsets = [0, 0], sizes = [2, 64], strides = [1, 1]} : vector<18x64xf32> to vector<2x64xf32>
    %719 = vector.extract_strided_slice %718 {offsets = [0, 55], sizes = [2, 9], strides = [1, 1]} : vector<2x64xf32> to vector<2x9xf32>
    %720 = vector.extract_strided_slice %718 {offsets = [0, 0], sizes = [2, 55], strides = [1, 1]} : vector<2x64xf32> to vector<2x55xf32>
    %721 = tpu.concatenate %719, %720 in 1 : vector<2x9xf32>, vector<2x55xf32> -> vector<2x64xf32>
    %cst_232 = arith.constant 0.000000e+00 : f32
    %722 = vector.shape_cast %167 : vector<1x64xi1> to vector<1x64xi1>
    %723 = vector.broadcast %722 : vector<1x64xi1> to vector<2x64xi1>
    %724 = vector.broadcast %cst_232 : f32 to vector<2x64xf32>
    %725 = arith.select %723, %721, %724 : vector<2x64xi1>, vector<2x64xf32>
    %726 = vector.extract_strided_slice %717 {offsets = [2, 0], sizes = [2, 64], strides = [1, 1]} : vector<18x64xf32> to vector<2x64xf32>
    %727 = vector.extract_strided_slice %726 {offsets = [0, 56], sizes = [2, 8], strides = [1, 1]} : vector<2x64xf32> to vector<2x8xf32>
    %728 = vector.extract_strided_slice %726 {offsets = [0, 0], sizes = [2, 56], strides = [1, 1]} : vector<2x64xf32> to vector<2x56xf32>
    %729 = tpu.concatenate %727, %728 in 1 : vector<2x8xf32>, vector<2x56xf32> -> vector<2x64xf32>
    %cst_233 = arith.constant 0.000000e+00 : f32
    %730 = vector.shape_cast %177 : vector<1x64xi1> to vector<1x64xi1>
    %731 = vector.broadcast %730 : vector<1x64xi1> to vector<2x64xi1>
    %732 = vector.broadcast %cst_233 : f32 to vector<2x64xf32>
    %733 = arith.select %731, %729, %732 : vector<2x64xi1>, vector<2x64xf32>
    %734 = arith.addf %725, %733 : vector<2x64xf32>
    %735 = vector.extract_strided_slice %717 {offsets = [4, 0], sizes = [2, 64], strides = [1, 1]} : vector<18x64xf32> to vector<2x64xf32>
    %736 = vector.extract_strided_slice %735 {offsets = [0, 57], sizes = [2, 7], strides = [1, 1]} : vector<2x64xf32> to vector<2x7xf32>
    %737 = vector.extract_strided_slice %735 {offsets = [0, 0], sizes = [2, 57], strides = [1, 1]} : vector<2x64xf32> to vector<2x57xf32>
    %738 = tpu.concatenate %736, %737 in 1 : vector<2x7xf32>, vector<2x57xf32> -> vector<2x64xf32>
    %cst_234 = arith.constant 0.000000e+00 : f32
    %739 = vector.shape_cast %191 : vector<1x64xi1> to vector<1x64xi1>
    %740 = vector.broadcast %739 : vector<1x64xi1> to vector<2x64xi1>
    %741 = vector.broadcast %cst_234 : f32 to vector<2x64xf32>
    %742 = arith.select %740, %738, %741 : vector<2x64xi1>, vector<2x64xf32>
    %743 = arith.addf %734, %742 : vector<2x64xf32>
    %744 = vector.extract_strided_slice %717 {offsets = [6, 0], sizes = [2, 64], strides = [1, 1]} : vector<18x64xf32> to vector<2x64xf32>
    %745 = vector.extract_strided_slice %744 {offsets = [0, 63], sizes = [2, 1], strides = [1, 1]} : vector<2x64xf32> to vector<2x1xf32>
    %746 = vector.extract_strided_slice %744 {offsets = [0, 0], sizes = [2, 63], strides = [1, 1]} : vector<2x64xf32> to vector<2x63xf32>
    %747 = tpu.concatenate %745, %746 in 1 : vector<2x1xf32>, vector<2x63xf32> -> vector<2x64xf32>
    %cst_235 = arith.constant 0.000000e+00 : f32
    %748 = vector.shape_cast %202 : vector<1x64xi1> to vector<1x64xi1>
    %749 = vector.broadcast %748 : vector<1x64xi1> to vector<2x64xi1>
    %750 = vector.broadcast %cst_235 : f32 to vector<2x64xf32>
    %751 = arith.select %749, %747, %750 : vector<2x64xi1>, vector<2x64xf32>
    %752 = arith.addf %743, %751 : vector<2x64xf32>
    %753 = vector.extract_strided_slice %717 {offsets = [8, 0], sizes = [2, 64], strides = [1, 1]} : vector<18x64xf32> to vector<2x64xf32>
    %754 = arith.addf %752, %753 : vector<2x64xf32>
    %755 = vector.extract_strided_slice %717 {offsets = [10, 0], sizes = [2, 64], strides = [1, 1]} : vector<18x64xf32> to vector<2x64xf32>
    %756 = vector.extract_strided_slice %755 {offsets = [0, 1], sizes = [2, 63], strides = [1, 1]} : vector<2x64xf32> to vector<2x63xf32>
    %757 = vector.extract_strided_slice %755 {offsets = [0, 0], sizes = [2, 1], strides = [1, 1]} : vector<2x64xf32> to vector<2x1xf32>
    %758 = tpu.concatenate %756, %757 in 1 : vector<2x63xf32>, vector<2x1xf32> -> vector<2x64xf32>
    %cst_236 = arith.constant 0.000000e+00 : f32
    %759 = vector.shape_cast %215 : vector<1x64xi1> to vector<1x64xi1>
    %760 = vector.broadcast %759 : vector<1x64xi1> to vector<2x64xi1>
    %761 = vector.broadcast %cst_236 : f32 to vector<2x64xf32>
    %762 = arith.select %760, %758, %761 : vector<2x64xi1>, vector<2x64xf32>
    %763 = arith.addf %754, %762 : vector<2x64xf32>
    %764 = vector.extract_strided_slice %717 {offsets = [12, 0], sizes = [2, 64], strides = [1, 1]} : vector<18x64xf32> to vector<2x64xf32>
    %765 = vector.extract_strided_slice %764 {offsets = [0, 7], sizes = [2, 57], strides = [1, 1]} : vector<2x64xf32> to vector<2x57xf32>
    %766 = vector.extract_strided_slice %764 {offsets = [0, 0], sizes = [2, 7], strides = [1, 1]} : vector<2x64xf32> to vector<2x7xf32>
    %767 = tpu.concatenate %765, %766 in 1 : vector<2x57xf32>, vector<2x7xf32> -> vector<2x64xf32>
    %cst_237 = arith.constant 0.000000e+00 : f32
    %768 = vector.shape_cast %229 : vector<1x64xi1> to vector<1x64xi1>
    %769 = vector.broadcast %768 : vector<1x64xi1> to vector<2x64xi1>
    %770 = vector.broadcast %cst_237 : f32 to vector<2x64xf32>
    %771 = arith.select %769, %767, %770 : vector<2x64xi1>, vector<2x64xf32>
    %772 = arith.addf %763, %771 : vector<2x64xf32>
    %773 = vector.extract_strided_slice %717 {offsets = [14, 0], sizes = [2, 64], strides = [1, 1]} : vector<18x64xf32> to vector<2x64xf32>
    %774 = vector.extract_strided_slice %773 {offsets = [0, 8], sizes = [2, 56], strides = [1, 1]} : vector<2x64xf32> to vector<2x56xf32>
    %775 = vector.extract_strided_slice %773 {offsets = [0, 0], sizes = [2, 8], strides = [1, 1]} : vector<2x64xf32> to vector<2x8xf32>
    %776 = tpu.concatenate %774, %775 in 1 : vector<2x56xf32>, vector<2x8xf32> -> vector<2x64xf32>
    %cst_238 = arith.constant 0.000000e+00 : f32
    %777 = vector.shape_cast %240 : vector<1x64xi1> to vector<1x64xi1>
    %778 = vector.broadcast %777 : vector<1x64xi1> to vector<2x64xi1>
    %779 = vector.broadcast %cst_238 : f32 to vector<2x64xf32>
    %780 = arith.select %778, %776, %779 : vector<2x64xi1>, vector<2x64xf32>
    %781 = arith.addf %772, %780 : vector<2x64xf32>
    %782 = vector.extract_strided_slice %717 {offsets = [16, 0], sizes = [2, 64], strides = [1, 1]} : vector<18x64xf32> to vector<2x64xf32>
    %783 = vector.extract_strided_slice %782 {offsets = [0, 9], sizes = [2, 55], strides = [1, 1]} : vector<2x64xf32> to vector<2x55xf32>
    %784 = vector.extract_strided_slice %782 {offsets = [0, 0], sizes = [2, 9], strides = [1, 1]} : vector<2x64xf32> to vector<2x9xf32>
    %785 = tpu.concatenate %783, %784 in 1 : vector<2x55xf32>, vector<2x9xf32> -> vector<2x64xf32>
    %cst_239 = arith.constant 0.000000e+00 : f32
    %786 = vector.shape_cast %254 : vector<1x64xi1> to vector<1x64xi1>
    %787 = vector.broadcast %786 : vector<1x64xi1> to vector<2x64xi1>
    %788 = vector.broadcast %cst_239 : f32 to vector<2x64xf32>
    %789 = arith.select %787, %785, %788 : vector<2x64xi1>, vector<2x64xf32>
    %790 = arith.addf %781, %789 : vector<2x64xf32>
    %c6_240 = arith.constant 6 : index
    %c0_241 = arith.constant 0 : index
    %c0_242 = arith.constant 0 : index
    %791 = vector.load %arg5[%c6_240, %c0_241, %c0_242] : memref<7x2x1xf32, #tpu.memory_space<vmem>>, vector<1x2x1xf32>
    %792 = vector.shape_cast %791 : vector<1x2x1xf32> to vector<2x1xf32>
    %793 = vector.broadcast %792 : vector<2x1xf32> to vector<2x64xf32>
    %794 = arith.addf %790, %793 : vector<2x64xf32>
    %c6_243 = arith.constant 6 : index
    %c0_244 = arith.constant 0 : index
    %c0_245 = arith.constant 0 : index
    %795 = vector.load %arg6[%c6_243, %c0_244, %c0_245] : memref<7x4x2xf32, #tpu.memory_space<vmem>>, vector<1x4x2xf32>
    %796 = vector.shape_cast %795 : vector<1x4x2xf32> to vector<4x2xf32>
    %cst_246 = arith.constant dense<0.000000e+00> : vector<4x64xf32>
    %797 = tpu.matmul %796, %794, %cst_246 {dimension_numbers = #tpu.dot_dimension_numbers<[1], [0], [0], [1], [0, 0, 1, 1], [], []>} : vector<4x2xf32>, vector<2x64xf32>, vector<4x64xf32> -> vector<4x64xf32>
    %c6_247 = arith.constant 6 : index
    %c0_248 = arith.constant 0 : index
    %c0_249 = arith.constant 0 : index
    %798 = vector.load %arg7[%c6_247, %c0_248, %c0_249] : memref<7x4x1xf32, #tpu.memory_space<vmem>>, vector<1x4x1xf32>
    %799 = vector.shape_cast %798 : vector<1x4x1xf32> to vector<4x1xf32>
    %800 = vector.broadcast %799 : vector<4x1xf32> to vector<4x64xf32>
    %801 = arith.addf %797, %800 : vector<4x64xf32>
    %802 = arith.addf %705, %801 : vector<4x64xf32>
    %c0_250 = arith.constant 0 : index
    %c0_251 = arith.constant 0 : index
    %803 = vector.load %arg10[%c0_250, %c0_251] : memref<64x256xf32, #tpu.memory_space<vmem>>, vector<64x256xf32>
    %cst_252 = arith.constant dense<0.000000e+00> : vector<4x256xf32>
    %804 = tpu.matmul %802, %803, %cst_252 {dimension_numbers = #tpu.dot_dimension_numbers<[1], [0], [0], [1], [0, 0, 1, 1], [], []>} : vector<4x64xf32>, vector<64x256xf32>, vector<4x256xf32> -> vector<4x256xf32>
    %805 = arith.addf %131, %804 : vector<4x256xf32>
    %c0_253 = arith.constant 0 : index
    %c0_254 = arith.constant 0 : index
    %c0_255 = arith.constant 0 : index
    %806 = vector.load %arg12[%c0_253, %c0_254, %c0_255] : memref<1x4x256xf32, #tpu.memory_space<vmem>>, vector<1x4x256xf32>
    %807 = vector.shape_cast %806 : vector<1x4x256xf32> to vector<4x256xf32>
    %808 = vector.shape_cast %805 : vector<4x256xf32> to vector<1x4x256xf32>
    tpu.vector_store %arg12[%c0_253, %c0_254, %c0_255], %808 {strides = array<i32>} : memref<1x4x256xf32, #tpu.memory_space<vmem>>, vector<1x4x256xf32>,
    return
  }
  func.func @transform_0(%arg0: i32) -> (i32, i32, i32) {
    %c0_i32 = arith.constant 0 : i32
    %c0_i32_0 = arith.constant 0 : i32
    %c0_i32_1 = arith.constant 0 : i32
    return %arg0, %c0_i32, %c0_i32_0 : i32, i32, i32
  }
  func.func @transform_1(%arg0: i32) -> (i32, i32, i32) {
    %c0_i32 = arith.constant 0 : i32
    %c0_i32_0 = arith.constant 0 : i32
    %c0_i32_1 = arith.constant 0 : i32
    %c0_i32_2 = arith.constant 0 : i32
    return %c0_i32, %c0_i32_0, %c0_i32_1 : i32, i32, i32
  }
  func.func @transform_2(%arg0: i32) -> (i32, i32, i32) {
    %c0_i32 = arith.constant 0 : i32
    %c0_i32_0 = arith.constant 0 : i32
    %c0_i32_1 = arith.constant 0 : i32
    %c0_i32_2 = arith.constant 0 : i32
    return %c0_i32, %c0_i32_0, %c0_i32_1 : i32, i32, i32
  }
  func.func @transform_3(%arg0: i32) -> (i32, i32, i32) {
    %c0_i32 = arith.constant 0 : i32
    %c0_i32_0 = arith.constant 0 : i32
    %c0_i32_1 = arith.constant 0 : i32
    %c0_i32_2 = arith.constant 0 : i32
    return %c0_i32, %c0_i32_0, %c0_i32_1 : i32, i32, i32
  }
  func.func @transform_4(%arg0: i32) -> (i32, i32, i32) {
    %c0_i32 = arith.constant 0 : i32
    %c0_i32_0 = arith.constant 0 : i32
    %c0_i32_1 = arith.constant 0 : i32
    %c0_i32_2 = arith.constant 0 : i32
    return %c0_i32, %c0_i32_0, %c0_i32_1 : i32, i32, i32
  }
  func.func @transform_5(%arg0: i32) -> (i32, i32, i32) {
    %c0_i32 = arith.constant 0 : i32
    %c0_i32_0 = arith.constant 0 : i32
    %c0_i32_1 = arith.constant 0 : i32
    %c0_i32_2 = arith.constant 0 : i32
    return %c0_i32, %c0_i32_0, %c0_i32_1 : i32, i32, i32
  }
  func.func @transform_6(%arg0: i32) -> (i32, i32, i32) {
    %c0_i32 = arith.constant 0 : i32
    %c0_i32_0 = arith.constant 0 : i32
    %c0_i32_1 = arith.constant 0 : i32
    %c0_i32_2 = arith.constant 0 : i32
    return %c0_i32, %c0_i32_0, %c0_i32_1 : i32, i32, i32
  }
  func.func @transform_7(%arg0: i32) -> (i32, i32) {
    %c0_i32 = arith.constant 0 : i32
    %c0_i32_0 = arith.constant 0 : i32
    %c0_i32_1 = arith.constant 0 : i32
    return %c0_i32, %c0_i32_0 : i32, i32
  }
  func.func @transform_8(%arg0: i32) -> (i32, i32) {
    %c0_i32 = arith.constant 0 : i32
    %c0_i32_0 = arith.constant 0 : i32
    %c0_i32_1 = arith.constant 0 : i32
    return %c0_i32, %c0_i32_0 : i32, i32
  }
  func.func @transform_9(%arg0: i32) -> (i32, i32) {
    %c0_i32 = arith.constant 0 : i32
    %c0_i32_0 = arith.constant 0 : i32
    %c0_i32_1 = arith.constant 0 : i32
    return %c0_i32, %c0_i32_0 : i32, i32
  }
  func.func @transform_10(%arg0: i32) -> (i32, i32) {
    %c0_i32 = arith.constant 0 : i32
    %c0_i32_0 = arith.constant 0 : i32
    %c0_i32_1 = arith.constant 0 : i32
    return %c0_i32, %c0_i32_0 : i32, i32
  }
  func.func @transform_11(%arg0: i32) -> (i32, i32, i32) {
    %c0_i32 = arith.constant 0 : i32
    %c0_i32_0 = arith.constant 0 : i32
    %c0_i32_1 = arith.constant 0 : i32
    return %arg0, %c0_i32, %c0_i32_0 : i32, i32, i32
  }
}

</mosaic_0001>

<bundles_post_ra>
// kernel: hourglass_pallas.1
= control target key start
LH: loop header
LB: loop body
LE: loop exit
PB: predicated region body
PF: predicated region fallthrough
CT: control target
= control target key end

     0   :  { %s3794_s0 = inlined_call_operand.vmem [shape: f32[2,4,256], index: 0, kind: input, shape index: {}]   ;;  %s3795_s1 = inlined_call_operand.vmem [shape: f32[7,2,4], index: 1, kind: input, shape index: {}]   ;;  %s3796_s2 = inlined_call_operand.vmem [shape: f32[7,2,1], index: 2, kind: input, shape index: {}]   ;;  %s3797_s3 = inlined_call_operand.vmem [shape: f32[7,18,2], index: 3, kind: input, shape index: {}]   ;;  %s3798_s4 = inlined_call_operand.vmem [shape: f32[7,2,1], index: 4, kind: input, shape index: {}]   ;;  %s3799_s5 = inlined_call_operand.vmem [shape: f32[7,4,2], index: 5, kind: input, shape index: {}]   ;;  %s3800_s6 = inlined_call_operand.vmem [shape: f32[7,4,1], index: 6, kind: input, shape index: {}]   ;;  %s3801_s7 = inlined_call_operand.vmem [shape: f32[256,64], index: 7, kind: input, shape index: {}]   ;;  %s3802_s8 = inlined_call_operand.hbm [shape: f32[64,16], index: 8, kind: input, shape index: {}]   ;;  %s3803_s9 = inlined_call_operand.vmem [shape: f32[64,256], index: 9, kind: input, shape index: {}]   ;;  %s3804_s10 = inlined_call_operand.vmem [shape: f32[16,64], index: 10, kind: input, shape index: {}]   ;;  %s3805_s11 = inlined_call_operand.vmem [shape: f32[2,4,256], index: 11, kind: output, shape index: {}]  }
   0x1   :  { %3883 = sst [smem:[#allocation7_spill]] %s3794_s0 }
   0x2   :  { %3884 = sst [smem:[#allocation8_spill]] %s3801_s7 }
   0x3   :  { %3885 = sst [smem:[#allocation9_spill]] %s3802_s8 }
   0x4   :  { %3886 = sst [smem:[#allocation10_spill]] %s3803_s9 }
   0x5   :  { %3887 = sst [smem:[#allocation11_spill]] %s3805_s11 }
   0x6   :  { %16 = vsyncpa [#allocation3], 0  ;;  %s2829_s17 = smov 0  }
   0x7 LB: > { %3888 = sst [smem:[#allocation5_spill]] %s2729_s17  ;;  %s2499_s21 = sadd.s32 4294967295, %s2729_s17   ;;  %s2729_s17 = sphi %s2829_s17, %s22_s17  }
   0x8   : > { %s3889_s8 = sld [smem:[#allocation9_spill]]  ;;  %p2501_p0 = scmp.ge.s32.totalorder %s2729_s17, 1 }
   0x9   : > { %p289_p1 = scmp.lt.s32.totalorder %s2729_s17, 3  ;;  %p2638_p2 = scmp.eq.s32.totalorder %s2499_s21, 0 }
   0xa   : > { %s2731_s22 = smov [#allocation2]   ;;  %s2732_s24 = smov 128  }
   0xb   : > { %p290_p3 = pnand %p2501_p0, %p289_p1  ;;  %s323_s23 = sshll.u32 %s2731_s22, 4  ;;  %s324_s23 = int_to_ptr.vmem [resolvable:$true] %s323_s23 }
   0xc   : > { %s2733_s25 = smov 8  }
   0xd   : > { %p2634_p4 = pneg %p290_p3  ;;  %353 = sbr.rel (%p290_p3) target bundleno = 3894 (0xf36), region = 64 }
   0xe   : > { %s321_s20 = sshll.u32 %s3889_s8, 4  ;;  %s322_s20 = int_to_ptr.hbm [resolvable:$true] %s321_s20 }
   0xf   : > { %p2635_p5 = pnand %p2638_p2, %p2634_p4 }
  0x11   : > { %2637 = dma.hbm_to_vmem [thread:$0]  (!%p2635_p5), %s322_s20, 1024, %s324_s23, [#allocation3], %s2732_s24, %s2732_s24, %s2733_s25  }
  0x12   : > { %2724 = dma.done.wait (%p2638_p2), [#allocation3], 1024  }
  0x13   : > { %2726 = vsyncadd (%p2638_p2), [#allocation3], 4294966272  ;;  %p394_p6 = scmp.lt.s32.totalorder %s2499_s21, 1  ;;  %v2734_v0 = vmov 0   ;;  %s3891_s0 = sld [smem:[#allocation7_spill]]  ;;  %vm3808_vm0 = vcmask 1043456  }
  0x14   : > { %2686 = vset.pattern.permute.xlu1 %v2734_v0  ;;  %2687 = vset.pattern.permute.xlu2 %v2734_v0  ;;  %v405_v2 = vld [vmem:[%s3795_s1] sm:$0x3]  ;;  %vm3807_vm1 = vcmask 31744   ;;  %s3843_s13 = smov 127   ;;  %vm654_vm2 = vcmask 1039360   ;;  %vm3863_vm3 = vcmask 1041408  }
  0x15   : > { %s4060_s21 = smov (!%p394_p6, %s2499_s21), 1  ;;  %2688 = vset.pattern.permute.xlu0 %v2734_v0  ;;  %v406_v7 = vld [vmem:[%s3796_s2] sm:$0x3]  ;;  %vm3809_vm4 = vcmask 15360   ;;  %v468_v25 = vld [vmem:[%s3797_s3 + $0x8] sm:$0xff]  ;;  %s2736_s22 = smov 112  }
  0x16   : > { %3890 = sst [smem:[#allocation6_spill]] %s4060_s21  ;;  %s3810_s26 = sshll.u32 %s4060_s21, 3  ;;  %v467_v21 = vld [vmem:[%s3797_s3] sm:$0xff]  ;;  %v469_v28 = vld [vmem:[%s3797_s3 + $0x10] sm:$0x3]  ;;  %vm706_vm5 = vcmask 916480  }
  0x17   : > { %s3892_s7 = sld [smem:[#allocation8_spill]]  ;;  %s3811_s16 = smov 15   ;;  %vm3806_vm6 = vcmask 130048   ;;  %vm3821_vm12 = vcmask 121856   ;;  %vm546_vm14 = vcmask 138240  }
  0x18   : > { %s2738_s18 = smov 17   ;;  %s2739_s19 = smov 16  }
  0x19   : > { %s398_s29 = scalar_lea.vmem %s3891_s0, %s3810_s26  ;;  %s3819_s20 = smov 1  }
  0x1a   : > { %v2848_v1 = vld [vmem:[%s398_s29] sm:$0xff]  ;;  %s3813_s23 = smov 113   ;;  %s2742_s24 = smov 111  }
  0x1b   : > { %413 = vst [vmem:[#allocation1] ss:$2 sm:$0xff] %v2848_v1  ;;  %s3839_s28 = smov 8   ;;  %s3838_s29 = smov 72  }
  0x1c   : > { %s3830_s30 = smov 9   ;;  %s3840_s12 = smov 73  }
  0x1d   : > { %v874_v30 = vld [vmem:[%s3892_s7 + $0x78] sm:$0xff]  ;;  %v873_v32 = vld [vmem:[%s3892_s7 + $0x70] sm:$0xff]  ;;  %v872_v34 = vld [vmem:[%s3892_s7 + $0x68] sm:$0xff]  ;;  %s3817_s14 = smov 65   ;;  %s3815_s15 = smov 121  }
  0x1e   : > { %v890_v31 = vld [vmem:[%s3892_s7 + $0xf8] sm:$0xff]  ;;  %v889_v33 = vld [vmem:[%s3892_s7 + $0xf0] sm:$0xff]  ;;  %v888_v35 = vld [vmem:[%s3892_s7 + $0xe8] sm:$0xff]  ;;  %s3827_s26 = smov 120   ;;  %s3940_s25 = smov 121  }
  0x1f   : > { %v871_v36 = vld [vmem:[%s3892_s7 + $0x60] sm:$0xff]  ;;  %v870_v38 = vld [vmem:[%s3892_s7 + $0x58] sm:$0xff]  ;;  %v869_v40 = vld [vmem:[%s3892_s7 + $0x50] sm:$0xff]  ;;  %s3941_s27 = smov 120   ;;  %s3989_s0 = smov 124  }
  0x20   : > { %v887_v37 = vld [vmem:[%s3892_s7 + $0xe0] sm:$0xff]  ;;  %v886_v39 = vld [vmem:[%s3892_s7 + $0xd8] sm:$0xff]  ;;  %v885_v41 = vld [vmem:[%s3892_s7 + $0xd0] sm:$0xff]  ;;  %s3990_s21 = smov 11   ;;  %s4034_s17 = smov 119  }
  0x21   : > { %v868_v42 = vld [vmem:[%s3892_s7 + $0x48] sm:$0xff]  ;;  %v867_v44 = vld [vmem:[%s3892_s7 + $0x40] sm:$0xff]  ;;  %v866_v46 = vld [vmem:[%s3892_s7 + $0x38] sm:$0xff]  ;;  %s4037_s11 = sld [smem:[#allocation10_spill]] }
  0x22   : > { %v414_v3 = vld.sshfl [vmem:[#allocation1] sm:$0xff pattern:$0x75316420]  ;;  %v415_v4 = vld.sshfl [vmem:[#allocation1 + $0x8] sm:$0xff pattern:$0x75316420] }
  0x23   : > { %2510 = vmatpush.msk.msra.mxu3 %vm3808_vm0, %v414_v3  ;;  %2512 = vmatpush.msk.msra.mxu1 %vm3808_vm0, %v415_v4  ;;  %818 = vst [vmem:[#allocation1] ss:$2 sm:$0xff] %v2848_v1  ;;  %v884_v43 = vld [vmem:[%s3892_s7 + $0xc8] sm:$0xff]  ;;  %v883_v45 = vld [vmem:[%s3892_s7 + $0xc0] sm:$0xff]  ;;  %v882_v47 = vld [vmem:[%s3892_s7 + $0xb8] sm:$0xff] }
  0x24   : > { %2511 = vmatmul.msk.f32.vlgmr.msra.gmra.mxu3 %vm3807_vm1, %v405_v2  ;;  %2513 = vmatmul.msk.f32.vlgmr.msra.gmra.mxu1 %vm3807_vm1, %v405_v2  ;;  %v865_v48 = vld [vmem:[%s3892_s7 + $0x30] sm:$0xff]  ;;  %v864_v50 = vld [vmem:[%s3892_s7 + $0x28] sm:$0xff]  ;;  %v863_v52 = vld [vmem:[%s3892_s7 + $0x20] sm:$0xff] }
  0x25   : > { %v881_v49 = vld [vmem:[%s3892_s7 + $0xb0] sm:$0xff]  ;;  %v880_v51 = vld [vmem:[%s3892_s7 + $0xa8] sm:$0xff]  ;;  %v879_v53 = vld [vmem:[%s3892_s7 + $0xa0] sm:$0xff] }
  0x26   : > { %v862_v54 = vld [vmem:[%s3892_s7 + $0x18] sm:$0xff]  ;;  %v861_v56 = vld [vmem:[%s3892_s7 + $0x10] sm:$0xff]  ;;  %v860_v58 = vld [vmem:[%s3892_s7 + $0x8] sm:$0xff] }
  0x27   : > { %v878_v55 = vld [vmem:[%s3892_s7 + $0x98] sm:$0xff]  ;;  %v877_v57 = vld [vmem:[%s3892_s7 + $0x90] sm:$0xff]  ;;  %v876_v59 = vld [vmem:[%s3892_s7 + $0x88] sm:$0xff] }
  0x28   : > { %v859_v60 = vld [vmem:[%s3892_s7] sm:$0xff] }
  0x29   : > { %v875_v61 = vld [vmem:[%s3892_s7 + $0x80] sm:$0xff] }
  0x2a   : > { %v820_v5 = vld.sshfl [vmem:[#allocation1 + $0x8] sm:$0xff pattern:$0x75316420]  ;;  %v819_v6 = vld.sshfl [vmem:[#allocation1] sm:$0xff pattern:$0x75316420] }
  0x2b   : > { %823 = vrot.lane.b32.xlu0 %v820_v5, %s3843_s13  ;;  %821 = vrot.lane.b32.xlu1 %v819_v6, %s3843_s13  ;;  %827 = vst [vmem:[#allocation1] ss:$2 sm:$0xff] %v2848_v1 }
  0x32   : > { %v828_v8 = vld.sshfl [vmem:[#allocation1] sm:$0xff pattern:$0x75316420] }
  0x33   : > { %409 = vperm.xlu1 %2686, %v406_v7   ;;  %829 = vrot.lane.b32.xlu0 %v828_v8, %s3843_s13 }
  0x9d   : > { %v824_v9 = vpop.permute.xlu0 %823  ;;  %v822_v10 = vpop.permute.xlu1 %821 }
  0x9e   : > { %v825_v18 = vsel %vm654_vm2, %v822_v10, %v824_v9 }
  0xa1   : > { %v462_v11 = vpop.f32.mrf.mxu1 }
  0xa5   : > { %v410_v12 = vpop.permute.xlu1 %409  ;;  %v830_v13 = vpop.permute.xlu0 %829 }
  0xa6   : > { %v463_v14 = vadd.f32 %v462_v11, %v410_v12  ;;  %v832_v15 = vsel %vm654_vm2, %v824_v9, %v830_v13 }
  0xa7   : > { %v834_v16 = vrot.slane %v832_v15, 4  ;;  %v442_v17 = vpop.f32.mrf.mxu3 }
  0xa8   : > { %v466_v19 = vmax.f32 %v463_v14, 0.0  ;;  %v443_v20 = vadd.f32 %v442_v17, %v410_v12  ;;  %v748_v14 = vld [vmem:[%s3798_s4] sm:$0x3]  ;;  %v551_v17 = vlaneseq }
  0xa9   : > { %v835_v22 = vsel %vm3808_vm0, %v825_v18, %v834_v16 }
  0xaa   : > { %v2873_v23 = vmax.f32 %v2848_v1, %v835_v22  ;;  %v465_v24 = vmax.f32 %v443_v20, 0.0  ;;  %2518 = vmatpush.msk.msrb.mxu3 %vm3863_vm3, %v466_v19  ;;  %v3017_v19 = vand.u32 127, %v551_v17 }
  0xab   : > { %2519 = vmatmul.msk.f32.vlgmr.msrb.gmra.mxu3 %vm3809_vm4, %v467_v21 }
  0xac   : > { %839 = vst [vmem:[#allocation1] ss:$2 sm:$0xff] %v2873_v23  ;;  %2514 = vmatpush.msk.msra.mxu2 %vm3863_vm3, %v465_v24  ;;  %917 = vmatpush.msra.mxu3 %v890_v31  ;;  %v553_v22 = vadd.s32 128, %v3017_v19  ;;  %v554_v24 = vshra.s32 %v3017_v19, 4 }
  0xad   : > { %2515 = vmatmul.msk.f32.vlgmr.msra.gmra.mxu2 %vm3809_vm4, %v467_v21 }
  0xae   : > { %897 = vmatpush.msrb.mxu2 %v874_v30  ;;  %918 = vmatpush.msra.mxu3 %v889_v33  ;;  %vm3022_vm7 = vcmp.ge.s32.totalorder %v554_v24, 1 }
  0xb0   : > { %898 = vmatpush.msrb.mxu2 %v873_v32  ;;  %919 = vmatpush.msra.mxu3 %v888_v35 }
  0xb2   : > { %899 = vmatpush.msrb.mxu2 %v872_v34  ;;  %920 = vmatpush.msra.mxu3 %v887_v37  ;;  %v756_v37 = vld [vmem:[%s3799_s5] sm:$0xf] }
  0xb3   : > { %v841_v26 = vld.sshfl [vmem:[#allocation1 + $0x8] sm:$0xff pattern:$0x75316420]  ;;  %v840_v27 = vld.sshfl [vmem:[#allocation1] sm:$0xff pattern:$0x75316420]  ;;  %2520 = vmatmul.msk.f32.gmra.mxu3 %vm3809_vm4, %v468_v25 }
  0xb4   : > { %844 = vrot.lane.b32.xlu2 %v841_v26, %s2736_s22  ;;  %842 = vrot.lane.b32.xlu0 %v840_v27, %s2736_s22  ;;  %848 = vst [vmem:[#allocation1] ss:$2 sm:$0xff] %v2873_v23  ;;  %v556_v27 = vand.u32 15, %v3017_v19 }
  0xb5   : > { %2516 = vmatmul.msk.f32.gmra.mxu2 %vm3809_vm4, %v468_v25  ;;  %921 = vmatpush.msra.mxu3 %v886_v39  ;;  %v555_v25 = vshra.s32 %v553_v22, 4 }
  0xb6   : > { %900 = vmatpush.msrb.mxu2 %v871_v36  ;;  %vm3032_vm9 = vcmp.ge.s32.totalorder %v556_v27, 1  ;;  %vm3036_vm10 = vcmp.lt.s32.totalorder %v556_v27, 15 }
  0xb7   : > { %922 = vmatpush.msra.mxu3 %v885_v41  ;;  %vm3026_vm8 = vcmp.ge.s32.totalorder %v555_v25, 1  ;;  %vm562_vm15 = vmand %vm3022_vm7, %vm3032_vm9 }
  0xb8   : > { %901 = vmatpush.msrb.mxu2 %v870_v38  ;;  %vm606_vm1 = vmand %vm3022_vm7, %vm3036_vm10 }
  0xb9   : > { %923 = vmatpush.msra.mxu3 %v884_v43 }
  0xba   : > { %902 = vmatpush.msrb.mxu2 %v869_v40 }
  0xbb   : > { %v849_v29 = vld.sshfl [vmem:[#allocation1] sm:$0xff pattern:$0x75316420]  ;;  %2521 = vmatmul.msk.f32.gmra.mxu3 %vm3809_vm4, %v469_v28 }
  0xbc   : > { %850 = vrot.lane.b32.xlu2 %v849_v29, %s2736_s22  ;;  %903 = vmatpush.msrb.mxu2 %v868_v42 }
  0xbd   : > { %2517 = vmatmul.msk.f32.gmra.mxu2 %vm3809_vm4, %v469_v28  ;;  %924 = vmatpush.msra.mxu3 %v883_v45  ;;  %v557_v28 = vand.u32 15, %v553_v22  ;;  %vm3822_vm4 = vcmask 7168  }
  0xbe   : > { %904 = vmatpush.msrb.mxu2 %v867_v44 }
  0xbf   : > { %925 = vmatpush.msra.mxu3 %v882_v47  ;;  %vm3040_vm11 = vcmp.ge.s32.totalorder %v557_v28, 1  ;;  %vm3044_vm13 = vcmp.lt.s32.totalorder %v557_v28, 15 }
  0xc0   : > { %905 = vmatpush.msrb.mxu2 %v866_v46 }
  0xc1   : > { %926 = vmatpush.msra.mxu3 %v881_v49 }
  0xc2   : > { %906 = vmatpush.msrb.mxu2 %v865_v48 }
  0xc3   : > { %927 = vmatpush.msra.mxu3 %v880_v51 }
  0xc4   : > { %907 = vmatpush.msrb.mxu2 %v864_v50 }
  0xc5   : > { %928 = vmatpush.msra.mxu3 %v879_v53 }
  0xc6   : > { %908 = vmatpush.msrb.mxu2 %v863_v52 }
  0xc7   : > { %929 = vmatpush.msra.mxu3 %v878_v55 }
  0xc8   : > { %909 = vmatpush.msrb.mxu2 %v862_v54 }
  0xc9   : > { %930 = vmatpush.msra.mxu3 %v877_v57 }
  0xca   : > { %910 = vmatpush.msrb.mxu2 %v861_v56 }
  0xcb   : > { %931 = vmatpush.msra.mxu3 %v876_v59 }
  0xcc   : > { %911 = vmatpush.msrb.mxu2 %v860_v58 }
  0xcd   : > { %932 = vmatpush.msra.mxu3 %v875_v61 }
  0xce   : > { %912 = vmatpush.msrb.mxu2 %v859_v60 }
 0x10e   : > { %v845_v62 = vpop.permute.xlu2 %844 }
 0x116   : > { %v851_v63 = vpop.permute.xlu2 %850 }
 0x117   : > { %v853_v0 = vsel %vm706_vm5, %v845_v62, %v851_v63  ;;  %v2527_v63 = vld [vmem:[%s3796_s2 + $0x2] sm:$0x3] }
 0x118   : > { %v855_v2 = vrot.slane %v853_v0, 4 }
 0x126   : > { %v843_v3 = vpop.permute.xlu0 %842 }
 0x127   : > { %v846_v4 = vsel %vm706_vm5, %v843_v3, %v845_v62 }
 0x128   : > { %v856_v5 = vsel %vm3808_vm0, %v846_v4, %v855_v2  ;;  %vm607_vm0 = vmand %vm3026_vm8, %vm3044_vm13 }
 0x129   : > { %v858_v6 = vmax.f32 %v2873_v23, %v856_v5 }
 0x12b   : > { %892 = vst [vmem:[#allocation1] ss:$2 sm:$0xff] %v858_v6 }
 0x12e   : > { %v530_v7 = vpop.f32.mrf.mxu3 }
 0x12f   : > { %594 = vrot.lane.b32.xlu2 %v530_v7, %s3811_s16  ;;  %540 = vrot.lane.b32.xlu0 %v530_v7, %s2738_s18 }
 0x130   : > { %570 = vrot.lane.b32.xlu1 %v530_v7, %s2739_s19  ;;  %v504_v10 = vpop.f32.mrf.mxu2 }
 0x132   : > { %v893_v8 = vld.sshfl [vmem:[#allocation1] sm:$0xff pattern:$0x75316420]  ;;  %v894_v9 = vld.sshfl [vmem:[#allocation1 + $0x8] sm:$0xff pattern:$0x75316420] }
 0x133   : > { %913 = vmatmul.f32.vlgmr.msrb.gmra.mxu2 %v893_v8  ;;  %933 = vmatmul.f32.vlgmr.msra.gmra.mxu3 %v894_v9 }
 0x136   : > { %v2997_v11 = vpop.f32.mrf.mxu3 }
 0x137   : > { %597 = vrot.lane.b32.xlu0 %v504_v10, %s3811_s16  ;;  %573 = vrot.lane.b32.xlu2 %v504_v10, %s2739_s19  ;;  %s3837_s19 = smov 56   ;;  %s3832_s16 = smov 57  }
 0x138   : > { %622 = vrot.lane.b32.xlu1 %v530_v7, %s3819_s20  ;;  %v3002_v12 = vpop.f32.mrf.mxu2 }
 0x13e   : > { %v536_v15 = vpop.f32.mrf.mxu3 }
 0x13f   : > { %676 = vrot.lane.b32.xlu0 %v2997_v11, %s3813_s23  ;;  %625 = vrot.lane.b32.xlu2 %v504_v10, %s3819_s20 }
 0x140   : > { %544 = vrot.lane.b32.xlu1 %v504_v10, %s2738_s18  ;;  %v510_v13 = vpop.f32.mrf.mxu2  ;;  %s3834_s18 = smov 7  }
 0x147   : > { %674 = vrot.lane.b32.xlu2 %v3002_v12, %s3813_s23  ;;  %650 = vrot.lane.b32.xlu0 %v3002_v12, %s3843_s13  ;;  %s3825_s23 = smov 55  }
 0x148   : > { %652 = vrot.lane.b32.xlu1 %v2997_v11, %s3843_s13 }
 0x14f   : > { %704 = vrot.lane.b32.xlu2 %v2997_v11, %s2736_s22  ;;  %728 = vrot.lane.b32.xlu0 %v510_v13, %s2742_s24 }
 0x150   : > { %702 = vrot.lane.b32.xlu1 %v3002_v12, %s2736_s22  ;;  %s3831_s22 = smov 71  }
 0x157   : > { %751 = vperm.xlu2 %2687, %v748_v14   ;;  %943 = vperm.xlu0 %2688, %v2527_v63  }
 0x158   : > { %730 = vrot.lane.b32.xlu1 %v536_v15, %s2742_s24  ;;  %s3833_s24 = smov 63  }
 0x189   : > { %v595_v16 = vpop.permute.xlu2 %594 }
 0x191   : > { %v574_v21 = vpop.permute.xlu2 %573 }
 0x199   : > { %v626_v29 = vpop.permute.xlu2 %625 }
 0x1a1   : > { %v541_v18 = vpop.permute.xlu0 %540  ;;  %v675_v56 = vpop.permute.xlu2 %674 }
 0x1a2   : > { %v571_v20 = vpop.permute.xlu1 %570 }
 0x1a3   : > { %v576_v32 = vsel %vm3806_vm6, %v574_v21, %v571_v20  ;;  %v579_v33 = vsel %vm3806_vm6, %v571_v20, %v574_v21  ;;  %vm563_vm6 = vmand %vm3026_vm8, %vm3040_vm11 }
 0x1a4   : > { %v584_v39 = vsel %vm3022_vm7, %v579_v33, 0.0  ;;  %v585_v40 = vsel %vm3026_vm8, %v576_v32, 0.0  ;;  %vm732_vm8 = vcmask 908288  }
 0x1a5   : > { %v588_v48 = vrot.slane %v584_v39, 2  ;;  %v589_v49 = vrot.slane %v585_v40, 2 }
 0x1a9   : > { %v598_v23 = vpop.permute.xlu0 %597  ;;  %v705_v20 = vpop.permute.xlu2 %704 }
 0x1aa   : > { %v623_v26 = vpop.permute.xlu1 %622  ;;  %v600_v42 = vsel %vm3821_vm12, %v598_v23, %v595_v16  ;;  %v603_v43 = vsel %vm3821_vm12, %v595_v16, %v598_v23  ;;  %vm3824_vm12 = vcmask 449536  }
 0x1ab   : > { %v612_v50 = vsel %vm606_vm1, %v603_v43, 0.0  ;;  %v613_v51 = vsel %vm607_vm0, %v600_v42, 0.0  ;;  %v628_v52 = vsel %vm3822_vm4, %v626_v29, %v623_v26  ;;  %v631_v53 = vsel %vm3822_vm4, %v623_v26, %v626_v29 }
 0x1ac   : > { %v616_v57 = vrot.slane %v612_v50, 4  ;;  %v617_v58 = vrot.slane %v613_v51, 4  ;;  %v636_v60 = vsel %vm3032_vm9, %v631_v53, 0.0  ;;  %v637_v61 = vsel %vm3040_vm11, %v628_v52, 0.0  ;;  %v2526_v53 = vld [vmem:[%s3795_s1 + $0x2] sm:$0x3] }
 0x1ad   : > { %v640_v5 = vrot.slane %v636_v60, 6  ;;  %v641_v6 = vrot.slane %v637_v61, 6  ;;  %vm3081_vm0 = vcmp.lt.s32.totalorder %v554_v24, 15  ;;  %vm678_vm1 = vcmask 924672   ;;  %v2531_v60 = vld [vmem:[%s3797_s3 + $0x20] sm:$0xff] }
 0x1ae   : > { %v2532_v61 = vld [vmem:[%s3797_s3 + $0x28] sm:$0x3] }
 0x1b1   : > { %v677_v38 = vpop.permute.xlu0 %676 }
 0x1b2   : > { %v545_v41 = vpop.permute.xlu1 %544  ;;  %v679_v15 = vsel %vm678_vm1, %v675_v56, %v677_v38  ;;  %v683_v16 = vsel %vm678_vm1, %v677_v38, %v675_v56 }
 0x1b3   : > { %v547_v44 = vsel %vm546_vm14, %v545_v41, %v541_v18  ;;  %v550_v45 = vsel %vm546_vm14, %v541_v18, %v545_v41  ;;  %vm3912_vm14 = vcmask 31744  }
 0x1b4   : > { %v568_v46 = vsel %vm562_vm15, %v550_v45, 0.0  ;;  %v569_v47 = vsel %vm563_vm6, %v547_v44, 0.0  ;;  %vm3085_vm6 = vcmp.lt.s32.totalorder %v555_v25, 15 }
 0x1b5   : > { %v592_v54 = vadd.f32 %v588_v48, %v568_v46  ;;  %v593_v55 = vadd.f32 %v589_v49, %v569_v47  ;;  %vm687_vm7 = vmand %vm3085_vm6, %vm3040_vm11  ;;  %v752_v46 = vpop.permute.xlu2 %751 }
 0x1b6   : > { %v693_v27 = vsel %vm687_vm7, %v683_v16, 0.0  ;;  %v914_v48 = vpop.f32.mrf.mxu2  ;;  %v934_v49 = vpop.f32.mrf.mxu3  ;;  %v3916_v16 = vmov 0 }
 0x1b7   : > { %v620_v0 = vadd.f32 %v616_v57, %v592_v54  ;;  %v621_v2 = vadd.f32 %v617_v58, %v593_v55  ;;  %v697_v33 = vrot.slane %v693_v27, 4  ;;  %v3120_v52 = vadd.f32 %v934_v49, %v914_v48 }
 0x1b9   : > { %v651_v59 = vpop.permute.xlu0 %650  ;;  %v644_v13 = vadd.f32 %v640_v5, %v620_v0  ;;  %v645_v14 = vadd.f32 %v641_v6, %v621_v2  ;;  %v2537_v2 = vld [vmem:[%s3798_s4 + $0x2] sm:$0x3] }
 0x1ba   : > { %v653_v62 = vpop.permute.xlu1 %652 }
 0x1bb   : > { %v655_v3 = vsel %vm654_vm2, %v651_v59, %v653_v62  ;;  %v659_v4 = vsel %vm654_vm2, %v653_v62, %v651_v59  ;;  %vm686_vm2 = vmand %vm3081_vm0, %vm3032_vm9  ;;  %v647_v22 = vadd.f32 %v645_v14, %v2997_v11  ;;  %v646_v23 = vadd.f32 %v644_v13, %v3002_v12  ;;  %v2530_v59 = vld [vmem:[%s3797_s3 + $0x18] sm:$0xff] }
 0x1bc   : > { %v664_v9 = vsel %vm3036_vm10, %v655_v3, 0.0  ;;  %v665_v10 = vsel %vm3044_vm13, %v659_v4, 0.0  ;;  %v692_v26 = vsel %vm686_vm2, %v679_v15, 0.0  ;;  %vm739_vm9 = vmand %vm3085_vm6, %vm3044_vm13  ;;  %vm3911_vm13 = vcmask 1043456   ;;  %v2539_v4 = vld [vmem:[%s3800_s6 + $0x4] sm:$0xf] }
 0x1bd   : > { %v668_v17 = vrot.slane %v664_v9, 2  ;;  %v669_v18 = vrot.slane %v665_v10, 2  ;;  %v696_v32 = vrot.slane %v692_v26, 4  ;;  %v1024_v13 = vshra.s32 %v3017_v19, 3 }
 0x1be   : > { %v1025_v14 = vand.u32 7, %v3017_v19 }
 0x1bf   : > { %v672_v30 = vadd.f32 %v668_v17, %v646_v23  ;;  %v673_v31 = vadd.f32 %v669_v18, %v647_v22  ;;  %vm3185_vm7 = vcmp.ge.s32.totalorder %v1024_v13, 1  ;;  %v3924_v23 = vmov 0  ;;  %v2374_v17 = vld [vmem:[%s4037_s11 + $0x40] sm:$0xff] }
 0x1c0   : > { %vm3181_vm2 = vcmp.lt.s32.totalorder %v1025_v14, 7 }
 0x1c1   : > { %v729_v12 = vpop.permute.xlu0 %728  ;;  %v700_v36 = vadd.f32 %v696_v32, %v672_v30  ;;  %v701_v38 = vadd.f32 %v697_v33, %v673_v31  ;;  %v3917_v16 = vsel %vm3181_vm2, 4294967295, %v3916_v16 }
 0x1c2   : > { %v703_v21 = vpop.permute.xlu1 %702 }
 0x1c3   : > { %v707_v24 = vsel %vm706_vm5, %v703_v21, %v705_v20  ;;  %v711_v25 = vsel %vm706_vm5, %v705_v20, %v703_v21  ;;  %vm738_vm5 = vmand %vm3081_vm0, %vm3036_vm10  ;;  %vm3909_vm10 = vcmask 15360  }
 0x1c4   : > { %v716_v28 = vsel %vm3081_vm0, %v707_v24, 0.0  ;;  %v717_v29 = vsel %vm3085_vm6, %v711_v25, 0.0  ;;  %vm3910_vm11 = vmmov %vm3909_vm10  ;;  %vm3862_vm6 = vcmask 64512  }
 0x1c5   : > { %v720_v34 = vrot.slane %v716_v28, 6  ;;  %v721_v11 = vrot.slane %v717_v29, 6  ;;  %vm3913_vm15 = vmmov %vm3909_vm10 }
 0x1c6   : > { %vm3914_vm0 = vmmov %vm3909_vm10 }
 0x1c7   : > { %v724_v40 = vadd.f32 %v720_v34, %v700_v36  ;;  %v725_v41 = vadd.f32 %v721_v11, %v701_v38  ;;  %vm3915_vm1 = vmmov %vm3914_vm0 }
 0x1c9   : > { %v944_v55 = vpop.permute.xlu0 %943 }
 0x1ca   : > { %v731_v39 = vpop.permute.xlu1 %730 }
 0x1cb   : > { %v733_v42 = vsel %vm732_vm8, %v729_v12, %v731_v39  ;;  %v737_v43 = vsel %vm732_vm8, %v731_v39, %v729_v12  ;;  %vm3189_vm8 = vcmp.ge.s32.totalorder %v1025_v14, 1 }
 0x1cc   : > { %v744_v44 = vsel %vm738_vm5, %v733_v42, 0.0  ;;  %v745_v45 = vsel %vm739_vm9, %v737_v43, 0.0  ;;  %vm3860_vm5 = vcmask 72704   ;;  %vm3861_vm9 = vcmask 56320  }
 0x1cd   : > { %v747_v35 = vadd.f32 %v745_v45, %v725_v41  ;;  %v746_v47 = vadd.f32 %v744_v44, %v724_v40  ;;  %v3926_v43 = vmov 0 }
 0x1cf   : > { %v755_v50 = vadd.f32 %v752_v46, %v747_v35  ;;  %v754_v51 = vadd.f32 %v752_v46, %v746_v47  ;;  %v3928_v46 = vmov 0 }
 0x1d1   : > { %2522 = vmatpush.msk.msra.mxu0 %vm3863_vm3, %v754_v51  ;;  %2524 = vmatpush.msk.msrb.mxu1 %vm3863_vm3, %v755_v50 }
 0x1d2   : > { %2523 = vmatmul.msk.f32.vlgmr.msra.gmra.mxu0 %vm3909_vm10, %v756_v37  ;;  %2525 = vmatmul.msk.f32.vlgmr.msrb.gmra.mxu1 %vm3910_vm11, %v756_v37  ;;  %vm3198_vm10 = vmand %vm3185_vm7, %vm3181_vm2 }
 0x1d3   : > { %2528 = vmatpush.msk.msrb.mxu0 %vm3911_vm13, %v3120_v52  ;;  %vm3206_vm11 = vmand %vm3185_vm7, %vm3189_vm8  ;;  %vm3829_vm13 = vcmask 515072  }
 0x1d4   : > { %v3925_v23 = vsel %vm3206_vm11, 4294967295, %v3924_v23 }
 0x1da   : > { %2529 = vmatmul.msk.f32.vlgmr.msrb.gmra.mxu0 %vm3912_vm14, %v2526_v53  ;;  %vm3224_vm14 = vcmp.lt.s32.totalorder %v1024_v13, 7 }
 0x1db   : > { %v3927_v43 = vsel %vm3224_vm14, 4294967295, %v3926_v43 }
 0x24f   : > { %v3132_v54 = vpop.f32.mrf.mxu0  ;;  %v3147_v62 = vpop.f32.mrf.mxu1 }
 0x257   : > { %v969_v56 = vpop.f32.mrf.mxu0 }
 0x258   : > { %v970_v57 = vadd.f32 %v969_v56, %v944_v55 }
 0x25a   : > { %v972_v58 = vmax.f32 %v970_v57, 0.0  ;;  %v3930_v57 = vmov 0 }
 0x25c   : > { %2533 = vmatpush.msk.msra.mxu1 %vm3863_vm3, %v972_v58 }
 0x25d   : > { %2534 = vmatmul.msk.f32.vlgmr.msra.gmra.mxu1 %vm3913_vm15, %v2530_v59  ;;  %vm3859_vm15 = vcmask 457728  }
 0x265   : > { %2535 = vmatmul.msk.f32.gmra.mxu1 %vm3914_vm0, %v2531_v60  ;;  %vm3823_vm0 = vcmask 465920  }
 0x26d   : > { %2536 = vmatmul.msk.f32.gmra.mxu1 %vm3915_vm1, %v2532_v61  ;;  %vm3232_vm1 = vmand %vm3224_vm14, %vm3189_vm8 }
 0x26e   : > { %v3929_v46 = vsel %vm3232_vm1, 4294967295, %v3928_v46 }
 0x2da   : > { %v1006_v63 = vpop.f32.mrf.mxu1 }
 0x2db   : > { %1047 = vrot.lane.b32.xlu0 %v1006_v63, %s3831_s22  ;;  %1035 = vrot.lane.b32.xlu2 %v1006_v63, %s3839_s28 }
 0x2dc   : > { %1032 = vrot.lane.b32.xlu1 %v1006_v63, %s3838_s29 }
 0x2e2   : > { %v3155_v0 = vpop.f32.mrf.mxu1 }
 0x2e3   : > { %1067 = vrot.lane.b32.xlu0 %v1006_v63, %s3819_s20  ;;  %1019 = vrot.lane.b32.xlu2 %v1006_v63, %s3830_s30  ;;  %s3851_s20 = smov 3  }
 0x2e4   : > { %1016 = vrot.lane.b32.xlu1 %v1006_v63, %s3840_s12 }
 0x2ea   : > { %v1012_v3 = vpop.f32.mrf.mxu1 }
 0x2eb   : > { %1064 = vrot.lane.b32.xlu2 %v1006_v63, %s3817_s14  ;;  %1095 = vrot.lane.b32.xlu0 %v3155_v0, %s3815_s15  ;;  %s3836_s15 = smov 119   ;;  %s3847_s14 = smov 115  }
 0x2ec   : > { %1050 = vrot.lane.b32.xlu1 %v1006_v63, %s3834_s18 }
 0x2f3   : > { %1115 = vrot.lane.b32.xlu0 %v3155_v0, %s3837_s19  ;;  %1083 = vrot.lane.b32.xlu2 %v3155_v0, %s3833_s24 }
 0x2f4   : > { %1080 = vrot.lane.b32.xlu1 %v3155_v0, %s3843_s13 }
 0x2fb   : > { %1145 = vperm.xlu0 %2688, %v2537_v2   ;;  %1112 = vrot.lane.b32.xlu2 %v3155_v0, %s3827_s26 }
 0x2fc   : > { %1098 = vrot.lane.b32.xlu1 %v3155_v0, %s3832_s16 }
 0x303   : > { %1131 = vrot.lane.b32.xlu2 %v1012_v3, %s3825_s23  ;;  %s3939_s23 = smov 65  }
 0x304   : > { %1128 = vrot.lane.b32.xlu1 %v1012_v3, %s3836_s15 }
 0x30c   : > { %1155 = vperm.xlu1 %2686, %v2539_v4   ;;  %v2538_v4 = vld [vmem:[%s3799_s5 + $0x4] sm:$0xf] }
 0x335   : > { %v1036_v5 = vpop.permute.xlu2 %1035 }
 0x33d   : > { %v1020_v6 = vpop.permute.xlu2 %1019 }
 0x345   : > { %v1065_v10 = vpop.permute.xlu2 %1064 }
 0x34d   : > { %v1048_v7 = vpop.permute.xlu0 %1047  ;;  %v1084_v28 = vpop.permute.xlu2 %1083 }
 0x34e   : > { %v1033_v8 = vpop.permute.xlu1 %1032 }
 0x34f   : > { %v1039_v20 = vsel %vm3862_vm6, %v1033_v8, %v1036_v5 }
 0x350   : > { %v1042_v26 = vsel %vm3185_vm7, %v1039_v20, 0.0 }
 0x351   : > { %v1044_v31 = vrot.slane %v1042_v26, 2  ;;  %v2546_v26 = vld [vmem:[%s3797_s3 + $0x30] sm:$0xff] }
 0x355   : > { %v1068_v15 = vpop.permute.xlu0 %1067  ;;  %v1113_v42 = vpop.permute.xlu2 %1112 }
 0x356   : > { %v1017_v9 = vpop.permute.xlu1 %1016  ;;  %v1070_v32 = vsel %vm3822_vm4, %v1065_v10, %v1068_v15  ;;  %vm3247_vm4 = vmand %vm3224_vm14, %vm3181_vm2 }
 0x357   : > { %v1023_v24 = vsel %vm3860_vm5, %v1017_v9, %v1020_v6  ;;  %v1073_v11 = vsel %vm3189_vm8, %v1070_v32, 0.0  ;;  %v3931_v57 = vsel %vm3247_vm4, 4294967295, %v3930_v57  ;;  %v2542_v9 = vld [vmem:[%s3795_s1 + $0x4] sm:$0x3]  ;;  %v1421_v32 = vld [vmem:[#allocation2 + $0x20] sm:$0xff] }
 0x358   : > { %v1031_v29 = vsel %vm3206_vm11, %v1023_v24, 0.0  ;;  %v1075_v39 = vrot.slane %v1073_v11, 6  ;;  %v1418_v11 = vld [vmem:[#allocation2 + $0x8] sm:$0xff] }
 0x359   : > { %v1046_v34 = vadd.f32 %v1044_v31, %v1031_v29  ;;  %v1424_v29 = vld [vmem:[#allocation2 + $0x38] sm:$0xff]  ;;  %v1422_v31 = vld [vmem:[#allocation2 + $0x28] sm:$0xff] }
 0x35a   : > { %1437 = vmatpush.msra.mxu2 %v1424_v29 }
 0x35d   : > { %v1096_v30 = vpop.permute.xlu0 %1095  ;;  %v1132_v58 = vpop.permute.xlu2 %1131 }
 0x35e   : > { %v1051_v22 = vpop.permute.xlu1 %1050 }
 0x35f   : > { %v1054_v25 = vsel %vm3861_vm9, %v1048_v7, %v1051_v22 }
 0x360   : > { %v1059_v27 = vsel %vm3198_vm10, %v1054_v25, 0.0 }
 0x361   : > { %v1061_v33 = vrot.slane %v1059_v27, 4  ;;  %v2547_v27 = vld [vmem:[%s3797_s3 + $0x38] sm:$0xff] }
 0x363   : > { %v1063_v36 = vadd.f32 %v1061_v33, %v1046_v34  ;;  %v1420_v33 = vld [vmem:[#allocation2 + $0x18] sm:$0xff]  ;;  %v1419_v34 = vld [vmem:[#allocation2 + $0x10] sm:$0xff] }
 0x365   : > { %v1077_v41 = vadd.f32 %v1075_v39, %v1063_v36  ;;  %v1116_v44 = vpop.permute.xlu0 %1115 }
 0x366   : > { %v1081_v12 = vpop.permute.xlu1 %1080  ;;  %v1119_v47 = vsel %vm3859_vm15, %v1113_v42, %v1116_v44 }
 0x367   : > { %v1087_v38 = vsel %vm3829_vm13, %v1081_v12, %v1084_v28  ;;  %v1078_v48 = vadd.f32 %v1077_v41, %v3155_v0  ;;  %v1122_v53 = vsel %vm3224_vm14, %v1119_v47, 0.0  ;;  %v2548_v28 = vld [vmem:[%s3797_s3 + $0x40] sm:$0x3]  ;;  %v1417_v12 = vld [vmem:[#allocation2] sm:$0xff] }
 0x368   : > { %v1090_v40 = vsel %vm3181_vm2, %v1087_v38, 0.0  ;;  %v1124_v56 = vrot.slane %v1122_v53, 6 }
 0x369   : > { %v1092_v45 = vrot.slane %v1090_v40, 2 }
 0x36b   : > { %v1094_v51 = vadd.f32 %v1092_v45, %v1078_v48  ;;  %v2553_v45 = vld [vmem:[%s3798_s4 + $0x4] sm:$0x3]  ;;  %v2559_v48 = vld [vmem:[%s3795_s1 + $0x6] sm:$0x3] }
 0x36d   : > { %v1146_v2 = vpop.permute.xlu0 %1145 }
 0x36e   : > { %v1099_v35 = vpop.permute.xlu1 %1098 }
 0x36f   : > { %v1102_v49 = vsel %vm3823_vm0, %v1096_v30, %v1099_v35  ;;  %vm3932_vm0 = vcmask 15360   ;;  %v1423_v30 = vld [vmem:[#allocation2 + $0x30] sm:$0xff]  ;;  %v2560_v35 = vld [vmem:[%s3796_s2 + $0x6] sm:$0x3] }
 0x370   : > { %v1107_v50 = vsel %vm3232_vm1, %v1102_v49, 0.0  ;;  %1438 = vmatpush.msra.mxu2 %v1423_v30 }
 0x371   : > { %v1109_v37 = vrot.slane %v1107_v50, 4 }
 0x372   : > { %1439 = vmatpush.msra.mxu2 %v1422_v31 }
 0x373   : > { %v1111_v55 = vadd.f32 %v1109_v37, %v1094_v51 }
 0x374   : > { %1440 = vmatpush.msra.mxu2 %v1421_v32 }
 0x375   : > { %v1126_v60 = vadd.f32 %v1124_v56, %v1111_v55 }
 0x376   : > { %v1129_v59 = vpop.permute.xlu1 %1128  ;;  %1441 = vmatpush.msra.mxu2 %v1420_v33 }
 0x377   : > { %v1135_v61 = vsel %vm3824_vm12, %v1129_v59, %v1132_v58  ;;  %vm3933_vm12 = vcmask 1043456  }
 0x378   : > { %v1139_v63 = vsel %vm3247_vm4, %v1135_v61, 0.0  ;;  %1442 = vmatpush.msra.mxu2 %v1419_v34 }
 0x379   : > { %v1140_v0 = vadd.f32 %v1139_v63, %v1126_v60 }
 0x37a   : > { %1443 = vmatpush.msra.mxu2 %v1418_v11 }
 0x37b   : > { %v1148_v3 = vadd.f32 %v1146_v2, %v1140_v0 }
 0x37c   : > { %1444 = vmatpush.msra.mxu2 %v1417_v12 }
 0x37d   : > { %2540 = vmatpush.msk.msra.mxu0 %vm3863_vm3, %v1148_v3 }
 0x37e   : > { %2541 = vmatmul.msk.f32.vlgmr.msra.gmra.mxu0 %vm3932_vm0, %v2538_v4  ;;  %v1156_v5 = vpop.permute.xlu1 %1155  ;;  %vm3934_vm0 = vcmask 31744  }
 0x3fb   : > { %v1181_v6 = vpop.f32.mrf.mxu0 }
 0x3fc   : > { %v1182_v7 = vadd.f32 %v1181_v6, %v1156_v5 }
 0x3fe   : > { %v3260_v8 = vadd.f32 %v1182_v7, %v3120_v52  ;;  %v2543_v52 = vld [vmem:[%s3796_s2 + $0x4] sm:$0x3] }
 0x400   : > { %1403 = vrot.lane.b32.xlu0 %v3260_v8, %s3833_s24  ;;  %1400 = vrot.lane.b32.xlu2 %v3260_v8, %s3843_s13 }
 0x401   : > { %2544 = vmatpush.msk.msrb.mxu0 %vm3933_vm12, %v3260_v8  ;;  %vm3935_vm12 = vcmask 15360  }
 0x402   : > { %2545 = vmatmul.msk.f32.vlgmr.msrb.gmra.mxu0 %vm3934_vm0, %v2542_v9  ;;  %vm3936_vm0 = vmmov %vm3935_vm12 }
 0x408   : > { %1191 = vperm.xlu0 %2688, %v2543_v52  }
 0x45a   : > { %v1401_v10 = vpop.permute.xlu2 %1400 }
 0x472   : > { %v1404_v13 = vpop.permute.xlu0 %1403 }
 0x473   : > { %v1406_v14 = vsel %vm3829_vm13, %v1401_v10, %v1404_v13  ;;  %vm3937_vm13 = vmmov %vm3936_vm0 }
 0x474   : > { %v1407_v15 = vmax.f32 %v3260_v8, %v1406_v14 }
 0x476   : > { %1412 = vrot.lane.b32.xlu2 %v1407_v15, %s3837_s19  ;;  %1409 = vrot.lane.b32.xlu1 %v1407_v15, %s3827_s26  ;;  %s3938_s26 = smov 1  }
 0x47a   : > { %v1192_v20 = vpop.permute.xlu0 %1191 }
 0x47f   : > { %v1217_v22 = vpop.f32.mrf.mxu0 }
 0x480   : > { %v1218_v24 = vadd.f32 %v1217_v22, %v1192_v20 }
 0x482   : > { %v1220_v25 = vmax.f32 %v1218_v24, 0.0 }
 0x484   : > { %2549 = vmatpush.msk.msra.mxu0 %vm3863_vm3, %v1220_v25 }
 0x485   : > { %2550 = vmatmul.msk.f32.vlgmr.msra.gmra.mxu0 %vm3935_vm12, %v2546_v26  ;;  %vm3943_vm12 = vcmask 1043456  }
 0x48d   : > { %2551 = vmatmul.msk.f32.gmra.mxu0 %vm3936_vm0, %v2547_v27  ;;  %vm3944_vm0 = vcmask 31744  }
 0x495   : > { %2552 = vmatmul.msk.f32.gmra.mxu0 %vm3937_vm13, %v2548_v28  ;;  %vm3835_vm13 = vcmask 523264  }
 0x4d0   : > { %v1413_v36 = vpop.permute.xlu2 %1412 }
 0x4e8   : > { %v1410_v38 = vpop.permute.xlu1 %1409 }
 0x4e9   : > { %v1415_v39 = vsel %vm3859_vm15, %v1410_v38, %v1413_v36 }
 0x4ea   : > { %v1416_v40 = vmax.f32 %v1407_v15, %v1415_v39 }
 0x4ec   : > { %2558 = vmatmul.msk.f32.vlgmr.msra.gmra.mxu2 %vm3835_vm13, %v1416_v40  ;;  %vm3947_vm13 = vcmask 465920  }
 0x502   : > { %v1254_v41 = vpop.f32.mrf.mxu0 }
 0x503   : > { %1264 = vrot.lane.b32.xlu0 %v1254_v41, %s3840_s12  ;;  %1275 = vrot.lane.b32.xlu2 %v1254_v41, %s3839_s28  ;;  %s3954_s28 = smov 15   ;;  %s3855_s12 = smov 12  }
 0x504   : > { %1272 = vrot.lane.b32.xlu1 %v1254_v41, %s3838_s29  ;;  %s3849_s29 = smov 13  }
 0x50a   : > { %v1257_v42 = vpop.f32.mrf.mxu0 }
 0x50b   : > { %1287 = vrot.lane.b32.xlu0 %v1254_v41, %s3834_s18  ;;  %1284 = vrot.lane.b32.xlu2 %v1254_v41, %s3831_s22  ;;  %s3878_s18 = smov 117   ;;  %s3841_s22 = smov 5  }
 0x50c   : > { %1267 = vrot.lane.b32.xlu1 %v1254_v41, %s3830_s30  ;;  %s3953_s30 = smov 113  }
 0x512   : > { %v1260_v44 = vpop.f32.mrf.mxu0 }
 0x513   : > { %1299 = vrot.lane.b32.xlu2 %v1254_v41, %s3938_s26  ;;  %1310 = vrot.lane.b32.xlu0 %v1257_v42, %s3843_s13 }
 0x514   : > { %1296 = vrot.lane.b32.xlu1 %v1254_v41, %s3939_s23 }
 0x51b   : > { %1322 = vrot.lane.b32.xlu2 %v1257_v42, %s3940_s25  ;;  %1325 = vrot.lane.b32.xlu0 %v1257_v42, %s3832_s16  ;;  %s3942_s16 = smov 55  }
 0x51c   : > { %1313 = vrot.lane.b32.xlu1 %v1257_v42, %s3833_s24  ;;  %s3857_s24 = smov 4  }
 0x523   : > { %1337 = vrot.lane.b32.xlu2 %v1257_v42, %s3837_s19  ;;  %1347 = vrot.lane.b32.xlu0 %v1260_v44, %s3836_s15  ;;  %s3853_s15 = smov 116   ;;  %s3845_s19 = smov 125  }
 0x524   : > { %1334 = vrot.lane.b32.xlu1 %v1257_v42, %s3941_s27 }
 0x52b   : > { %1360 = vperm.xlu2 %2687, %v2553_v45   ;;  %1455 = vperm.xlu0 %2688, %v2560_v35   ;;  %v2554_v35 = vld [vmem:[%s3799_s5 + $0x8] sm:$0xf] }
 0x52c   : > { %1350 = vrot.lane.b32.xlu1 %v1260_v44, %s3942_s16  ;;  %s4035_s16 = smov 55  }
 0x55d   : > { %v1276_v47 = vpop.permute.xlu2 %1275 }
 0x565   : > { %v1285_v37 = vpop.permute.xlu2 %1284 }
 0x56d   : > { %v1300_v58 = vpop.permute.xlu2 %1299 }
 0x56f   : > { %v3319_v49 = vpop.f32.mrf.mxu2 }
 0x570   : > { %2561 = vmatpush.msk.msrb.mxu3 %vm3943_vm12, %v3319_v49  ;;  %vm3945_vm12 = vcmask 7168  }
 0x571   : > { %2562 = vmatmul.msk.f32.vlgmr.msrb.gmra.mxu3 %vm3944_vm0, %v2559_v48  ;;  %vm3946_vm0 = vcmask 515072  }
 0x575   : > { %v1265_v50 = vpop.permute.xlu0 %1264  ;;  %v1323_v9 = vpop.permute.xlu2 %1322 }
 0x576   : > { %v1273_v51 = vpop.permute.xlu1 %1272 }
 0x577   : > { %v1278_v56 = vsel %vm3862_vm6, %v1273_v51, %v1276_v47 }
 0x578   : > { %v1279_v59 = vsel %vm3185_vm7, %v1278_v56, 0.0 }
 0x579   : > { %v1281_v0 = vrot.slane %v1279_v59, 2 }
 0x57d   : > { %v1288_v53 = vpop.permute.xlu0 %1287  ;;  %v1338_v27 = vpop.permute.xlu2 %1337 }
 0x57e   : > { %v1268_v55 = vpop.permute.xlu1 %1267  ;;  %v1290_v60 = vsel %vm3861_vm9, %v1285_v37, %v1288_v53  ;;  %v2563_v37 = vld [vmem:[%s3797_s3 + $0x48] sm:$0xff]  ;;  %v2564_v53 = vld [vmem:[%s3797_s3 + $0x50] sm:$0xff]  ;;  %vm3961_vm9 = vcmask 31744  }
 0x57f   : > { %v1270_v61 = vsel %vm3860_vm5, %v1265_v50, %v1268_v55  ;;  %v1291_v2 = vsel %vm3198_vm10, %v1290_v60, 0.0  ;;  %v2565_v55 = vld [vmem:[%s3797_s3 + $0x58] sm:$0x3] }
 0x580   : > { %v1271_v3 = vsel %vm3206_vm11, %v1270_v61, 0.0  ;;  %v1293_v6 = vrot.slane %v1291_v2, 4  ;;  %v2570_v61 = vld [vmem:[%s3798_s4 + $0x6] sm:$0x3] }
 0x581   : > { %v1283_v7 = vadd.f32 %v1281_v0, %v1271_v3  ;;  %v2576_v0 = vld [vmem:[%s3796_s2 + $0x8] sm:$0x3] }
 0x583   : > { %v1295_v13 = vadd.f32 %v1293_v6, %v1283_v7 }
 0x585   : > { %v1311_v4 = vpop.permute.xlu0 %1310  ;;  %v1361_v45 = vpop.permute.xlu2 %1360 }
 0x586   : > { %v1297_v63 = vpop.permute.xlu1 %1296 }
 0x587   : > { %v1302_v5 = vsel %vm3945_vm12, %v1297_v63, %v1300_v58  ;;  %vm3949_vm12 = vcmask 15360   ;;  %v2572_v63 = vld [vmem:[%s3800_s6 + $0xc] sm:$0xf] }
 0x588   : > { %v1303_v52 = vsel %vm3189_vm8, %v1302_v5, 0.0 }
 0x589   : > { %v1305_v14 = vrot.slane %v1303_v52, 6  ;;  %v1536_v52 = vshra.s32 %v3017_v19, 2 }
 0x58b   : > { %v1307_v24 = vadd.f32 %v1305_v14, %v1295_v13  ;;  %vm3411_vm5 = vcmp.ge.s32.totalorder %v1536_v52, 1 }
 0x58d   : > { %v1326_v22 = vpop.permute.xlu0 %1325  ;;  %v1308_v30 = vadd.f32 %v1307_v24, %v1257_v42 }
 0x58e   : > { %v1314_v10 = vpop.permute.xlu1 %1313  ;;  %v1328_v25 = vsel %vm3947_vm13, %v1323_v9, %v1326_v22  ;;  %vm3948_vm13 = vcmask 449536   ;;  %v1537_v9 = vand.u32 3, %v3017_v19 }
 0x58f   : > { %v1316_v15 = vsel %vm3946_vm0, %v1311_v4, %v1314_v10  ;;  %v1329_v28 = vsel %vm3232_vm1, %v1328_v25, 0.0  ;;  %vm3950_vm0 = vmmov %vm3949_vm12  ;;  %vm3975_vm1 = vcmask 15360  }
 0x590   : > { %v1317_v20 = vsel %vm3181_vm2, %v1316_v15, 0.0  ;;  %v1331_v34 = vrot.slane %v1329_v28, 4  ;;  %vm3977_vm2 = vcmask 31744   ;;  %vm3978_vm11 = vmmov %vm3975_vm1 }
 0x591   : > { %v1319_v26 = vrot.slane %v1317_v20, 2 }
 0x593   : > { %v1321_v33 = vadd.f32 %v1319_v26, %v1308_v30 }
 0x595   : > { %v1333_v12 = vadd.f32 %v1331_v34, %v1321_v33  ;;  %v1348_v36 = vpop.permute.xlu0 %1347 }
 0x596   : > { %v1335_v29 = vpop.permute.xlu1 %1334 }
 0x597   : > { %v1340_v31 = vsel %vm3859_vm15, %v1335_v29, %v1338_v27  ;;  %vm3407_vm15 = vcmp.ge.s32.totalorder %v1537_v9, 1 }
 0x598   : > { %v1341_v32 = vsel %vm3224_vm14, %v1340_v31, 0.0 }
 0x599   : > { %v1343_v11 = vrot.slane %v1341_v32, 6 }
 0x59b   : > { %v1345_v39 = vadd.f32 %v1343_v11, %v1333_v12 }
 0x59d   : > { %v1456_v47 = vpop.permute.xlu0 %1455 }
 0x59e   : > { %v1351_v38 = vpop.permute.xlu1 %1350 }
 0x59f   : > { %v1353_v40 = vsel %vm3948_vm13, %v1348_v36, %v1351_v38  ;;  %vm3951_vm13 = vmmov %vm3950_vm0 }
 0x5a0   : > { %v1354_v41 = vsel %vm3247_vm4, %v1353_v40, 0.0  ;;  %vm3869_vm4 = vcmask 97280  }
 0x5a1   : > { %v1355_v44 = vadd.f32 %v1354_v41, %v1345_v39 }
 0x5a3   : > { %v1363_v42 = vadd.f32 %v1361_v45, %v1355_v44  ;;  %v2603_v44 = vld [vmem:[%s3799_s5 + $0x14] sm:$0xf] }
 0x5a5   : > { %2556 = vmatpush.msk.msrb.mxu1 %vm3863_vm3, %v1363_v42 }
 0x5a6   : > { %2557 = vmatmul.msk.f32.vlgmr.msrb.gmra.mxu1 %vm3949_vm12, %v2554_v35  ;;  %vm3952_vm12 = vmmov %vm3950_vm0 }
 0x5f4   : > { %v1481_v48 = vpop.f32.mrf.mxu3 }
 0x5f5   : > { %v1482_v50 = vadd.f32 %v1481_v48, %v1456_v47  ;;  %v2126_v47 = vld [vmem:[%s3804_s10 + $0x8] sm:$0xff] }
 0x5f7   : > { %v1484_v51 = vmax.f32 %v1482_v50, 0.0 }
 0x5f9   : > { %2566 = vmatpush.msk.msra.mxu1 %vm3863_vm3, %v1484_v51  ;;  %vm3429_vm3 = vmand %vm3411_vm5, %vm3407_vm15 }
 0x5fa   : > { %2567 = vmatmul.msk.f32.vlgmr.msra.gmra.mxu1 %vm3950_vm0, %v2563_v37  ;;  %vm3403_vm0 = vcmp.lt.s32.totalorder %v1537_v9, 3 }
 0x5fb   : > { %vm3420_vm6 = vmand %vm3411_vm5, %vm3403_vm0 }
 0x602   : > { %2568 = vmatmul.msk.f32.gmra.mxu1 %vm3951_vm13, %v2564_v53  ;;  %vm3865_vm13 = vcmask 23552  }
 0x60a   : > { %2569 = vmatmul.msk.f32.gmra.mxu1 %vm3952_vm12, %v2565_v55  ;;  %vm3864_vm12 = vcmask 39936  }
 0x623   : > { %v3366_v56 = vpop.f32.mrf.mxu1 }
 0x677   : > { %v1518_v58 = vpop.f32.mrf.mxu1 }
 0x678   : > { %1528 = vrot.lane.b32.xlu0 %v1518_v58, %s3878_s18  ;;  %1547 = vrot.lane.b32.xlu2 %v1518_v58, %s3857_s24  ;;  %s3987_s24 = smov 13  }
 0x679   : > { %1544 = vrot.lane.b32.xlu1 %v1518_v58, %s3853_s15  ;;  %s3874_s15 = smov 11  }
 0x67f   : > { %v3374_v59 = vpop.f32.mrf.mxu1 }
 0x680   : > { %1561 = vrot.lane.b32.xlu0 %v1518_v58, %s3851_s20  ;;  %1558 = vrot.lane.b32.xlu2 %v1518_v58, %s3847_s14  ;;  %s3980_s20 = smov 4   ;;  %s3981_s14 = smov 116  }
 0x681   : > { %1531 = vrot.lane.b32.xlu1 %v1518_v58, %s3841_s22  ;;  %s3882_s22 = smov 123  }
 0x687   : > { %v1524_v60 = vpop.f32.mrf.mxu1 }
 0x688   : > { %1578 = vrot.lane.b32.xlu2 %v1518_v58, %s3938_s26  ;;  %1591 = vrot.lane.b32.xlu0 %v3374_v59, %s3843_s13  ;;  %s3876_s13 = smov 124  }
 0x689   : > { %1575 = vrot.lane.b32.xlu1 %v1518_v58, %s3953_s30 }
 0x690   : > { %1605 = vrot.lane.b32.xlu2 %v3374_v59, %s3845_s19  ;;  %1608 = vrot.lane.b32.xlu0 %v3374_v59, %s3849_s29  ;;  %s3984_s29 = smov 5   ;;  %s3986_s19 = smov 125  }
 0x691   : > { %1594 = vrot.lane.b32.xlu1 %v3374_v59, %s3954_s28 }
 0x698   : > { %1625 = vrot.lane.b32.xlu2 %v3374_v59, %s3855_s12  ;;  %1638 = vrot.lane.b32.xlu0 %v1524_v60, %s3882_s22  ;;  %s3985_s12 = smov 127  }
 0x699   : > { %1622 = vrot.lane.b32.xlu1 %v3374_v59, %s3876_s13  ;;  %s3983_s13 = smov 115  }
 0x6a0   : > { %1655 = vperm.xlu2 %2687, %v2570_v61   ;;  %1665 = vperm.xlu0 %2688, %v2572_v63  }
 0x6a1   : > { %1641 = vrot.lane.b32.xlu1 %v1524_v60, %s3874_s15  ;;  %s3982_s15 = smov 3  }
 0x6a9   : > { %1701 = vperm.xlu1 %2686, %v2576_v0  }
 0x6d2   : > { %v1548_v2 = vpop.permute.xlu2 %1547 }
 0x6da   : > { %v1559_v5 = vpop.permute.xlu2 %1558 }
 0x6e2   : > { %v1579_v10 = vpop.permute.xlu2 %1578 }
 0x6ea   : > { %v1529_v3 = vpop.permute.xlu0 %1528  ;;  %v1606_v33 = vpop.permute.xlu2 %1605 }
 0x6eb   : > { %v1545_v4 = vpop.permute.xlu1 %1544 }
 0x6ec   : > { %v1550_v20 = vsel %vm3961_vm9, %v1545_v4, %v1548_v2  ;;  %vm3966_vm9 = vcmask 7168   ;;  %v2125_v2 = vld [vmem:[%s3804_s10] sm:$0xff] }
 0x6ed   : > { %v1553_v27 = vsel %vm3411_vm5, %v1550_v20, 0.0 }
 0x6ee   : > { %v1555_v32 = vrot.slane %v1553_v27, 2  ;;  %v2575_v27 = vld [vmem:[%s3795_s1 + $0x8] sm:$0x3] }
 0x6f2   : > { %v1562_v6 = vpop.permute.xlu0 %1561  ;;  %v1626_v50 = vpop.permute.xlu2 %1625 }
 0x6f3   : > { %v1532_v7 = vpop.permute.xlu1 %1531  ;;  %v1565_v24 = vsel %vm3865_vm13, %v1559_v5, %v1562_v6  ;;  %vm3446_vm13 = vcmp.lt.s32.totalorder %v1536_v52, 3 }
 0x6f4   : > { %v1535_v26 = vsel %vm3864_vm12, %v1529_v3, %v1532_v7  ;;  %v1570_v30 = vsel %vm3420_vm6, %v1565_v24, 0.0  ;;  %vm3967_vm12 = vcmask 121856   ;;  %vm3454_vm14 = vmand %vm3446_vm13, %vm3407_vm15 }
 0x6f5   : > { %v1543_v31 = vsel %vm3429_vm3, %v1535_v26, 0.0  ;;  %v1572_v11 = vrot.slane %v1570_v30, 4 }
 0x6f6   : > { %v1557_v12 = vadd.f32 %v1555_v32, %v1543_v31  ;;  %v2579_v32 = vld [vmem:[%s3797_s3 + $0x60] sm:$0xff] }
 0x6f8   : > { %v1574_v40 = vadd.f32 %v1572_v11, %v1557_v12 }
 0x6fa   : > { %v1592_v28 = vpop.permute.xlu0 %1591  ;;  %v1656_v9 = vpop.permute.xlu2 %1655 }
 0x6fb   : > { %v1576_v22 = vpop.permute.xlu1 %1575 }
 0x6fc   : > { %v1581_v29 = vsel %vm3966_vm9, %v1576_v22, %v1579_v10  ;;  %vm3868_vm9 = vcmask 105472   ;;  %v2571_v10 = vld [vmem:[%s3799_s5 + $0xc] sm:$0xf] }
 0x6fd   : > { %v1584_v34 = vsel %vm3407_vm15, %v1581_v29, 0.0 }
 0x6fe   : > { %v1586_v38 = vrot.slane %v1584_v34, 6 }
 0x700   : > { %v1588_v42 = vadd.f32 %v1586_v38, %v1574_v40  ;;  %v2588_v38 = vld [vmem:[%s3800_s6 + $0x10] sm:$0xf] }
 0x702   : > { %v1609_v45 = vpop.permute.xlu0 %1608  ;;  %v1589_v37 = vadd.f32 %v1588_v42, %v3374_v59 }
 0x703   : > { %v1595_v36 = vpop.permute.xlu1 %1594  ;;  %v1612_v48 = vsel %vm3868_vm9, %v1606_v33, %v1609_v45  ;;  %vm3469_vm9 = vmand %vm3446_vm13, %vm3403_vm0  ;;  %v2581_v33 = vld [vmem:[%s3797_s3 + $0x70] sm:$0x3] }
 0x704   : > { %v1597_v39 = vsel %vm3967_vm12, %v1592_v28, %v1595_v36  ;;  %v1617_v55 = vsel %vm3454_vm14, %v1612_v48, 0.0  ;;  %vm3871_vm12 = vcmask 89088   ;;  %v2586_v36 = vld [vmem:[%s3798_s4 + $0x8] sm:$0x3] }
 0x705   : > { %v1600_v41 = vsel %vm3403_vm0, %v1597_v39, 0.0  ;;  %v1619_v61 = vrot.slane %v1617_v55, 4  ;;  %v2592_v39 = vld [vmem:[%s3796_s2 + $0xa] sm:$0x3] }
 0x706   : > { %v1602_v35 = vrot.slane %v1600_v41, 2 }
 0x708   : > { %v1604_v60 = vadd.f32 %v1602_v35, %v1589_v37 }
 0x70a   : > { %v1621_v0 = vadd.f32 %v1619_v61, %v1604_v60  ;;  %v1639_v59 = vpop.permute.xlu0 %1638 }
 0x70b   : > { %v1623_v51 = vpop.permute.xlu1 %1622 }
 0x70c   : > { %v1629_v53 = vsel %vm3869_vm4, %v1623_v51, %v1626_v50  ;;  %vm3974_vm4 = vcmask 1041408  }
 0x70d   : > { %v1632_v58 = vsel %vm3446_vm13, %v1629_v53, 0.0 }
 0x70e   : > { %v1634_v63 = vrot.slane %v1632_v58, 6 }
 0x710   : > { %v1636_v4 = vadd.f32 %v1634_v63, %v1621_v0 }
 0x712   : > { %v1666_v20 = vpop.permute.xlu0 %1665 }
 0x713   : > { %v1642_v3 = vpop.permute.xlu1 %1641 }
 0x714   : > { %v1645_v5 = vsel %vm3871_vm12, %v1639_v59, %v1642_v3  ;;  %vm3976_vm12 = vcmask 1043456  }
 0x715   : > { %v1649_v6 = vsel %vm3469_vm9, %v1645_v5, 0.0 }
 0x716   : > { %v1650_v7 = vadd.f32 %v1649_v6, %v1636_v4 }
 0x718   : > { %v1658_v52 = vadd.f32 %v1656_v9, %v1650_v7 }
 0x71a   : > { %2573 = vmatpush.msk.msra.mxu3 %vm3974_vm4, %v1658_v52 }
 0x71b   : > { %2574 = vmatmul.msk.f32.vlgmr.msra.gmra.mxu3 %vm3975_vm1, %v2571_v10  ;;  %v1702_v28 = vpop.permute.xlu1 %1701 }
 0x79e   : > { %v1691_v22 = vpop.f32.mrf.mxu3 }
 0x79f   : > { %v1692_v24 = vadd.f32 %v1691_v22, %v1666_v20 }
 0x7a1   : > { %v3482_v26 = vadd.f32 %v1692_v24, %v3319_v49  ;;  %v2580_v49 = vld [vmem:[%s3797_s3 + $0x68] sm:$0xff] }
 0x7a3   : > { %2577 = vmatpush.msk.msrb.mxu2 %vm3976_vm12, %v3482_v26  ;;  %vm3992_vm12 = vcmask 23552  }
 0x7a4   : > { %2578 = vmatmul.msk.f32.vlgmr.msrb.gmra.mxu2 %vm3977_vm2, %v2575_v27  ;;  %vm3979_vm2 = vmmov %vm3975_vm1 }
 0x827   : > { %v1727_v29 = vpop.f32.mrf.mxu2 }
 0x828   : > { %v1728_v30 = vadd.f32 %v1727_v29, %v1702_v28 }
 0x82a   : > { %v1730_v31 = vmax.f32 %v1728_v30, 0.0 }
 0x82c   : > { %2582 = vmatpush.msk.msrb.mxu3 %vm3974_vm4, %v1730_v31  ;;  %vm3993_vm4 = vcmask 39936  }
 0x82d   : > { %2583 = vmatmul.msk.f32.vlgmr.msrb.gmra.mxu3 %vm3975_vm1, %v2579_v32  ;;  %vm3994_vm1 = vcmask 7168  }
 0x835   : > { %2584 = vmatmul.msk.f32.gmra.mxu3 %vm3978_vm11, %v2580_v49  ;;  %vm3991_vm11 = vcmask 31744  }
 0x83d   : > { %2585 = vmatmul.msk.f32.gmra.mxu3 %vm3979_vm2, %v2581_v33  ;;  %vm3995_vm2 = vcmask 121856  }
 0x8b0   : > { %v1764_v34 = vpop.f32.mrf.mxu3 }
 0x8b1   : > { %1774 = vrot.lane.b32.xlu1 %v1764_v34, %s3878_s18  ;;  %1785 = vrot.lane.b32.xlu0 %v1764_v34, %s3980_s20  ;;  %s3988_s18 = smov 12  }
 0x8b2   : > { %1782 = vrot.lane.b32.xlu2 %v1764_v34, %s3981_s14 }
 0x8b8   : > { %v1767_v11 = vpop.f32.mrf.mxu3 }
 0x8b9   : > { %1797 = vrot.lane.b32.xlu1 %v1764_v34, %s3982_s15  ;;  %1794 = vrot.lane.b32.xlu0 %v1764_v34, %s3983_s13 }
 0x8ba   : > { %1777 = vrot.lane.b32.xlu2 %v1764_v34, %s3984_s29 }
 0x8c0   : > { %v1770_v12 = vpop.f32.mrf.mxu3 }
 0x8c1   : > { %1809 = vrot.lane.b32.xlu0 %v1764_v34, %s3938_s26  ;;  %1820 = vrot.lane.b32.xlu1 %v1767_v11, %s3985_s12 }
 0x8c2   : > { %1806 = vrot.lane.b32.xlu2 %v1764_v34, %s3953_s30 }
 0x8c9   : > { %1832 = vrot.lane.b32.xlu0 %v1767_v11, %s3986_s19  ;;  %1835 = vrot.lane.b32.xlu1 %v1767_v11, %s3987_s24 }
 0x8ca   : > { %1823 = vrot.lane.b32.xlu2 %v1767_v11, %s3954_s28 }
 0x8d1   : > { %1847 = vrot.lane.b32.xlu0 %v1767_v11, %s3988_s18  ;;  %1857 = vrot.lane.b32.xlu1 %v1770_v12, %s3882_s22  ;;  %s4007_s22 = smov 117  }
 0x8d2   : > { %1844 = vrot.lane.b32.xlu2 %v1767_v11, %s3989_s0 }
 0x8d9   : > { %1870 = vperm.xlu0 %2688, %v2586_v36   ;;  %1880 = vperm.xlu1 %2686, %v2588_v38  }
 0x8da   : > { %1860 = vrot.lane.b32.xlu2 %v1770_v12, %s3990_s21 }
 0x8e2   : > { %1916 = vperm.xlu2 %2687, %v2592_v39  }
 0x90c   : > { %v1783_v40 = vpop.permute.xlu2 %1782 }
 0x914   : > { %v1778_v41 = vpop.permute.xlu2 %1777 }
 0x91c   : > { %v1807_v35 = vpop.permute.xlu2 %1806 }
 0x923   : > { %v1775_v45 = vpop.permute.xlu1 %1774  ;;  %v1786_v42 = vpop.permute.xlu0 %1785 }
 0x924   : > { %v1788_v51 = vsel %vm3991_vm11, %v1783_v40, %v1786_v42  ;;  %v1824_v37 = vpop.permute.xlu2 %1823  ;;  %v1780_v63 = vsel %vm3993_vm4, %v1775_v45, %v1778_v41  ;;  %vm3996_vm11 = vcmask 105472   ;;  %vm3998_vm4 = vcmask 89088  }
 0x925   : > { %v1789_v55 = vsel %vm3411_vm5, %v1788_v51, 0.0  ;;  %v1781_v5 = vsel %vm3429_vm3, %v1780_v63, 0.0 }
 0x926   : > { %v1791_v0 = vrot.slane %v1789_v55, 2 }
 0x928   : > { %v1793_v6 = vadd.f32 %v1791_v0, %v1781_v5 }
 0x92b   : > { %v1798_v48 = vpop.permute.xlu1 %1797  ;;  %v1795_v50 = vpop.permute.xlu0 %1794 }
 0x92c   : > { %v1800_v53 = vsel %vm3992_vm12, %v1795_v50, %v1798_v48  ;;  %v1845_v52 = vpop.permute.xlu2 %1844  ;;  %vm3997_vm12 = vcmask 97280   ;;  %v2587_v50 = vld [vmem:[%s3799_s5 + $0x10] sm:$0xf] }
 0x92d   : > { %v1801_v58 = vsel %vm3420_vm6, %v1800_v53, 0.0 }
 0x92e   : > { %v1803_v4 = vrot.slane %v1801_v58, 4  ;;  %v2591_v58 = vld [vmem:[%s3795_s1 + $0xa] sm:$0x3] }
 0x930   : > { %v1805_v9 = vadd.f32 %v1803_v4, %v1793_v6 }
 0x933   : > { %v1810_v60 = vpop.permute.xlu0 %1809  ;;  %v1821_v61 = vpop.permute.xlu1 %1820 }
 0x934   : > { %v1812_v59 = vsel %vm3994_vm1, %v1807_v35, %v1810_v60  ;;  %v1826_v24 = vsel %vm3995_vm2, %v1821_v61, %v1824_v37  ;;  %v1861_v36 = vpop.permute.xlu2 %1860  ;;  %vm3999_vm1 = vcmask 1041408   ;;  %vm4000_vm2 = vcmask 15360  }
 0x935   : > { %v1813_v3 = vsel %vm3407_vm15, %v1812_v59, 0.0  ;;  %v1827_v28 = vsel %vm3403_vm0, %v1826_v24, 0.0  ;;  %v2595_v59 = vld [vmem:[%s3797_s3 + $0x78] sm:$0xff] }
 0x936   : > { %v1815_v7 = vrot.slane %v1813_v3, 6  ;;  %v1829_v31 = vrot.slane %v1827_v28, 2  ;;  %v2597_v3 = vld [vmem:[%s3797_s3 + $0x88] sm:$0x3] }
 0x938   : > { %v1817_v22 = vadd.f32 %v1815_v7, %v1805_v9  ;;  %v2602_v7 = vld [vmem:[%s3798_s4 + $0xa] sm:$0x3]  ;;  %v2604_v9 = vld [vmem:[%s3800_s6 + $0x14] sm:$0xf] }
 0x93a   : > { %v1818_v30 = vadd.f32 %v1817_v22, %v1767_v11 }
 0x93b   : > { %v1833_v10 = vpop.permute.xlu0 %1832  ;;  %v1836_v20 = vpop.permute.xlu1 %1835 }
 0x93c   : > { %v1838_v27 = vsel %vm3996_vm11, %v1833_v10, %v1836_v20  ;;  %v1831_v34 = vadd.f32 %v1829_v31, %v1818_v30  ;;  %vm4001_vm11 = vcmask 1043456   ;;  %v1917_v60 = vpop.permute.xlu2 %1916  ;;  %v2555_v10 = vld [vmem:[%s3800_s6 + $0x8] sm:$0xf] }
 0x93d   : > { %v1839_v29 = vsel %vm3454_vm14, %v1838_v27, 0.0 }
 0x93e   : > { %v1841_v32 = vrot.slane %v1839_v29, 4 }
 0x940   : > { %v1843_v39 = vadd.f32 %v1841_v32, %v1831_v34 }
 0x943   : > { %v1848_v49 = vpop.permute.xlu0 %1847  ;;  %v1858_v33 = vpop.permute.xlu1 %1857 }
 0x944   : > { %v1850_v12 = vsel %vm3997_vm12, %v1845_v52, %v1848_v49  ;;  %v1863_v41 = vsel %vm3998_vm4, %v1858_v33, %v1861_v36  ;;  %vm4002_vm12 = vcmask 31744   ;;  %vm4003_vm4 = vmmov %vm3999_vm1  ;;  %v2609_v52 = vld [vmem:[%s3796_s2 + $0xc] sm:$0x3] }
 0x945   : > { %v1851_v38 = vsel %vm3446_vm13, %v1850_v12, 0.0  ;;  %v1864_v42 = vsel %vm3469_vm9, %v1863_v41, 0.0 }
 0x946   : > { %v1853_v40 = vrot.slane %v1851_v38, 6 }
 0x948   : > { %v1855_v45 = vadd.f32 %v1853_v40, %v1843_v39 }
 0x94a   : > { %v1865_v11 = vadd.f32 %v1864_v42, %v1855_v45 }
 0x94b   : > { %v1871_v35 = vpop.permute.xlu0 %1870  ;;  %v1881_v51 = vpop.permute.xlu1 %1880 }
 0x94c   : > { %v1873_v48 = vadd.f32 %v1871_v35, %v1865_v11 }
 0x94e   : > { %2589 = vmatpush.msk.msrb.mxu0 %vm3999_vm1, %v1873_v48  ;;  %vm4004_vm1 = vmmov %vm4000_vm2 }
 0x94f   : > { %2590 = vmatmul.msk.f32.vlgmr.msrb.gmra.mxu0 %vm4000_vm2, %v2587_v50  ;;  %vm4005_vm2 = vmmov %vm4004_vm1 }
 0x9cc   : > { %v1906_v37 = vpop.f32.mrf.mxu0 }
 0x9cd   : > { %v1907_v53 = vadd.f32 %v1906_v37, %v1881_v51 }
 0x9cf   : > { %v3558_v55 = vadd.f32 %v1907_v53, %v3482_v26  ;;  %v2596_v26 = vld [vmem:[%s3797_s3 + $0x80] sm:$0xff] }
 0x9d1   : > { %2593 = vmatpush.msk.msra.mxu2 %vm4001_vm11, %v3558_v55  ;;  %vm4006_vm11 = vmmov %vm4004_vm1 }
 0x9d2   : > { %2594 = vmatmul.msk.f32.vlgmr.msra.gmra.mxu2 %vm4002_vm12, %v2591_v58 }
 0x9d3   : > { %2144 = vmatpush.msrb.mxu2 %v2126_v47 }
 0x9d5   : > { %2145 = vmatpush.msrb.mxu2 %v2125_v2 }
 0xa55   : > { %v1942_v61 = vpop.f32.mrf.mxu2 }
 0xa56   : > { %v1943_v63 = vadd.f32 %v1942_v61, %v1917_v60 }
 0xa58   : > { %v1945_v0 = vmax.f32 %v1943_v63, 0.0 }
 0xa5a   : > { %2598 = vmatpush.msk.msra.mxu0 %vm4003_vm4, %v1945_v0  ;;  %vm4009_vm4 = vcmask 23552  }
 0xa5b   : > { %2599 = vmatmul.msk.f32.vlgmr.msra.gmra.mxu0 %vm4004_vm1, %v2595_v59  ;;  %vm4010_vm1 = vcmask 39936  }
 0xa63   : > { %2600 = vmatmul.msk.f32.gmra.mxu0 %vm4005_vm2, %v2596_v26  ;;  %vm4011_vm2 = vcmask 7168  }
 0xa6b   : > { %2601 = vmatmul.msk.f32.gmra.mxu0 %vm4006_vm11, %v2597_v3  ;;  %vm4012_vm11 = vcmask 121856  }
 0xad8   : > { %v1979_v4 = vpop.f32.mrf.mxu0 }
 0xad9   : > { %1989 = vrot.lane.b32.xlu2 %v1979_v4, %s4007_s22  ;;  %2000 = vrot.lane.b32.xlu1 %v1979_v4, %s3980_s20 }
 0xada   : > { %1997 = vrot.lane.b32.xlu0 %v1979_v4, %s3981_s14  ;;  %s4025_s14 = smov 73  }
 0xae0   : > { %v1982_v5 = vpop.f32.mrf.mxu0 }
 0xae1   : > { %2012 = vrot.lane.b32.xlu2 %v1979_v4, %s3982_s15  ;;  %2009 = vrot.lane.b32.xlu1 %v1979_v4, %s3983_s13  ;;  %s4008_s15 = smov 123  }
 0xae2   : > { %1992 = vrot.lane.b32.xlu0 %v1979_v4, %s3984_s29  ;;  %s4029_s29 = smov 71  }
 0xae8   : > { %v1985_v6 = vpop.f32.mrf.mxu0 }
 0xae9   : > { %2024 = vrot.lane.b32.xlu1 %v1979_v4, %s3938_s26  ;;  %2035 = vrot.lane.b32.xlu2 %v1982_v5, %s3985_s12 }
 0xaea   : > { %2021 = vrot.lane.b32.xlu0 %v1979_v4, %s3953_s30  ;;  %s4027_s30 = smov 72  }
 0xaf1   : > { %2047 = vrot.lane.b32.xlu1 %v1982_v5, %s3986_s19  ;;  %2050 = vrot.lane.b32.xlu2 %v1982_v5, %s3987_s24  ;;  %s4032_s19 = smov 63   ;;  %s4033_s24 = smov 56  }
 0xaf2   : > { %2038 = vrot.lane.b32.xlu0 %v1982_v5, %s3954_s28  ;;  %s4026_s28 = smov 8  }
 0xaf9   : > { %2062 = vrot.lane.b32.xlu1 %v1982_v5, %s3988_s18  ;;  %2072 = vrot.lane.b32.xlu2 %v1985_v6, %s4008_s15  ;;  %s4028_s18 = smov 7  }
 0xafa   : > { %2059 = vrot.lane.b32.xlu0 %v1982_v5, %s3989_s0  ;;  %s4030_s0 = smov 9  }
 0xb01   : > { %2085 = vperm.xlu1 %2686, %v2602_v7   ;;  %2095 = vperm.xlu2 %2687, %v2604_v9  }
 0xb02   : > { %2075 = vrot.lane.b32.xlu0 %v1985_v6, %s3990_s21  ;;  %s4031_s21 = smov 57  }
 0xb09   : > { %2157 = vperm.xlu1 %2686, %v2609_v52  }
 0xb0a   : > { %1370 = vperm.xlu0 %2688, %v2555_v10  }
 0xb33   : > { %v1990_v22 = vpop.permute.xlu2 %1989 }
 0xb3b   : > { %v2013_v29 = vpop.permute.xlu2 %2012 }
 0xb43   : > { %v2036_v36 = vpop.permute.xlu2 %2035 }
 0xb4b   : > { %v2001_v20 = vpop.permute.xlu1 %2000  ;;  %v2051_v37 = vpop.permute.xlu2 %2050 }
 0xb4c   : > { %v1998_v24 = vpop.permute.xlu0 %1997 }
 0xb4d   : > { %v2003_v30 = vsel %vm4002_vm12, %v1998_v24, %v2001_v20 }
 0xb4e   : > { %v2004_v34 = vsel %vm3411_vm5, %v2003_v30, 0.0  ;;  %vm4015_vm5 = vcmask 89088  }
 0xb4f   : > { %v2006_v40 = vrot.slane %v2004_v34, 2 }
 0xb53   : > { %v2010_v27 = vpop.permute.xlu1 %2009  ;;  %v2073_v4 = vpop.permute.xlu2 %2072 }
 0xb54   : > { %v1993_v28 = vpop.permute.xlu0 %1992  ;;  %v2015_v49 = vsel %vm4009_vm4, %v2010_v27, %v2013_v29 }
 0xb55   : > { %v1995_v33 = vsel %vm4010_vm1, %v1990_v22, %v1993_v28  ;;  %v2016_v38 = vsel %vm3420_vm6, %v2015_v49, 0.0  ;;  %vm4013_vm6 = vcmask 105472  }
 0xb56   : > { %v1996_v39 = vsel %vm3429_vm3, %v1995_v33, 0.0  ;;  %v2018_v45 = vrot.slane %v2016_v38, 4  ;;  %vm4014_vm3 = vcmask 97280   ;;  %v2608_v33 = vld [vmem:[%s3795_s1 + $0xc] sm:$0x3] }
 0xb57   : > { %v2008_v42 = vadd.f32 %v2006_v40, %v1996_v39  ;;  %v2614_v38 = vld [vmem:[%s3797_s3 + $0xa0] sm:$0x3] }
 0xb59   : > { %v2020_v50 = vadd.f32 %v2018_v45, %v2008_v42  ;;  %v2619_v45 = vld [vmem:[%s3798_s4 + $0xc] sm:$0x3]  ;;  %v2621_v42 = vld [vmem:[%s3800_s6 + $0x18] sm:$0xf] }
 0xb5b   : > { %v2025_v31 = vpop.permute.xlu1 %2024  ;;  %v2096_v22 = vpop.permute.xlu2 %2095 }
 0xb5c   : > { %v2022_v32 = vpop.permute.xlu0 %2021 }
 0xb5d   : > { %v2027_v12 = vsel %vm4011_vm2, %v2022_v32, %v2025_v31 }
 0xb5e   : > { %v2028_v41 = vsel %vm3407_vm15, %v2027_v12, 0.0  ;;  %vm4017_vm15 = vcmask 15360  }
 0xb5f   : > { %v2030_v48 = vrot.slane %v2028_v41, 6  ;;  %vm4022_vm4 = vmmov %vm4017_vm15 }
 0xb60   : > { %vm4023_vm1 = vmmov %vm4022_vm4 }
 0xb61   : > { %v2032_v19 = vadd.f32 %v2030_v48, %v2020_v50  ;;  %vm4024_vm2 = vmmov %vm4023_vm1 }
 0xb63   : > { %v2048_v11 = vpop.permute.xlu1 %2047  ;;  %v2033_v14 = vadd.f32 %v2032_v19, %v1982_v5 }
 0xb64   : > { %v2039_v35 = vpop.permute.xlu0 %2038  ;;  %v2053_v25 = vsel %vm4013_vm6, %v2048_v11, %v2051_v37  ;;  %v757_v11 = vld [vmem:[%s3800_s6] sm:$0xf]  ;;  %vm4038_vm6 = vcmask 56320  }
 0xb65   : > { %v2041_v15 = vsel %vm4012_vm11, %v2036_v36, %v2039_v35  ;;  %v2054_v63 = vsel %vm3454_vm14, %v2053_v25, 0.0  ;;  %vm4016_vm14 = vcmask 1041408   ;;  %vm4036_vm11 = vcmask 64512  }
 0xb66   : > { %v2042_v51 = vsel %vm3403_vm0, %v2041_v15, 0.0  ;;  %v2056_v26 = vrot.slane %v2054_v63, 4  ;;  %vm4018_vm0 = vcmask 130048   ;;  %v2379_v63 = vld [vmem:[%s4037_s11 + $0x68] sm:$0xff] }
 0xb67   : > { %v2044_v53 = vrot.slane %v2042_v51, 2 }
 0xb69   : > { %v2046_v59 = vadd.f32 %v2044_v53, %v2033_v14  ;;  %v2380_v53 = vld [vmem:[%s4037_s11 + $0x70] sm:$0xff] }
 0xb6a   : > { %2393 = vmatpush.msrb.mxu0 %v2380_v53 }
 0xb6b   : > { %v2063_v58 = vpop.permute.xlu1 %2062  ;;  %v2058_v3 = vadd.f32 %v2056_v26, %v2046_v59  ;;  %v2376_v59 = vld [vmem:[%s4037_s11 + $0x50] sm:$0xff]  ;;  %v2377_v26 = vld [vmem:[%s4037_s11 + $0x58] sm:$0xff] }
 0xb6c   : > { %v2060_v60 = vpop.permute.xlu0 %2059 }
 0xb6d   : > { %v2065_v61 = vsel %vm4014_vm3, %v2060_v60, %v2063_v58  ;;  %v2381_v58 = vld [vmem:[%s4037_s11 + $0x78] sm:$0xff]  ;;  %v2378_v60 = vld [vmem:[%s4037_s11 + $0x60] sm:$0xff]  ;;  %vm4040_vm3 = vcmask 7168  }
 0xb6e   : > { %v2066_v0 = vsel %vm3446_vm13, %v2065_v61, 0.0  ;;  %vm4019_vm13 = vcmask 1043456   ;;  %2394 = vmatpush.msrb.mxu0 %v2378_v60 }
 0xb6f   : > { %v2068_v13 = vrot.slane %v2066_v0, 6 }
 0xb70   : > { %2395 = vmatpush.msrb.mxu0 %v2376_v59 }
 0xb71   : > { %v2070_v7 = vadd.f32 %v2068_v13, %v2058_v3 }
 0xb72   : > { %2396 = vmatpush.msrb.mxu0 %v2374_v17 }
 0xb73   : > { %v2086_v10 = vpop.permute.xlu1 %2085 }
 0xb74   : > { %v2076_v6 = vpop.permute.xlu0 %2075 }
 0xb75   : > { %v2078_v9 = vsel %vm4015_vm5, %v2073_v4, %v2076_v6  ;;  %v2375_v6 = vld [vmem:[%s4037_s11 + $0x48] sm:$0xff]  ;;  %vm4043_vm5 = vcmask 465920  }
 0xb76   : > { %v2079_v5 = vsel %vm3469_vm9, %v2078_v9, 0.0  ;;  %vm4020_vm9 = vmmov %vm4002_vm12 }
 0xb77   : > { %v2080_v52 = vadd.f32 %v2079_v5, %v2070_v7  ;;  %vm4021_vm12 = vmmov %vm4016_vm14 }
 0xb79   : > { %v2088_v20 = vadd.f32 %v2086_v10, %v2080_v52  ;;  %v2372_v52 = vld [vmem:[%s4037_s11 + $0x30] sm:$0xff]  ;;  %v2373_v10 = vld [vmem:[%s4037_s11 + $0x38] sm:$0xff] }
 0xb7a   : > { %2397 = vmatpush.msrb.mxu0 %v2372_v52 }
 0xb7b   : > { %2605 = vmatpush.msk.msrb.mxu1 %vm4016_vm14, %v2088_v20  ;;  %vm4044_vm14 = vnez %v3917_v16 }
 0xb7c   : > { %2606 = vmatmul.msk.f32.vlgmr.msrb.gmra.mxu1 %vm4017_vm15, %v2603_v44  ;;  %v1371_v29 = vpop.permute.xlu0 %1370  ;;  %vm4045_vm15 = vnez %v3929_v46 }
 0xb7d   : > { %v1397_v30 = vadd.f32 %v3366_v56, %v1371_v29  ;;  %v2613_v56 = vld [vmem:[%s3797_s3 + $0x98] sm:$0xff] }
 0xb7f   : > { %v1399_v31 = vadd.f32 %v1397_v30, %v3260_v8  ;;  %v2612_v8 = vld [vmem:[%s3797_s3 + $0x90] sm:$0xff] }
 0xbf9   : > { %v2121_v24 = vpop.f32.mrf.mxu1 }
 0xbfa   : > { %v2122_v27 = vadd.f32 %v2121_v24, %v2096_v22 }
 0xbfc   : > { %v2124_v28 = vadd.f32 %v2122_v27, %v3558_v55  ;;  %v2158_v55 = vpop.permute.xlu1 %2157 }
 0xbfe   : > { %2607 = vmatmul.msk.f32.vlgmr.msrb.gmra.mxu2 %vm4018_vm0, %v2124_v28  ;;  %vm4046_vm0 = vcmask 457728  }
 0xc81   : > { %v2147_v32 = vpop.f32.mrf.mxu2 }
 0xc82   : > { %v3646_v49 = vadd.f32 %v2147_v32, %v1399_v31 }
 0xc84   : > { %2610 = vmatpush.msk.msra.mxu1 %vm4019_vm13, %v3646_v49  ;;  %vm4047_vm13 = vnez %v3927_v43  ;;  %v2370_v43 = vld [vmem:[%s4037_s11 + $0x20] sm:$0xff] }
 0xc85   : > { %2611 = vmatmul.msk.f32.vlgmr.msra.gmra.mxu1 %vm4020_vm9, %v2608_v33  ;;  %vm4048_vm9 = vcmask 449536   ;;  %2398 = vmatpush.msrb.mxu0 %v2370_v43 }
 0xc86   : > { %2413 = vmatpush.msrb.mxu1 %v2381_v58 }
 0xc88   : > { %2414 = vmatpush.msrb.mxu1 %v2379_v63 }
 0xc8a   : > { %2415 = vmatpush.msrb.mxu1 %v2377_v26 }
 0xc8c   : > { %2416 = vmatpush.msrb.mxu1 %v2375_v6 }
 0xc8e   : > { %2417 = vmatpush.msrb.mxu1 %v2373_v10 }
 0xd02   : > { %v2183_v34 = vpop.f32.mrf.mxu1 }
 0xd03   : > { %v2184_v12 = vadd.f32 %v2183_v34, %v2158_v55 }
 0xd05   : > { %v2186_v36 = vmax.f32 %v2184_v12, 0.0 }
 0xd07   : > { %2615 = vmatpush.msk.msra.mxu2 %vm4021_vm12, %v2186_v36  ;;  %vm4049_vm12 = vnez %v3931_v57  ;;  %v2371_v57 = vld [vmem:[%s4037_s11 + $0x28] sm:$0xff] }
 0xd08   : > { %2616 = vmatmul.msk.f32.vlgmr.msra.gmra.mxu2 %vm4022_vm4, %v2612_v8  ;;  %vm4050_vm4 = vcmask 1041408   ;;  %2418 = vmatpush.msrb.mxu1 %v2371_v57 }
 0xd10   : > { %2617 = vmatmul.msk.f32.gmra.mxu2 %vm4023_vm1, %v2613_v56 }
 0xd18   : > { %2618 = vmatmul.msk.f32.gmra.mxu2 %vm4024_vm2, %v2614_v38  ;;  %vm4052_vm2 = vcmask 523264  }
 0xd8b   : > { %v2220_v39 = vpop.f32.mrf.mxu2 }
 0xd8c   : > { %2230 = vrot.lane.b32.xlu1 %v2220_v39, %s4025_s14  ;;  %2241 = vrot.lane.b32.xlu0 %v2220_v39, %s4026_s28 }
 0xd8d   : > { %2238 = vrot.lane.b32.xlu2 %v2220_v39, %s4027_s30 }
 0xd93   : > { %v3673_v40 = vpop.f32.mrf.mxu2 }
 0xd94   : > { %2253 = vrot.lane.b32.xlu1 %v2220_v39, %s4028_s18  ;;  %2250 = vrot.lane.b32.xlu0 %v2220_v39, %s4029_s29 }
 0xd95   : > { %2233 = vrot.lane.b32.xlu2 %v2220_v39, %s4030_s0  ;;  %s4051_s0 = sld [smem:[#allocation6_spill]] }
 0xd9b   : > { %v2226_v41 = vpop.f32.mrf.mxu2 }
 0xd9c   : > { %2265 = vrot.lane.b32.xlu0 %v2220_v39, %s3938_s26  ;;  %2276 = vrot.lane.b32.xlu1 %v3673_v40, %s3985_s12 }
 0xd9d   : > { %2262 = vrot.lane.b32.xlu2 %v2220_v39, %s3939_s23 }
 0xda4   : > { %2288 = vrot.lane.b32.xlu0 %v3673_v40, %s3940_s25  ;;  %2291 = vrot.lane.b32.xlu1 %v3673_v40, %s4031_s21  ;;  %s4055_s21 = sshll.u32 %s4051_s0, 3 }
 0xda5   : > { %2279 = vrot.lane.b32.xlu2 %v3673_v40, %s4032_s19 }
 0xdac   : > { %2303 = vrot.lane.b32.xlu0 %v3673_v40, %s4033_s24  ;;  %2313 = vrot.lane.b32.xlu1 %v2226_v41, %s4034_s17  ;;  %s4056_s17 = sld [smem:[#allocation11_spill]] }
 0xdad   : > { %2300 = vrot.lane.b32.xlu2 %v3673_v40, %s3941_s27 }
 0xdb2   : > { %s403_s26 = scalar_lea.vmem %s4056_s17, %s4055_s21 }
 0xdb4   : > { %2326 = vperm.xlu0 %2688, %v2619_v45   ;;  %2336 = vperm.xlu1 %2686, %v2621_v42  }
 0xdb5   : > { %2316 = vrot.lane.b32.xlu2 %v2226_v41, %s4035_s16 }
 0xdbd   : > { %760 = vperm.xlu2 %2687, %v757_v11  }
 0xde7   : > { %v2239_v35 = vpop.permute.xlu2 %2238 }
 0xdef   : > { %v2234_v48 = vpop.permute.xlu2 %2233 }
 0xdf7   : > { %v2263_v51 = vpop.permute.xlu2 %2262 }
 0xdfe   : > { %v2231_v15 = vpop.permute.xlu1 %2230  ;;  %v2242_v50 = vpop.permute.xlu0 %2241 }
 0xdff   : > { %v2244_v25 = vsel %vm4036_vm11, %v2239_v35, %v2242_v50  ;;  %v2280_v14 = vpop.permute.xlu2 %2279  ;;  %v2620_v35 = vld [vmem:[%s3799_s5 + $0x18] sm:$0xf]  ;;  %v2366_v50 = vld [vmem:[%s4037_s11] sm:$0xff]  ;;  %vm4053_vm11 = vmmov %vm4052_vm2 }
 0xe00   : > { %v2245_v0 = vsel %vm3185_vm7, %v2244_v25, 0.0  ;;  %vm4039_vm7 = vcmask 72704  }
 0xe01   : > { %v2236_v7 = vsel %vm4039_vm7, %v2231_v15, %v2234_v48  ;;  %v2247_v9 = vrot.slane %v2245_v0, 2  ;;  %v2368_v48 = vld [vmem:[%s4037_s11 + $0x10] sm:$0xff]  ;;  %v2369_v15 = vld [vmem:[%s4037_s11 + $0x18] sm:$0xff] }
 0xe02   : > { %2399 = vmatpush.msrb.mxu0 %v2368_v48  ;;  %2419 = vmatpush.msrb.mxu1 %v2369_v15 }
 0xe04   : > { %2400 = vmatpush.msrb.mxu0 %v2366_v50 }
 0xe06   : > { %v2254_v19 = vpop.permute.xlu1 %2253  ;;  %v2251_v37 = vpop.permute.xlu0 %2250 }
 0xe07   : > { %v2256_v61 = vsel %vm4038_vm6, %v2251_v37, %v2254_v19  ;;  %v2301_v22 = vpop.permute.xlu2 %2300  ;;  %vm4054_vm6 = vcmask 1043456  }
 0xe08   : > { %v2257_v13 = vsel %vm3198_vm10, %v2256_v61, 0.0  ;;  %vm4041_vm10 = vnez %v3925_v23  ;;  %vm4057_vm7 = vmmov %vm4054_vm6 }
 0xe09   : > { %v2259_v20 = vrot.slane %v2257_v13, 4  ;;  %v2237_v44 = vsel %vm4041_vm10, %v2236_v7, 0.0 }
 0xe0a   : > { %v2249_v47 = vadd.f32 %v2247_v9, %v2237_v44 }
 0xe0c   : > { %v2261_v18 = vadd.f32 %v2259_v20, %v2249_v47 }
 0xe0e   : > { %v2266_v3 = vpop.permute.xlu0 %2265  ;;  %v2277_v4 = vpop.permute.xlu1 %2276 }
 0xe0f   : > { %v2268_v5 = vsel %vm4040_vm3, %v2263_v51, %v2266_v3  ;;  %v2317_v56 = vpop.permute.xlu2 %2316  ;;  %v2367_v51 = vld [vmem:[%s4037_s11 + $0x8] sm:$0xff] }
 0xe10   : > { %v2269_v21 = vsel %vm3189_vm8, %v2268_v5, 0.0  ;;  %vm4042_vm8 = vcmask 515072   ;;  %2420 = vmatpush.msrb.mxu1 %v2367_v51 }
 0xe11   : > { %v2271_v2 = vrot.slane %v2269_v21, 6  ;;  %v2282_v29 = vsel %vm4042_vm8, %v2277_v4, %v2280_v14 }
 0xe12   : > { %v2283_v31 = vsel %vm4044_vm14, %v2282_v29, 0.0 }
 0xe13   : > { %v2273_v28 = vadd.f32 %v2271_v2, %v2261_v18  ;;  %v2285_v33 = vrot.slane %v2283_v31, 2 }
 0xe15   : > { %v2274_v32 = vadd.f32 %v2273_v28, %v3673_v40 }
 0xe16   : > { %v2289_v24 = vpop.permute.xlu0 %2288  ;;  %v2292_v27 = vpop.permute.xlu1 %2291 }
 0xe17   : > { %v2294_v30 = vsel %vm4043_vm5, %v2289_v24, %v2292_v27  ;;  %v2287_v36 = vadd.f32 %v2285_v33, %v2274_v32  ;;  %v761_v58 = vpop.permute.xlu2 %760 }
 0xe18   : > { %v2295_v23 = vsel %vm4045_vm15, %v2294_v30, 0.0  ;;  %v810_v60 = vadd.f32 %v3147_v62, %v761_v58  ;;  %v790_v61 = vadd.f32 %v3132_v54, %v761_v58 }
 0xe19   : > { %v2297_v55 = vrot.slane %v2295_v23, 4 }
 0xe1a   : > { %v814_v14 = vrot.slane %v810_v60, 4 }
 0xe1b   : > { %v2299_v39 = vadd.f32 %v2297_v55, %v2287_v36 }
 0xe1c   : > { %v815_v63 = vsel %vm4054_vm6, %v790_v61, %v814_v14 }
 0xe1d   : > { %v817_v26 = vadd.f32 %v815_v63, %v2848_v1 }
 0xe1e   : > { %v2304_v34 = vpop.permute.xlu0 %2303  ;;  %v2314_v12 = vpop.permute.xlu1 %2313 }
 0xe1f   : > { %v2306_v8 = vsel %vm4046_vm0, %v2301_v22, %v2304_v34  ;;  %v2319_v16 = vsel %vm4048_vm9, %v2314_v12, %v2317_v56 }
 0xe20   : > { %v2307_v38 = vsel %vm4047_vm13, %v2306_v8, 0.0  ;;  %v2320_v46 = vsel %vm4049_vm12, %v2319_v16, 0.0 }
 0xe21   : > { %v2309_v41 = vrot.slane %v2307_v38, 6 }
 0xe23   : > { %v2311_v45 = vadd.f32 %v2309_v41, %v2299_v39 }
 0xe25   : > { %v2321_v40 = vadd.f32 %v2320_v46, %v2311_v45 }
 0xe26   : > { %v2327_v42 = vpop.permute.xlu0 %2326  ;;  %v2337_v19 = vpop.permute.xlu1 %2336 }
 0xe27   : > { %v2329_v11 = vadd.f32 %v2327_v42, %v2321_v40 }
 0xe29   : > { %2622 = vmatpush.msk.msra.mxu3 %vm4050_vm4, %v2329_v11 }
 0xe2a   : > { %2623 = vmatmul.msk.f32.vlgmr.msra.gmra.mxu3 %vm4023_vm1, %v2620_v35 }
 0xead   : > { %v2362_v37 = vpop.f32.mrf.mxu3 }
 0xeae   : > { %v2363_v25 = vadd.f32 %v2362_v37, %v2337_v19 }
 0xeb0   : > { %v2365_v53 = vadd.f32 %v2363_v25, %v3646_v49 }
 0xeb2   : > { %2624 = vmatmul.msk.f32.vlgmr.msrb.gmra.mxu0 %vm4052_vm2, %v2365_v53  ;;  %2625 = vmatmul.msk.f32.vlgmr.msrb.gmra.mxu1 %vm4053_vm11, %v2365_v53 }
 0xf2f   : > { %v2422_v0 = vpop.f32.mrf.mxu1  ;;  %v2402_v13 = vpop.f32.mrf.mxu0 }
 0xf30   : > { %v2427_v59 = vrot.slane %v2422_v0, 4 }
 0xf32   : > { %v2428_v49 = vsel %vm4057_vm7, %v2402_v13, %v2427_v59 }
 0xf33   : > { %v2430_v3 = vadd.f32 %v2428_v49, %v817_v26 }
 0xf35   : > { %2431 = vst [vmem:[%s403_s26] sm:$0xff] %v2430_v3 }
 0xf36 PF: > { %s4058_s23 = sld [smem:[#allocation5_spill]] }
 0xf3c   : > { %s22_s17 = sadd.s32 1, %s4058_s23  }
 0xf3d   : > { %p19_p7 = scmp.ge.s32.totalorder %s22_s17, 4  }
 0xf3f   :  { %21 = sbr.rel (!%p19_p7) target bundleno = 7 (0x7), region = 135 }
 0xf44   :  { %2453 = vsyncpa [#allocation3], 1 }
 0xf45   :  { %2455 = vsyncpa [#allocation3 + $0x1], 1 }

</bundles_post_ra>
